<compile_context>
chip_gen: v6e
topology: v6e:2x2x1
jax: 0.10.0
libtpu: 0.0.40
codegen_flags: <defaults>
</compile_context>

<pallas_src>
import functools
import math

import jax
import jax.numpy as jnp
from jax.experimental import pallas as pl
from jax.experimental.pallas import tpu as pltpu


# ----------------------- small BERT-like configuration ------------------------
HIDDEN = 128          # lane-dense (multiple of 128)
N_HEADS = 2
HEAD_DIM = HIDDEN // N_HEADS
FFN = 4 * HIDDEN
N_LAYERS = 2
VOCAB = 1000
MAX_POS = 512
TYPE_VOCAB = 2
LN_EPS = 1e-12        # BERT default layer-norm eps


# --------------------------- fused encoder kernel ------------------------------

def _encoder_kernel(tok_ref, pt_ref, mask_ref, embg_ref, embb_ref,
                    wqkv_ref, bqkv_ref, wo_ref, bo_ref, ln1g_ref, ln1b_ref,
                    wi_ref, bi_ref, wo2_ref, bo2_ref, ln2g_ref, ln2b_ref,
                    out_ref, *, n_heads, head_dim):
    """grid = (batch, layer). out block index is constant across the layer axis, so the
    (S, H) activation stays resident in VMEM and is carried layer -> layer."""
    layer = pl.program_id(1)

    def ln(x, g, b):                                   # f32 LayerNorm over last dim
        mu = jnp.mean(x, axis=-1, keepdims=True)
        xc = x - mu
        var = jnp.mean(xc * xc, axis=-1, keepdims=True)
        return xc * jax.lax.rsqrt(var + LN_EPS) * g + b

    # Layer 0: embedding add (token + position/type) + embedding LayerNorm, written into
    # the VMEM-resident output block that carries the activation across layers.
    @pl.when(layer == 0)
    def _():
        e = tok_ref[0].astype(jnp.float32) + pt_ref[...]
        out_ref[0] = ln(e, embg_ref[...], embb_ref[...]).astype(out_ref.dtype)

    x = out_ref[0].astype(jnp.float32)                 # (S, H) carried activation
    x_bf = x.astype(jnp.bfloat16)
    hidden = x.shape[-1]

    # ---- fused QKV projection: one lane-dense (S, 3H) MXU pass ----
    qkv = jnp.dot(x_bf, wqkv_ref[0], preferred_element_type=jnp.float32) + bqkv_ref[0]
    q = qkv[:, :hidden]
    k = qkv[:, hidden:2 * hidden]
    v = qkv[:, 2 * hidden:]

    # ---- per-head attention, fully in VMEM; f32 softmax, bf16 MXU operands ----
    mask = mask_ref[0]                                 # (1, S) additive key bias
    scale = 1.0 / math.sqrt(head_dim)
    ctx_heads = []
    for h in range(n_heads):
        sl = slice(h * head_dim, (h + 1) * head_dim)
        qh = q[:, sl].astype(jnp.bfloat16)
        kh = k[:, sl].astype(jnp.bfloat16)
        vh = v[:, sl].astype(jnp.bfloat16)
        s = jax.lax.dot_general(qh, kh, (((1,), (1,)), ((), ())),
                                preferred_element_type=jnp.float32) * scale + mask
        m = jnp.max(s, axis=-1, keepdims=True)
        p = jnp.exp(s - m)
        denom = jnp.sum(p, axis=-1, keepdims=True)
        ch = jnp.dot(p.astype(jnp.bfloat16), vh, preferred_element_type=jnp.float32)
        ctx_heads.append(ch * pl.reciprocal(denom, approx=True))
    # lane-dense (S, H) context, heads adjacent on the lane axis -> full-width contraction
    ctx = jnp.concatenate(ctx_heads, axis=-1)

    # ---- attention output projection + residual + LayerNorm (fused) ----
    a = jnp.dot(ctx.astype(jnp.bfloat16), wo_ref[0],
                preferred_element_type=jnp.float32) + bo_ref[0] + x
    x1 = ln(a, ln1g_ref[0], ln1b_ref[0])

    # ---- FFN: GELU(x1 @ wi + bi) @ wo2 + bo2 + residual + LayerNorm (fused) ----
    hin = jnp.dot(x1.astype(jnp.bfloat16), wi_ref[0],
                  preferred_element_type=jnp.float32) + bi_ref[0]
    c = math.sqrt(2.0 / math.pi)
    hact = 0.5 * hin * (1.0 + jnp.tanh(c * (hin + 0.044715 * hin * hin * hin)))
    b2 = jnp.dot(hact.astype(jnp.bfloat16), wo2_ref[0],
                 preferred_element_type=jnp.float32) + bo2_ref[0] + x1
    out_ref[0] = ln(b2, ln2g_ref[0], ln2b_ref[0]).astype(out_ref.dtype)


def _encoder(params, tok, pos_typ, mask_bias, *, B, S):
    H, F, L = HIDDEN, FFN, N_LAYERS
    kernel = functools.partial(_encoder_kernel, n_heads=N_HEADS, head_dim=HEAD_DIM)

    def rep(shape):   # per-layer weight: block index depends only on the layer axis
        return pl.BlockSpec(shape, lambda b, l: (l,) + (0,) * (len(shape) - 1))

    def const(shape):  # layer/batch-invariant input
        return pl.BlockSpec(shape, lambda b, l: (0,) * len(shape))

    return pl.pallas_call(
        kernel,
        out_shape=jax.ShapeDtypeStruct((B, S, H), jnp.float32),
        grid=(B, L),
        in_specs=[
            pl.BlockSpec((1, S, H), lambda b, l: (b, 0, 0)),   # token embeddings
            const((S, H)),                                     # pos + token-type embedding
            pl.BlockSpec((1, 1, S), lambda b, l: (b, 0, 0)),   # additive attention mask
            const((1, H)), const((1, H)),                      # embedding LN gamma/beta
            rep((1, H, 3 * H)), rep((1, 1, 3 * H)),            # fused QKV weight / bias
            rep((1, H, H)), rep((1, 1, H)),                    # attn out proj
            rep((1, 1, H)), rep((1, 1, H)),                    # LN1 gamma/beta
            rep((1, H, F)), rep((1, 1, F)),                    # FFN in
            rep((1, F, H)), rep((1, 1, H)),                    # FFN out
            rep((1, 1, H)), rep((1, 1, H)),                    # LN2 gamma/beta
        ],
        out_specs=pl.BlockSpec((1, S, H), lambda b, l: (b, 0, 0)),
        compiler_params=pltpu.CompilerParams(
            dimension_semantics=("parallel", "arbitrary")),
    )(tok, pos_typ, mask_bias,
      params["emb_ln_g"], params["emb_ln_b"],
      params["wqkv"], params["bqkv"], params["wo"], params["bo"],
      params["ln1_g"], params["ln1_b"],
      params["wi"], params["bi"], params["wo2"], params["bo2"],
      params["ln2_g"], params["ln2_b"])


# ------------------------------ model wrapper ----------------------------------

def text_feature_extract(params, input_ids, attention_mask):
    """input_ids, attention_mask: (B, S) int32 -> CLS embedding (B, HIDDEN)."""
    B, S = input_ids.shape
    # Embedding gather (wrapper glue); position/type embedding sum precomputed at init.
    tok = jnp.take(params["word_emb"], input_ids, axis=0)              # (B, S, H)
    pos_typ = jax.lax.slice(params["pos_type_emb"], (0, 0), (S, HIDDEN))
    # BERT-style additive attention mask: 0 where attended, -1e4 where padded.
    mask_bias = ((1.0 - attention_mask.astype(jnp.float32)) * -10000.0).reshape(B, 1, S)

    last_hidden = _encoder(params, tok, pos_typ, mask_bias, B=B, S=S)
    return last_hidden[:, 0, :]                                         # CLS embedding


# ------------------------------- param init ------------------------------------

def init_params(key):
    def rnd(k, shape, scale=0.02):
        return jax.random.normal(k, shape, jnp.float32) * scale

    keys = jax.random.split(key, 3 + N_LAYERS)
    word_emb = rnd(keys[0], (VOCAB, HIDDEN))
    pos_emb = rnd(keys[1], (MAX_POS, HIDDEN))
    type_emb = rnd(keys[2], (TYPE_VOCAB, HIDDEN))

    params = {
        "word_emb": word_emb,
        # token_type_ids are all zero in this module -> fold type_emb[0] into positions.
        "pos_type_emb": pos_emb + type_emb[0][None, :],
        "emb_ln_g": jnp.ones((1, HIDDEN), jnp.float32),
        "emb_ln_b": jnp.zeros((1, HIDDEN), jnp.float32),
    }

    wqkv, bqkv, wo, bo, wi, bi, wo2, bo2 = ([] for _ in range(8))
    for li in range(N_LAYERS):
        ks = jax.random.split(keys[3 + li], 8)
        wqkv.append(rnd(ks[0], (HIDDEN, 3 * HIDDEN)))      # pre-transposed (in, out)
        bqkv.append(rnd(ks[1], (1, 3 * HIDDEN), 0.01))
        wo.append(rnd(ks[2], (HIDDEN, HIDDEN)))
        bo.append(rnd(ks[3], (1, HIDDEN), 0.01))
        wi.append(rnd(ks[4], (HIDDEN, FFN)))
        bi.append(rnd(ks[5], (1, FFN), 0.01))
        wo2.append(rnd(ks[6], (FFN, HIDDEN)))
        bo2.append(rnd(ks[7], (1, HIDDEN), 0.01))

    stack = lambda xs: jnp.stack(xs, axis=0)
    ones = jnp.ones((N_LAYERS, 1, HIDDEN), jnp.float32)
    zeros = jnp.zeros((N_LAYERS, 1, HIDDEN), jnp.float32)
    params.update({
        # MXU operands stored bf16 (f32 accumulation in-kernel); biases/LN stay f32.
        "wqkv": stack(wqkv).astype(jnp.bfloat16), "bqkv": stack(bqkv),
        "wo": stack(wo).astype(jnp.bfloat16), "bo": stack(bo),
        "ln1_g": ones, "ln1_b": zeros,
        "wi": stack(wi).astype(jnp.bfloat16), "bi": stack(bi),
        "wo2": stack(wo2).astype(jnp.bfloat16), "bo2": stack(bo2),
        "ln2_g": ones, "ln2_b": zeros,
    })
    return params


# ---------------------------- pure-JAX reference --------------------------------

def _reference_forward(params, input_ids, attention_mask):
    B, S = input_ids.shape
    tok = jnp.take(params["word_emb"], input_ids, axis=0)
    x = tok + params["pos_type_emb"][:S][None]

    def ln(v, g, b):
        mu = v.mean(-1, keepdims=True)
        var = ((v - mu) ** 2).mean(-1, keepdims=True)
        return (v - mu) * jax.lax.rsqrt(var + LN_EPS) * g + b

    x = ln(x, params["emb_ln_g"][0], params["emb_ln_b"][0])
    bias = (1.0 - attention_mask.astype(jnp.float32)) * -10000.0
    c = math.sqrt(2.0 / math.pi)
    for li in range(N_LAYERS):
        qkv = x @ params["wqkv"][li].astype(jnp.float32) + params["bqkv"][li]
        q, k, v = jnp.split(qkv, 3, axis=-1)

        def heads(t):
            return t.reshape(B, S, N_HEADS, HEAD_DIM).transpose(0, 2, 1, 3)

        s = jnp.einsum("bhqd,bhkd->bhqk", heads(q), heads(k)) / math.sqrt(HEAD_DIM)
        s = s + bias[:, None, None, :]
        p = jax.nn.softmax(s, axis=-1)
        ctx = (jnp.einsum("bhqk,bhkd->bhqd", p, heads(v))
                  .transpose(0, 2, 1, 3).reshape(B, S, HIDDEN))
        x = ln(ctx @ params["wo"][li].astype(jnp.float32) + params["bo"][li] + x,
               params["ln1_g"][li], params["ln1_b"][li])
        h = x @ params["wi"][li].astype(jnp.float32) + params["bi"][li]
        h = 0.5 * h * (1.0 + jnp.tanh(c * (h + 0.044715 * h ** 3)))
        x = ln(h @ params["wo2"][li].astype(jnp.float32) + params["bo2"][li] + x,
               params["ln2_g"][li], params["ln2_b"][li])
    return x[:, 0, :]


# ------------------------------------ main --------------------------------------

if __name__ == "__main__":
    key = jax.random.PRNGKey(0)
    k_params, k_ids = jax.random.split(key)

    B, S = 2, 128
    params = init_params(k_params)
    input_ids = jax.random.randint(k_ids, (B, S), 0, VOCAB, dtype=jnp.int32)
    # last 32 positions are padding (mask = 0)
    attention_mask = jnp.concatenate(
        [jnp.ones((B, S - 32), jnp.int32), jnp.zeros((B, 32), jnp.int32)], axis=1)

    fwd = jax.jit(text_feature_extract)
    cls = jax.block_until_ready(fwd(params, input_ids, attention_mask))

    assert cls.shape == (B, HIDDEN), cls.shape
    assert bool(jnp.isfinite(cls).all())

    # f32 'highest'-precision reference using the same (bf16-stored) weights.
    with jax.default_matmul_precision("highest"):
        ref = _reference_forward(params, input_ids, attention_mask)
    max_diff = float(jnp.max(jnp.abs(cls - ref)))
    assert max_diff < 5e-2, f"mismatch vs reference: {max_diff}"

    print("KERNEL_OK")
</pallas_src>

<mosaic_0001>
module attributes {stable_mosaic.version = 11 : i64} {
  func.func @_encoder_kernel(%arg0: i32, %arg1: i32, %arg2: memref<1x128x128xf32, #tpu.memory_space<vmem>>, %arg3: memref<128x128xf32, #tpu.memory_space<vmem>>, %arg4: memref<1x1x128xf32, #tpu.memory_space<vmem>>, %arg5: memref<1x128xf32, #tpu.memory_space<vmem>>, %arg6: memref<1x128xf32, #tpu.memory_space<vmem>>, %arg7: memref<1x128x384xbf16, #tpu.memory_space<vmem>>, %arg8: memref<1x1x384xf32, #tpu.memory_space<vmem>>, %arg9: memref<1x128x128xbf16, #tpu.memory_space<vmem>>, %arg10: memref<1x1x128xf32, #tpu.memory_space<vmem>>, %arg11: memref<1x1x128xf32, #tpu.memory_space<vmem>>, %arg12: memref<1x1x128xf32, #tpu.memory_space<vmem>>, %arg13: memref<1x128x512xbf16, #tpu.memory_space<vmem>>, %arg14: memref<1x1x512xf32, #tpu.memory_space<vmem>>, %arg15: memref<1x512x128xbf16, #tpu.memory_space<vmem>>, %arg16: memref<1x1x128xf32, #tpu.memory_space<vmem>>, %arg17: memref<1x1x128xf32, #tpu.memory_space<vmem>>, %arg18: memref<1x1x128xf32, #tpu.memory_space<vmem>>, %arg19: memref<1x128x128xf32, #tpu.memory_space<vmem>>) attributes {dimension_semantics = [#tpu.dimension_semantics<parallel>, #tpu.dimension_semantics<arbitrary>], iteration_bounds = array<i64: 2, 2>, scalar_prefetch = 0 : i64, scratch_operands = 0 : i64, tpu.core_type = #tpu.core_type<tc>, window_params = [{transform_indices = @transform_0, window_bounds = array<i64: 1, 128, 128>}, {pipeline_mode = #tpu.pipeline_mode<synchronous>, transform_indices = @transform_1, window_bounds = array<i64: 128, 128>}, {transform_indices = @transform_2, window_bounds = array<i64: 1, 1, 128>}, {pipeline_mode = #tpu.pipeline_mode<synchronous>, transform_indices = @transform_3, window_bounds = array<i64: 1, 128>}, {pipeline_mode = #tpu.pipeline_mode<synchronous>, transform_indices = @transform_4, window_bounds = array<i64: 1, 128>}, {transform_indices = @transform_5, window_bounds = array<i64: 1, 128, 384>}, {transform_indices = @transform_6, window_bounds = array<i64: 1, 1, 384>}, {transform_indices = @transform_7, window_bounds = array<i64: 1, 128, 128>}, {transform_indices = @transform_8, window_bounds = array<i64: 1, 1, 128>}, {transform_indices = @transform_9, window_bounds = array<i64: 1, 1, 128>}, {transform_indices = @transform_10, window_bounds = array<i64: 1, 1, 128>}, {transform_indices = @transform_11, window_bounds = array<i64: 1, 128, 512>}, {transform_indices = @transform_12, window_bounds = array<i64: 1, 1, 512>}, {transform_indices = @transform_13, window_bounds = array<i64: 1, 512, 128>}, {transform_indices = @transform_14, window_bounds = array<i64: 1, 1, 128>}, {transform_indices = @transform_15, window_bounds = array<i64: 1, 1, 128>}, {transform_indices = @transform_16, window_bounds = array<i64: 1, 1, 128>}, {transform_indices = @transform_17, window_bounds = array<i64: 1, 128, 128>}]} {
    %c0_i32 = arith.constant 0 : i32
    %0 = arith.cmpi eq, %arg1, %c0_i32 : i32
    %1 = arith.extui %0 : i1 to i32
    %c0_i32_0 = arith.constant 0 : i32
    %2 = arith.cmpi ne, %1, %c0_i32_0 : i32
    scf.if %2 {
      %c0_72 = arith.constant 0 : index
      %c0_73 = arith.constant 0 : index
      %c0_74 = arith.constant 0 : index
      %155 = vector.load %arg2[%c0_72, %c0_73, %c0_74] : memref<1x128x128xf32, #tpu.memory_space<vmem>>, vector<1x128x128xf32>
      %156 = vector.shape_cast %155 : vector<1x128x128xf32> to vector<128x128xf32>
      %c0_75 = arith.constant 0 : index
      %c0_76 = arith.constant 0 : index
      %157 = vector.load %arg3[%c0_75, %c0_76] : memref<128x128xf32, #tpu.memory_space<vmem>>, vector<128x128xf32>
      %158 = arith.addf %156, %157 : vector<128x128xf32>
      %c0_77 = arith.constant 0 : index
      %c0_78 = arith.constant 0 : index
      %159 = vector.load %arg5[%c0_77, %c0_78] : memref<1x128xf32, #tpu.memory_space<vmem>>, vector<1x128xf32>
      %c0_79 = arith.constant 0 : index
      %c0_80 = arith.constant 0 : index
      %160 = vector.load %arg6[%c0_79, %c0_80] : memref<1x128xf32, #tpu.memory_space<vmem>>, vector<1x128xf32>
      %cst_81 = arith.constant dense<0.000000e+00> : vector<128xf32>
      %161 = vector.multi_reduction <add>, %158, %cst_81 [1] : vector<128x128xf32> to vector<128xf32>
      %162 = vector.shape_cast %161 : vector<128xf32> to vector<128x1xf32>
      %cst_82 = arith.constant 1.280000e+02 : f32
      %163 = vector.broadcast %cst_82 : f32 to vector<128x1xf32>
      %164 = arith.divf %162, %163 : vector<128x1xf32>
      %165 = vector.broadcast %164 : vector<128x1xf32> to vector<128x128xf32>
      %166 = arith.subf %158, %165 : vector<128x128xf32>
      %167 = arith.mulf %166, %166 : vector<128x128xf32>
      %cst_83 = arith.constant dense<0.000000e+00> : vector<128xf32>
      %168 = vector.multi_reduction <add>, %167, %cst_83 [1] : vector<128x128xf32> to vector<128xf32>
      %169 = vector.shape_cast %168 : vector<128xf32> to vector<128x1xf32>
      %cst_84 = arith.constant 1.280000e+02 : f32
      %170 = vector.broadcast %cst_84 : f32 to vector<128x1xf32>
      %171 = arith.divf %169, %170 : vector<128x1xf32>
      %cst_85 = arith.constant 9.99999996E-13 : f32
      %172 = vector.broadcast %cst_85 : f32 to vector<128x1xf32>
      %173 = arith.addf %171, %172 : vector<128x1xf32>
      %174 = math.rsqrt %173 : vector<128x1xf32>
      %175 = vector.broadcast %174 : vector<128x1xf32> to vector<128x128xf32>
      %176 = arith.mulf %166, %175 : vector<128x128xf32>
      %177 = vector.broadcast %159 : vector<1x128xf32> to vector<128x128xf32>
      %178 = arith.mulf %176, %177 : vector<128x128xf32>
      %179 = vector.broadcast %160 : vector<1x128xf32> to vector<128x128xf32>
      %180 = arith.addf %178, %179 : vector<128x128xf32>
      %c0_86 = arith.constant 0 : index
      %c0_87 = arith.constant 0 : index
      %c0_88 = arith.constant 0 : index
      %181 = vector.load %arg19[%c0_86, %c0_87, %c0_88] : memref<1x128x128xf32, #tpu.memory_space<vmem>>, vector<1x128x128xf32>
      %182 = vector.shape_cast %181 : vector<1x128x128xf32> to vector<128x128xf32>
      %183 = vector.shape_cast %180 : vector<128x128xf32> to vector<1x128x128xf32>
      tpu.vector_store %arg19[%c0_86, %c0_87, %c0_88], %183 {strides = array<i32>} : memref<1x128x128xf32, #tpu.memory_space<vmem>>, vector<1x128x128xf32>,
    } else {
    }
    %c0 = arith.constant 0 : index
    %c0_1 = arith.constant 0 : index
    %c0_2 = arith.constant 0 : index
    %3 = vector.load %arg19[%c0, %c0_1, %c0_2] : memref<1x128x128xf32, #tpu.memory_space<vmem>>, vector<1x128x128xf32>
    %4 = vector.shape_cast %3 : vector<1x128x128xf32> to vector<128x128xf32>
    %5 = arith.truncf %4 : vector<128x128xf32> to vector<128x128xbf16>
    %c0_3 = arith.constant 0 : index
    %c0_4 = arith.constant 0 : index
    %c0_5 = arith.constant 0 : index
    %6 = vector.load %arg7[%c0_3, %c0_4, %c0_5] : memref<1x128x384xbf16, #tpu.memory_space<vmem>>, vector<1x128x384xbf16>
    %7 = vector.shape_cast %6 : vector<1x128x384xbf16> to vector<128x384xbf16>
    %cst = arith.constant dense<0.000000e+00> : vector<128x384xf32>
    %8 = tpu.matmul %5, %7, %cst {dimension_numbers = #tpu.dot_dimension_numbers<[1], [0], [0], [1], [0, 0, 1, 1], [], []>} : vector<128x128xbf16>, vector<128x384xbf16>, vector<128x384xf32> -> vector<128x384xf32>
    %c0_6 = arith.constant 0 : index
    %c0_7 = arith.constant 0 : index
    %c0_8 = arith.constant 0 : index
    %9 = vector.load %arg8[%c0_6, %c0_7, %c0_8] : memref<1x1x384xf32, #tpu.memory_space<vmem>>, vector<1x1x384xf32>
    %10 = vector.shape_cast %9 : vector<1x1x384xf32> to vector<1x384xf32>
    %11 = vector.broadcast %10 : vector<1x384xf32> to vector<128x384xf32>
    %12 = arith.addf %8, %11 : vector<128x384xf32>
    %13 = vector.extract_strided_slice %12 {offsets = [0, 0], sizes = [128, 128], strides = [1, 1]} : vector<128x384xf32> to vector<128x128xf32>
    %14 = vector.extract_strided_slice %12 {offsets = [0, 128], sizes = [128, 128], strides = [1, 1]} : vector<128x384xf32> to vector<128x128xf32>
    %15 = vector.extract_strided_slice %12 {offsets = [0, 256], sizes = [128, 128], strides = [1, 1]} : vector<128x384xf32> to vector<128x128xf32>
    %c0_9 = arith.constant 0 : index
    %c0_10 = arith.constant 0 : index
    %c0_11 = arith.constant 0 : index
    %16 = vector.load %arg4[%c0_9, %c0_10, %c0_11] : memref<1x1x128xf32, #tpu.memory_space<vmem>>, vector<1x1x128xf32>
    %17 = vector.shape_cast %16 : vector<1x1x128xf32> to vector<1x128xf32>
    %18 = vector.extract_strided_slice %13 {offsets = [0, 0], sizes = [128, 64], strides = [1, 1]} : vector<128x128xf32> to vector<128x64xf32>
    %19 = arith.truncf %18 : vector<128x64xf32> to vector<128x64xbf16>
    %20 = vector.extract_strided_slice %14 {offsets = [0, 0], sizes = [128, 64], strides = [1, 1]} : vector<128x128xf32> to vector<128x64xf32>
    %21 = arith.truncf %20 : vector<128x64xf32> to vector<128x64xbf16>
    %22 = vector.extract_strided_slice %15 {offsets = [0, 0], sizes = [128, 64], strides = [1, 1]} : vector<128x128xf32> to vector<128x64xf32>
    %23 = arith.truncf %22 : vector<128x64xf32> to vector<128x64xbf16>
    %cst_12 = arith.constant dense<0.000000e+00> : vector<128x128xf32>
    %24 = tpu.matmul %19, %21, %cst_12 {dimension_numbers = #tpu.dot_dimension_numbers<[1], [1], [0], [0], [0, 0, 1, 0], [], []>} : vector<128x64xbf16>, vector<128x64xbf16>, vector<128x128xf32> -> vector<128x128xf32>
    %cst_13 = arith.constant 1.250000e-01 : f32
    %25 = vector.broadcast %cst_13 : f32 to vector<128x128xf32>
    %26 = arith.mulf %24, %25 : vector<128x128xf32>
    %27 = vector.broadcast %17 : vector<1x128xf32> to vector<128x128xf32>
    %28 = arith.addf %26, %27 : vector<128x128xf32>
    %cst_14 = arith.constant dense<0xFF800000> : vector<128xf32>
    %29 = vector.multi_reduction <maximumf>, %28, %cst_14 [1] : vector<128x128xf32> to vector<128xf32>
    %30 = vector.shape_cast %29 : vector<128xf32> to vector<128x1xf32>
    %31 = vector.broadcast %30 : vector<128x1xf32> to vector<128x128xf32>
    %32 = arith.subf %28, %31 : vector<128x128xf32>
    %33 = math.exp %32 : vector<128x128xf32>
    %cst_15 = arith.constant dense<0.000000e+00> : vector<128xf32>
    %34 = vector.multi_reduction <add>, %33, %cst_15 [1] : vector<128x128xf32> to vector<128xf32>
    %35 = vector.shape_cast %34 : vector<128xf32> to vector<128x1xf32>
    %36 = arith.truncf %33 : vector<128x128xf32> to vector<128x128xbf16>
    %cst_16 = arith.constant dense<0.000000e+00> : vector<128x64xf32>
    %37 = tpu.matmul %36, %23, %cst_16 {dimension_numbers = #tpu.dot_dimension_numbers<[1], [0], [0], [1], [0, 0, 1, 1], [], []>} : vector<128x128xbf16>, vector<128x64xbf16>, vector<128x64xf32> -> vector<128x64xf32>
    %38 = tpu.reciprocal %35 {approx = true} : vector<128x1xf32> -> vector<128x1xf32>
    %39 = vector.broadcast %38 : vector<128x1xf32> to vector<128x64xf32>
    %40 = arith.mulf %37, %39 : vector<128x64xf32>
    %41 = vector.extract_strided_slice %13 {offsets = [0, 64], sizes = [128, 64], strides = [1, 1]} : vector<128x128xf32> to vector<128x64xf32>
    %42 = arith.truncf %41 : vector<128x64xf32> to vector<128x64xbf16>
    %43 = vector.extract_strided_slice %14 {offsets = [0, 64], sizes = [128, 64], strides = [1, 1]} : vector<128x128xf32> to vector<128x64xf32>
    %44 = arith.truncf %43 : vector<128x64xf32> to vector<128x64xbf16>
    %45 = vector.extract_strided_slice %15 {offsets = [0, 64], sizes = [128, 64], strides = [1, 1]} : vector<128x128xf32> to vector<128x64xf32>
    %46 = arith.truncf %45 : vector<128x64xf32> to vector<128x64xbf16>
    %cst_17 = arith.constant dense<0.000000e+00> : vector<128x128xf32>
    %47 = tpu.matmul %42, %44, %cst_17 {dimension_numbers = #tpu.dot_dimension_numbers<[1], [1], [0], [0], [0, 0, 1, 0], [], []>} : vector<128x64xbf16>, vector<128x64xbf16>, vector<128x128xf32> -> vector<128x128xf32>
    %cst_18 = arith.constant 1.250000e-01 : f32
    %48 = vector.broadcast %cst_18 : f32 to vector<128x128xf32>
    %49 = arith.mulf %47, %48 : vector<128x128xf32>
    %50 = vector.broadcast %17 : vector<1x128xf32> to vector<128x128xf32>
    %51 = arith.addf %49, %50 : vector<128x128xf32>
    %cst_19 = arith.constant dense<0xFF800000> : vector<128xf32>
    %52 = vector.multi_reduction <maximumf>, %51, %cst_19 [1] : vector<128x128xf32> to vector<128xf32>
    %53 = vector.shape_cast %52 : vector<128xf32> to vector<128x1xf32>
    %54 = vector.broadcast %53 : vector<128x1xf32> to vector<128x128xf32>
    %55 = arith.subf %51, %54 : vector<128x128xf32>
    %56 = math.exp %55 : vector<128x128xf32>
    %cst_20 = arith.constant dense<0.000000e+00> : vector<128xf32>
    %57 = vector.multi_reduction <add>, %56, %cst_20 [1] : vector<128x128xf32> to vector<128xf32>
    %58 = vector.shape_cast %57 : vector<128xf32> to vector<128x1xf32>
    %59 = arith.truncf %56 : vector<128x128xf32> to vector<128x128xbf16>
    %cst_21 = arith.constant dense<0.000000e+00> : vector<128x64xf32>
    %60 = tpu.matmul %59, %46, %cst_21 {dimension_numbers = #tpu.dot_dimension_numbers<[1], [0], [0], [1], [0, 0, 1, 1], [], []>} : vector<128x128xbf16>, vector<128x64xbf16>, vector<128x64xf32> -> vector<128x64xf32>
    %61 = tpu.reciprocal %58 {approx = true} : vector<128x1xf32> -> vector<128x1xf32>
    %62 = vector.broadcast %61 : vector<128x1xf32> to vector<128x64xf32>
    %63 = arith.mulf %60, %62 : vector<128x64xf32>
    %64 = tpu.concatenate %40, %63 in 1 : vector<128x64xf32>, vector<128x64xf32> -> vector<128x128xf32>
    %65 = arith.truncf %64 : vector<128x128xf32> to vector<128x128xbf16>
    %c0_22 = arith.constant 0 : index
    %c0_23 = arith.constant 0 : index
    %c0_24 = arith.constant 0 : index
    %66 = vector.load %arg9[%c0_22, %c0_23, %c0_24] : memref<1x128x128xbf16, #tpu.memory_space<vmem>>, vector<1x128x128xbf16>
    %67 = vector.shape_cast %66 : vector<1x128x128xbf16> to vector<128x128xbf16>
    %cst_25 = arith.constant dense<0.000000e+00> : vector<128x128xf32>
    %68 = tpu.matmul %65, %67, %cst_25 {dimension_numbers = #tpu.dot_dimension_numbers<[1], [0], [0], [1], [0, 0, 1, 1], [], []>} : vector<128x128xbf16>, vector<128x128xbf16>, vector<128x128xf32> -> vector<128x128xf32>
    %c0_26 = arith.constant 0 : index
    %c0_27 = arith.constant 0 : index
    %c0_28 = arith.constant 0 : index
    %69 = vector.load %arg10[%c0_26, %c0_27, %c0_28] : memref<1x1x128xf32, #tpu.memory_space<vmem>>, vector<1x1x128xf32>
    %70 = vector.shape_cast %69 : vector<1x1x128xf32> to vector<1x128xf32>
    %71 = vector.broadcast %70 : vector<1x128xf32> to vector<128x128xf32>
    %72 = arith.addf %68, %71 : vector<128x128xf32>
    %73 = arith.addf %72, %4 : vector<128x128xf32>
    %c0_29 = arith.constant 0 : index
    %c0_30 = arith.constant 0 : index
    %c0_31 = arith.constant 0 : index
    %74 = vector.load %arg11[%c0_29, %c0_30, %c0_31] : memref<1x1x128xf32, #tpu.memory_space<vmem>>, vector<1x1x128xf32>
    %75 = vector.shape_cast %74 : vector<1x1x128xf32> to vector<1x128xf32>
    %c0_32 = arith.constant 0 : index
    %c0_33 = arith.constant 0 : index
    %c0_34 = arith.constant 0 : index
    %76 = vector.load %arg12[%c0_32, %c0_33, %c0_34] : memref<1x1x128xf32, #tpu.memory_space<vmem>>, vector<1x1x128xf32>
    %77 = vector.shape_cast %76 : vector<1x1x128xf32> to vector<1x128xf32>
    %cst_35 = arith.constant dense<0.000000e+00> : vector<128xf32>
    %78 = vector.multi_reduction <add>, %73, %cst_35 [1] : vector<128x128xf32> to vector<128xf32>
    %79 = vector.shape_cast %78 : vector<128xf32> to vector<128x1xf32>
    %cst_36 = arith.constant 1.280000e+02 : f32
    %80 = vector.broadcast %cst_36 : f32 to vector<128x1xf32>
    %81 = arith.divf %79, %80 : vector<128x1xf32>
    %82 = vector.broadcast %81 : vector<128x1xf32> to vector<128x128xf32>
    %83 = arith.subf %73, %82 : vector<128x128xf32>
    %84 = arith.mulf %83, %83 : vector<128x128xf32>
    %cst_37 = arith.constant dense<0.000000e+00> : vector<128xf32>
    %85 = vector.multi_reduction <add>, %84, %cst_37 [1] : vector<128x128xf32> to vector<128xf32>
    %86 = vector.shape_cast %85 : vector<128xf32> to vector<128x1xf32>
    %cst_38 = arith.constant 1.280000e+02 : f32
    %87 = vector.broadcast %cst_38 : f32 to vector<128x1xf32>
    %88 = arith.divf %86, %87 : vector<128x1xf32>
    %cst_39 = arith.constant 9.99999996E-13 : f32
    %89 = vector.broadcast %cst_39 : f32 to vector<128x1xf32>
    %90 = arith.addf %88, %89 : vector<128x1xf32>
    %91 = math.rsqrt %90 : vector<128x1xf32>
    %92 = vector.broadcast %91 : vector<128x1xf32> to vector<128x128xf32>
    %93 = arith.mulf %83, %92 : vector<128x128xf32>
    %94 = vector.broadcast %75 : vector<1x128xf32> to vector<128x128xf32>
    %95 = arith.mulf %93, %94 : vector<128x128xf32>
    %96 = vector.broadcast %77 : vector<1x128xf32> to vector<128x128xf32>
    %97 = arith.addf %95, %96 : vector<128x128xf32>
    %98 = arith.truncf %97 : vector<128x128xf32> to vector<128x128xbf16>
    %c0_40 = arith.constant 0 : index
    %c0_41 = arith.constant 0 : index
    %c0_42 = arith.constant 0 : index
    %99 = vector.load %arg13[%c0_40, %c0_41, %c0_42] : memref<1x128x512xbf16, #tpu.memory_space<vmem>>, vector<1x128x512xbf16>
    %100 = vector.shape_cast %99 : vector<1x128x512xbf16> to vector<128x512xbf16>
    %cst_43 = arith.constant dense<0.000000e+00> : vector<128x512xf32>
    %101 = tpu.matmul %98, %100, %cst_43 {dimension_numbers = #tpu.dot_dimension_numbers<[1], [0], [0], [1], [0, 0, 1, 1], [], []>} : vector<128x128xbf16>, vector<128x512xbf16>, vector<128x512xf32> -> vector<128x512xf32>
    %c0_44 = arith.constant 0 : index
    %c0_45 = arith.constant 0 : index
    %c0_46 = arith.constant 0 : index
    %102 = vector.load %arg14[%c0_44, %c0_45, %c0_46] : memref<1x1x512xf32, #tpu.memory_space<vmem>>, vector<1x1x512xf32>
    %103 = vector.shape_cast %102 : vector<1x1x512xf32> to vector<1x512xf32>
    %104 = vector.broadcast %103 : vector<1x512xf32> to vector<128x512xf32>
    %105 = arith.addf %101, %104 : vector<128x512xf32>
    %cst_47 = arith.constant 5.000000e-01 : f32
    %106 = vector.broadcast %cst_47 : f32 to vector<128x512xf32>
    %107 = arith.mulf %106, %105 : vector<128x512xf32>
    %cst_48 = arith.constant 4.471500e-02 : f32
    %108 = vector.broadcast %cst_48 : f32 to vector<128x512xf32>
    %109 = arith.mulf %108, %105 : vector<128x512xf32>
    %110 = arith.mulf %109, %105 : vector<128x512xf32>
    %111 = arith.mulf %110, %105 : vector<128x512xf32>
    %112 = arith.addf %105, %111 : vector<128x512xf32>
    %cst_49 = arith.constant 0.797884583 : f32
    %113 = vector.broadcast %cst_49 : f32 to vector<128x512xf32>
    %114 = arith.mulf %113, %112 : vector<128x512xf32>
    %115 = math.tanh %114 : vector<128x512xf32>
    %cst_50 = arith.constant 1.000000e+00 : f32
    %116 = vector.broadcast %cst_50 : f32 to vector<128x512xf32>
    %117 = arith.addf %116, %115 : vector<128x512xf32>
    %118 = arith.mulf %107, %117 : vector<128x512xf32>
    %119 = arith.truncf %118 : vector<128x512xf32> to vector<128x512xbf16>
    %c0_51 = arith.constant 0 : index
    %c0_52 = arith.constant 0 : index
    %c0_53 = arith.constant 0 : index
    %120 = vector.load %arg15[%c0_51, %c0_52, %c0_53] : memref<1x512x128xbf16, #tpu.memory_space<vmem>>, vector<1x512x128xbf16>
    %121 = vector.shape_cast %120 : vector<1x512x128xbf16> to vector<512x128xbf16>
    %cst_54 = arith.constant dense<0.000000e+00> : vector<128x128xf32>
    %122 = tpu.matmul %119, %121, %cst_54 {dimension_numbers = #tpu.dot_dimension_numbers<[1], [0], [0], [1], [0, 0, 1, 1], [], []>} : vector<128x512xbf16>, vector<512x128xbf16>, vector<128x128xf32> -> vector<128x128xf32>
    %c0_55 = arith.constant 0 : index
    %c0_56 = arith.constant 0 : index
    %c0_57 = arith.constant 0 : index
    %123 = vector.load %arg16[%c0_55, %c0_56, %c0_57] : memref<1x1x128xf32, #tpu.memory_space<vmem>>, vector<1x1x128xf32>
    %124 = vector.shape_cast %123 : vector<1x1x128xf32> to vector<1x128xf32>
    %125 = vector.broadcast %124 : vector<1x128xf32> to vector<128x128xf32>
    %126 = arith.addf %122, %125 : vector<128x128xf32>
    %127 = arith.addf %126, %97 : vector<128x128xf32>
    %c0_58 = arith.constant 0 : index
    %c0_59 = arith.constant 0 : index
    %c0_60 = arith.constant 0 : index
    %128 = vector.load %arg17[%c0_58, %c0_59, %c0_60] : memref<1x1x128xf32, #tpu.memory_space<vmem>>, vector<1x1x128xf32>
    %129 = vector.shape_cast %128 : vector<1x1x128xf32> to vector<1x128xf32>
    %c0_61 = arith.constant 0 : index
    %c0_62 = arith.constant 0 : index
    %c0_63 = arith.constant 0 : index
    %130 = vector.load %arg18[%c0_61, %c0_62, %c0_63] : memref<1x1x128xf32, #tpu.memory_space<vmem>>, vector<1x1x128xf32>
    %131 = vector.shape_cast %130 : vector<1x1x128xf32> to vector<1x128xf32>
    %cst_64 = arith.constant dense<0.000000e+00> : vector<128xf32>
    %132 = vector.multi_reduction <add>, %127, %cst_64 [1] : vector<128x128xf32> to vector<128xf32>
    %133 = vector.shape_cast %132 : vector<128xf32> to vector<128x1xf32>
    %cst_65 = arith.constant 1.280000e+02 : f32
    %134 = vector.broadcast %cst_65 : f32 to vector<128x1xf32>
    %135 = arith.divf %133, %134 : vector<128x1xf32>
    %136 = vector.broadcast %135 : vector<128x1xf32> to vector<128x128xf32>
    %137 = arith.subf %127, %136 : vector<128x128xf32>
    %138 = arith.mulf %137, %137 : vector<128x128xf32>
    %cst_66 = arith.constant dense<0.000000e+00> : vector<128xf32>
    %139 = vector.multi_reduction <add>, %138, %cst_66 [1] : vector<128x128xf32> to vector<128xf32>
    %140 = vector.shape_cast %139 : vector<128xf32> to vector<128x1xf32>
    %cst_67 = arith.constant 1.280000e+02 : f32
    %141 = vector.broadcast %cst_67 : f32 to vector<128x1xf32>
    %142 = arith.divf %140, %141 : vector<128x1xf32>
    %cst_68 = arith.constant 9.99999996E-13 : f32
    %143 = vector.broadcast %cst_68 : f32 to vector<128x1xf32>
    %144 = arith.addf %142, %143 : vector<128x1xf32>
    %145 = math.rsqrt %144 : vector<128x1xf32>
    %146 = vector.broadcast %145 : vector<128x1xf32> to vector<128x128xf32>
    %147 = arith.mulf %137, %146 : vector<128x128xf32>
    %148 = vector.broadcast %129 : vector<1x128xf32> to vector<128x128xf32>
    %149 = arith.mulf %147, %148 : vector<128x128xf32>
    %150 = vector.broadcast %131 : vector<1x128xf32> to vector<128x128xf32>
    %151 = arith.addf %149, %150 : vector<128x128xf32>
    %c0_69 = arith.constant 0 : index
    %c0_70 = arith.constant 0 : index
    %c0_71 = arith.constant 0 : index
    %152 = vector.load %arg19[%c0_69, %c0_70, %c0_71] : memref<1x128x128xf32, #tpu.memory_space<vmem>>, vector<1x128x128xf32>
    %153 = vector.shape_cast %152 : vector<1x128x128xf32> to vector<128x128xf32>
    %154 = vector.shape_cast %151 : vector<128x128xf32> to vector<1x128x128xf32>
    tpu.vector_store %arg19[%c0_69, %c0_70, %c0_71], %154 {strides = array<i32>} : memref<1x128x128xf32, #tpu.memory_space<vmem>>, vector<1x128x128xf32>,
    return
  }
  func.func @transform_0(%arg0: i32, %arg1: i32) -> (i32, i32, i32) {
    %c0_i32 = arith.constant 0 : i32
    %c0_i32_0 = arith.constant 0 : i32
    %c0_i32_1 = arith.constant 0 : i32
    return %arg0, %c0_i32, %c0_i32_0 : i32, i32, i32
  }
  func.func @transform_1(%arg0: i32, %arg1: i32) -> (i32, i32) {
    %c0_i32 = arith.constant 0 : i32
    %c0_i32_0 = arith.constant 0 : i32
    %c0_i32_1 = arith.constant 0 : i32
    return %c0_i32, %c0_i32_0 : i32, i32
  }
  func.func @transform_2(%arg0: i32, %arg1: i32) -> (i32, i32, i32) {
    %c0_i32 = arith.constant 0 : i32
    %c0_i32_0 = arith.constant 0 : i32
    %c0_i32_1 = arith.constant 0 : i32
    return %arg0, %c0_i32, %c0_i32_0 : i32, i32, i32
  }
  func.func @transform_3(%arg0: i32, %arg1: i32) -> (i32, i32) {
    %c0_i32 = arith.constant 0 : i32
    %c0_i32_0 = arith.constant 0 : i32
    %c0_i32_1 = arith.constant 0 : i32
    return %c0_i32, %c0_i32_0 : i32, i32
  }
  func.func @transform_4(%arg0: i32, %arg1: i32) -> (i32, i32) {
    %c0_i32 = arith.constant 0 : i32
    %c0_i32_0 = arith.constant 0 : i32
    %c0_i32_1 = arith.constant 0 : i32
    return %c0_i32, %c0_i32_0 : i32, i32
  }
  func.func @transform_5(%arg0: i32, %arg1: i32) -> (i32, i32, i32) {
    %c0_i32 = arith.constant 0 : i32
    %c0_i32_0 = arith.constant 0 : i32
    %c0_i32_1 = arith.constant 0 : i32
    return %arg1, %c0_i32, %c0_i32_0 : i32, i32, i32
  }
  func.func @transform_6(%arg0: i32, %arg1: i32) -> (i32, i32, i32) {
    %c0_i32 = arith.constant 0 : i32
    %c0_i32_0 = arith.constant 0 : i32
    %c0_i32_1 = arith.constant 0 : i32
    return %arg1, %c0_i32, %c0_i32_0 : i32, i32, i32
  }
  func.func @transform_7(%arg0: i32, %arg1: i32) -> (i32, i32, i32) {
    %c0_i32 = arith.constant 0 : i32
    %c0_i32_0 = arith.constant 0 : i32
    %c0_i32_1 = arith.constant 0 : i32
    return %arg1, %c0_i32, %c0_i32_0 : i32, i32, i32
  }
  func.func @transform_8(%arg0: i32, %arg1: i32) -> (i32, i32, i32) {
    %c0_i32 = arith.constant 0 : i32
    %c0_i32_0 = arith.constant 0 : i32
    %c0_i32_1 = arith.constant 0 : i32
    return %arg1, %c0_i32, %c0_i32_0 : i32, i32, i32
  }
  func.func @transform_9(%arg0: i32, %arg1: i32) -> (i32, i32, i32) {
    %c0_i32 = arith.constant 0 : i32
    %c0_i32_0 = arith.constant 0 : i32
    %c0_i32_1 = arith.constant 0 : i32
    return %arg1, %c0_i32, %c0_i32_0 : i32, i32, i32
  }
  func.func @transform_10(%arg0: i32, %arg1: i32) -> (i32, i32, i32) {
    %c0_i32 = arith.constant 0 : i32
    %c0_i32_0 = arith.constant 0 : i32
    %c0_i32_1 = arith.constant 0 : i32
    return %arg1, %c0_i32, %c0_i32_0 : i32, i32, i32
  }
  func.func @transform_11(%arg0: i32, %arg1: i32) -> (i32, i32, i32) {
    %c0_i32 = arith.constant 0 : i32
    %c0_i32_0 = arith.constant 0 : i32
    %c0_i32_1 = arith.constant 0 : i32
    return %arg1, %c0_i32, %c0_i32_0 : i32, i32, i32
  }
  func.func @transform_12(%arg0: i32, %arg1: i32) -> (i32, i32, i32) {
    %c0_i32 = arith.constant 0 : i32
    %c0_i32_0 = arith.constant 0 : i32
    %c0_i32_1 = arith.constant 0 : i32
    return %arg1, %c0_i32, %c0_i32_0 : i32, i32, i32
  }
  func.func @transform_13(%arg0: i32, %arg1: i32) -> (i32, i32, i32) {
    %c0_i32 = arith.constant 0 : i32
    %c0_i32_0 = arith.constant 0 : i32
    %c0_i32_1 = arith.constant 0 : i32
    return %arg1, %c0_i32, %c0_i32_0 : i32, i32, i32
  }
  func.func @transform_14(%arg0: i32, %arg1: i32) -> (i32, i32, i32) {
    %c0_i32 = arith.constant 0 : i32
    %c0_i32_0 = arith.constant 0 : i32
    %c0_i32_1 = arith.constant 0 : i32
    return %arg1, %c0_i32, %c0_i32_0 : i32, i32, i32
  }
  func.func @transform_15(%arg0: i32, %arg1: i32) -> (i32, i32, i32) {
    %c0_i32 = arith.constant 0 : i32
    %c0_i32_0 = arith.constant 0 : i32
    %c0_i32_1 = arith.constant 0 : i32
    return %arg1, %c0_i32, %c0_i32_0 : i32, i32, i32
  }
  func.func @transform_16(%arg0: i32, %arg1: i32) -> (i32, i32, i32) {
    %c0_i32 = arith.constant 0 : i32
    %c0_i32_0 = arith.constant 0 : i32
    %c0_i32_1 = arith.constant 0 : i32
    return %arg1, %c0_i32, %c0_i32_0 : i32, i32, i32
  }
  func.func @transform_17(%arg0: i32, %arg1: i32) -> (i32, i32, i32) {
    %c0_i32 = arith.constant 0 : i32
    %c0_i32_0 = arith.constant 0 : i32
    %c0_i32_1 = arith.constant 0 : i32
    return %arg0, %c0_i32, %c0_i32_0 : i32, i32, i32
  }
}

</mosaic_0001>

<bundles_post_ra>
// kernel: text_feature_extract.1
= control target key start
LH: loop header
LB: loop body
LE: loop exit
PB: predicated region body
PF: predicated region fallthrough
CT: control target
= control target key end

     0   :  { %s6201_s24 = smov 0   ;;  %s6203_s25 = smov 0   ;;  %s8763_s0 = inlined_call_operand.vmem [shape: f32[2,128,128], index: 0, kind: input, shape index: {}]   ;;  %s8764_s1 = inlined_call_operand.vmem [shape: f32[128,128], index: 1, kind: input, shape index: {}]   ;;  %s8765_s2 = inlined_call_operand.vmem [shape: f32[2,1,128], index: 2, kind: input, shape index: {}]   ;;  %s8766_s3 = inlined_call_operand.vmem [shape: f32[1,128], index: 3, kind: input, shape index: {}]   ;;  %s8767_s4 = inlined_call_operand.vmem [shape: f32[1,128], index: 4, kind: input, shape index: {}]   ;;  %s8768_s5 = inlined_call_operand.vmem [shape: bf16[2,128,384], index: 5, kind: input, shape index: {}]   ;;  %s8769_s6 = inlined_call_operand.vmem [shape: f32[2,1,384], index: 6, kind: input, shape index: {}]   ;;  %s8770_s7 = inlined_call_operand.vmem [shape: bf16[2,128,128], index: 7, kind: input, shape index: {}]   ;;  %s8771_s8 = inlined_call_operand.vmem [shape: f32[2,1,128], index: 8, kind: input, shape index: {}]   ;;  %s8772_s9 = inlined_call_operand.vmem [shape: f32[2,1,128], index: 9, kind: input, shape index: {}]   ;;  %s8773_s10 = inlined_call_operand.vmem [shape: f32[2,1,128], index: 10, kind: input, shape index: {}]   ;;  %s8774_s11 = inlined_call_operand.vmem [shape: bf16[2,128,512], index: 11, kind: input, shape index: {}]   ;;  %s8775_s12 = inlined_call_operand.vmem [shape: f32[2,1,512], index: 12, kind: input, shape index: {}]   ;;  %s8776_s13 = inlined_call_operand.vmem [shape: bf16[2,512,128], index: 13, kind: input, shape index: {}]   ;;  %s8777_s14 = inlined_call_operand.vmem [shape: f32[2,1,128], index: 14, kind: input, shape index: {}]   ;;  %s8778_s15 = inlined_call_operand.vmem [shape: f32[2,1,128], index: 15, kind: input, shape index: {}]   ;;  %s8779_s16 = inlined_call_operand.vmem [shape: f32[2,1,128], index: 16, kind: input, shape index: {}]   ;;  %s8780_s17 = inlined_call_operand.vmem [shape: f32[2,128,128], index: 17, kind: output, shape index: {}]  }
   0x1   :  { %8835 = sst [smem:[#allocation50_spill]] %s8763_s0  ;;  %s6205_s26 = smov 0  }
   0x2   :  { %8836 = sst [smem:[#allocation51_spill]] %s8764_s1  ;;  %s6207_s27 = smov 0  }
   0x3   :  { %8837 = sst [smem:[#allocation52_spill]] %s8765_s2  ;;  %s6209_s28 = smov 0  }
   0x4   :  { %8838 = sst [smem:[#allocation53_spill]] %s8766_s3 }
   0x5   :  { %8839 = sst [smem:[#allocation54_spill]] %s8767_s4 }
   0x6   :  { %8840 = sst [smem:[#allocation55_spill]] %s8768_s5 }
   0x7   :  { %8841 = sst [smem:[#allocation56_spill]] %s8769_s6 }
   0x8   :  { %8842 = sst [smem:[#allocation57_spill]] %s8770_s7 }
   0x9   :  { %8843 = sst [smem:[#allocation58_spill]] %s8774_s11 }
   0xa   :  { %8844 = sst [smem:[#allocation59_spill]] %s8775_s12 }
   0xb   :  { %8845 = sst [smem:[#allocation60_spill]] %s8780_s17 }
   0xc LB: > { %8846 = sst [smem:[#allocation2_spill]] %s6091_s24  ;;  %s36_s29 = sadd.s32 1, %s6099_s26  ;;  %s6107_s28 = sphi %s6209_s28, %s27_s28   ;;  %s6103_s27 = sphi %s6207_s27, %s8974_s27   ;;  %s6099_s26 = sphi %s6205_s26, %s8973_s26   ;;  %s6095_s25 = sphi %s6203_s25, %s8972_s25   ;;  %s6091_s24 = sphi %s6201_s24, %s8971_s24  }
   0xd   : > { %8847 = sst [smem:[#allocation3_spill]] %s6099_s26  ;;  %s39_s0 = sadd.s32 1, %s6103_s27 }
   0xe   : > { %8848 = sst [smem:[#allocation4_spill]] %s6103_s27  ;;  %p37_p0 = scmp.ge.s32.totalorder %s36_s29, 2 }
   0xf   : > { %8849 = sst [smem:[#allocation5_spill]] %s6107_s28  ;;  %p4907_p1 = scmp.ge.s32.totalorder %s6107_s28, 1 }
  0x10   : > { %p613_p2 = scmp.lt.s32.totalorder %s6107_s28, 5  ;;  %s8976_s29 = smov (%p37_p0, %s36_s29), 0 }
  0x11   : > { %8850 = sst [smem:[#allocation6_spill]] %s8976_s29  ;;  %s8978_s0 = smov (!%p37_p0, %s39_s0), %s6103_s27 }
  0x12   : > { %p614_p3 = pnand %p4907_p1, %p613_p2  ;;  %p41_p4 = scmp.ge.s32.totalorder %s8978_s0, 2 }
  0x14   : > { %s8980_s0 = smov (%p41_p4, %s8978_s0), 0  ;;  %617 = sbr.rel (%p614_p3) target bundleno = 3323 (0xcfb), region = 88 }
  0x15   : > { %8851 = sst [smem:[#allocation7_spill]] %s8980_s0 }
  0x19   : > { %p714_p5 = scmp.lt.s32.totalorder %s6095_s25, 1  ;;  %p722_p6 = scmp.lt.s32.totalorder %s6091_s24, 1 }
  0x1a   : > { %s8854_s23 = sld [smem:[#allocation50_spill]] }
  0x1b   : > { %s8982_s25 = smov (!%p714_p5, %s6095_s25), 1  ;;  %s8856_s5 = sld [smem:[#allocation55_spill]] }
  0x1c   : > { %8852 = sst [smem:[#allocation8_spill]] %s8982_s25  ;;  %s5044_s18 = sshll.u32 %s8982_s25, 7 }
  0x1d   : > { %s6237_s30 = scalar_select %p722_p6, %s6091_s24, 1 }
  0x1e   : > { %s8857_s7 = sld [smem:[#allocation57_spill]] }
  0x1f   : > { %s5497_s29 = smul.u32 192, %s6237_s30  ;;  %s5045_s26 = sshll.u32 %s6237_s30, 6 }
  0x20   : > { %s6247_s0 = scalar_lea.vmem %s8854_s23, %s5044_s18  ;;  %s5498_s27 = smul.u32 3, %s6237_s30 }
  0x21   : > { %8855 = sst [smem:[#allocation9_spill]] %s6247_s0  ;;  %s6255_s3 = scalar_lea.vmem %s8856_s5, %s5497_s29 }
  0x22   : > { %s8858_s6 = sld [smem:[#allocation56_spill]]  ;;  %s5046_s17 = sshll.u32 %s6237_s30, 8 }
  0x23   : > { %s4915_s24 = sshll.u32 %s6237_s30, 2  ;;  %s8859_s11 = sld [smem:[#allocation58_spill]] }
  0x24   : > { %s6260_s19 = scalar_lea.vmem %s8857_s7, %s5045_s26  ;;  %s8860_s12 = sld [smem:[#allocation59_spill]] }
  0x25   : > { %s6294_s25 = scalar_lea.vmem %s8776_s13, %s5046_s17  ;;  %s761_s29 = scalar_lea.vmem %s8777_s14, %s6237_s30 }
  0x26   : > { %s764_s7 = scalar_lea.vmem %s8778_s15, %s6237_s30  ;;  %s8861_s21 = sld [smem:[#allocation60_spill]] }
  0x27   : > { %s8862_s2 = sld [smem:[#allocation2_spill]] }
  0x28   : > { %s6265_s22 = scalar_lea.vmem %s8858_s6, %s5498_s27 }
  0x29   : > { %s6284_s1 = scalar_lea.vmem %s8859_s11, %s5046_s17  ;;  %s767_s11 = scalar_lea.vmem %s8779_s16, %s6237_s30 }
  0x2a   : > { %s6289_s20 = scalar_lea.vmem %s8860_s12, %s4915_s24 }
  0x2c   : > { %s6311_s12 = scalar_lea.vmem %s8861_s21, %s5044_s18 }
  0x2d   : > { %p4920_p7 = scmp.ne.s32.totalorder %s8862_s2, 0 }
  0x2e   : > { %s8863_s17 = sld [smem:[#allocation9_spill]] (!%p4920_p7) }
  0x2f   : > { %777 = sbr.rel (%p4920_p7) target bundleno = 395 (0x18b), region = 92  ;;  %s8864_s23 = sld [smem:[#allocation51_spill]] (!%p4920_p7) }
  0x30   : > { %s8865_s5 = sld [smem:[#allocation53_spill]] (!%p4920_p7) }
  0x31   : > { %s8866_s18 = sld [smem:[#allocation54_spill]] (!%p4920_p7) }
  0x34   : > { %v778_v0 = vld [vmem:[%s8863_s17] sm:$0xff]  ;;  %v780_v2 = vld [vmem:[%s8863_s17 + $0x10] sm:$0xff]  ;;  %v779_v5 = vld [vmem:[%s8863_s17 + $0x8] sm:$0xff] }
  0x35   : > { %v794_v1 = vld [vmem:[%s8864_s23] sm:$0xff]  ;;  %v796_v4 = vld [vmem:[%s8864_s23 + $0x10] sm:$0xff]  ;;  %v795_v6 = vld [vmem:[%s8864_s23 + $0x8] sm:$0xff] }
  0x36   : > { %v6319_v3 = vadd.f32 %v794_v1, %v778_v0  ;;  %v812_v7 = vadd.f32 %v796_v4, %v780_v2  ;;  %v781_v8 = vld [vmem:[%s8863_s17 + $0x18] sm:$0xff]  ;;  %v6333_v10 = vadd.f32 %v795_v6, %v779_v5  ;;  %v782_v12 = vld [vmem:[%s8863_s17 + $0x20] sm:$0xff]  ;;  %v783_v14 = vld [vmem:[%s8863_s17 + $0x28] sm:$0xff] }
  0x37   : > { %v797_v9 = vld [vmem:[%s8864_s23 + $0x18] sm:$0xff]  ;;  %v798_v13 = vld [vmem:[%s8864_s23 + $0x20] sm:$0xff]  ;;  %v799_v15 = vld [vmem:[%s8864_s23 + $0x28] sm:$0xff] }
  0x38   : > { %828 = vadd.xlane.f32.xlu0 %v6319_v3  ;;  %832 = vadd.xlane.f32.xlu1 %v812_v7  ;;  %v6335_v11 = vadd.f32 %v797_v9, %v781_v8  ;;  %v6346_v16 = vadd.f32 %v798_v13, %v782_v12  ;;  %v6349_v17 = vadd.f32 %v799_v15, %v783_v14  ;;  %v784_v18 = vld [vmem:[%s8863_s17 + $0x30] sm:$0xff]  ;;  %v785_v20 = vld [vmem:[%s8863_s17 + $0x38] sm:$0xff]  ;;  %v786_v24 = vld [vmem:[%s8863_s17 + $0x40] sm:$0xff] }
  0x39   : > { %v800_v19 = vld [vmem:[%s8864_s23 + $0x30] sm:$0xff]  ;;  %v801_v21 = vld [vmem:[%s8864_s23 + $0x38] sm:$0xff]  ;;  %v802_v25 = vld [vmem:[%s8864_s23 + $0x40] sm:$0xff] }
  0x3a   : > { %v6360_v22 = vadd.f32 %v800_v19, %v784_v18  ;;  %v6363_v23 = vadd.f32 %v801_v21, %v785_v20  ;;  %v787_v26 = vld [vmem:[%s8863_s17 + $0x48] sm:$0xff]  ;;  %v6374_v28 = vadd.f32 %v802_v25, %v786_v24  ;;  %v788_v30 = vld [vmem:[%s8863_s17 + $0x50] sm:$0xff]  ;;  %v789_v32 = vld [vmem:[%s8863_s17 + $0x58] sm:$0xff] }
  0x3b   : > { %v803_v27 = vld [vmem:[%s8864_s23 + $0x48] sm:$0xff]  ;;  %v804_v31 = vld [vmem:[%s8864_s23 + $0x50] sm:$0xff]  ;;  %v805_v33 = vld [vmem:[%s8864_s23 + $0x58] sm:$0xff] }
  0x3c   : > { %830 = vadd.xlane.f32.xlu0 %v6333_v10  ;;  %834 = vadd.xlane.f32.xlu1 %v6335_v11  ;;  %v6377_v29 = vadd.f32 %v803_v27, %v787_v26  ;;  %v6388_v34 = vadd.f32 %v804_v31, %v788_v30  ;;  %v6391_v35 = vadd.f32 %v805_v33, %v789_v32  ;;  %v790_v36 = vld [vmem:[%s8863_s17 + $0x60] sm:$0xff]  ;;  %v791_v38 = vld [vmem:[%s8863_s17 + $0x68] sm:$0xff]  ;;  %v792_v42 = vld [vmem:[%s8863_s17 + $0x70] sm:$0xff] }
  0x3d   : > { %v806_v37 = vld [vmem:[%s8864_s23 + $0x60] sm:$0xff]  ;;  %v807_v39 = vld [vmem:[%s8864_s23 + $0x68] sm:$0xff]  ;;  %v808_v43 = vld [vmem:[%s8864_s23 + $0x70] sm:$0xff] }
  0x3e   : > { %v6402_v40 = vadd.f32 %v806_v37, %v790_v36  ;;  %v6405_v41 = vadd.f32 %v807_v39, %v791_v38  ;;  %v793_v44 = vld [vmem:[%s8863_s17 + $0x78] sm:$0xff]  ;;  %v6416_v46 = vadd.f32 %v808_v43, %v792_v42 }
  0x3f   : > { %v809_v45 = vld [vmem:[%s8864_s23 + $0x78] sm:$0xff] }
  0x40   : > { %836 = vadd.xlane.f32.xlu0 %v6346_v16  ;;  %838 = vadd.xlane.f32.xlu1 %v6349_v17  ;;  %v6419_v47 = vadd.f32 %v809_v45, %v793_v44 }
  0x44   : > { %840 = vadd.xlane.f32.xlu0 %v6360_v22  ;;  %842 = vadd.xlane.f32.xlu1 %v6363_v23 }
  0x48   : > { %844 = vadd.xlane.f32.xlu0 %v6374_v28  ;;  %846 = vadd.xlane.f32.xlu1 %v6377_v29 }
  0x4c   : > { %848 = vadd.xlane.f32.xlu0 %v6388_v34  ;;  %850 = vadd.xlane.f32.xlu1 %v6391_v35 }
  0x50   : > { %852 = vadd.xlane.f32.xlu0 %v6402_v40  ;;  %854 = vadd.xlane.f32.xlu1 %v6405_v41 }
  0x54   : > { %856 = vadd.xlane.f32.xlu0 %v6416_v46  ;;  %858 = vadd.xlane.f32.xlu1 %v6419_v47 }
  0xc1   : > { %v829_v48 = vpop.xlane.xlu0 %828  ;;  %v833_v50 = vpop.xlane.xlu1 %832 }
  0xc2   : > { %v861_v49 = vmul.f32 0.0078125, %v829_v48  ;;  %v863_v51 = vmul.f32 0.0078125, %v833_v50 }
  0xc4   : > { %v6424_v52 = vsub.f32 %v6319_v3, %v861_v49  ;;  %v6426_v53 = vsub.f32 %v812_v7, %v863_v51 }
  0xc5   : > { %v831_v54 = vpop.xlane.xlu0 %830  ;;  %v835_v57 = vpop.xlane.xlu1 %834 }
  0xc6   : > { %v862_v55 = vmul.f32 0.0078125, %v831_v54  ;;  %v893_v56 = vmul.f32 %v6424_v52, %v6424_v52  ;;  %v864_v58 = vmul.f32 0.0078125, %v835_v57  ;;  %v895_v60 = vmul.f32 %v6426_v53, %v6426_v53 }
  0xc8   : > { %v6431_v59 = vsub.f32 %v6333_v10, %v862_v55  ;;  %909 = vadd.xlane.f32.xlu0 %v893_v56  ;;  %v6436_v61 = vsub.f32 %v6335_v11, %v864_v58 }
  0xc9   : > { %v837_v62 = vpop.xlane.xlu0 %836  ;;  %v839_v1 = vpop.xlane.xlu1 %838 }
  0xca   : > { %v865_v63 = vmul.f32 0.0078125, %v837_v62  ;;  %v894_v0 = vmul.f32 %v6431_v59, %v6431_v59  ;;  %v866_v2 = vmul.f32 0.0078125, %v839_v1  ;;  %v896_v4 = vmul.f32 %v6436_v61, %v6436_v61 }
  0xcc   : > { %v6441_v3 = vsub.f32 %v6346_v16, %v865_v63  ;;  %913 = vadd.xlane.f32.xlu0 %v895_v60  ;;  %911 = vadd.xlane.f32.xlu1 %v894_v0  ;;  %v6446_v5 = vsub.f32 %v6349_v17, %v866_v2 }
  0xcd   : > { %v841_v6 = vpop.xlane.xlu0 %840  ;;  %v843_v9 = vpop.xlane.xlu1 %842 }
  0xce   : > { %v867_v7 = vmul.f32 0.0078125, %v841_v6  ;;  %v897_v8 = vmul.f32 %v6441_v3, %v6441_v3  ;;  %v868_v10 = vmul.f32 0.0078125, %v843_v9  ;;  %v898_v12 = vmul.f32 %v6446_v5, %v6446_v5 }
  0xd0   : > { %v6451_v11 = vsub.f32 %v6360_v22, %v867_v7  ;;  %915 = vadd.xlane.f32.xlu1 %v896_v4  ;;  %917 = vadd.xlane.f32.xlu0 %v897_v8  ;;  %v6456_v13 = vsub.f32 %v6363_v23, %v868_v10 }
  0xd1   : > { %v845_v14 = vpop.xlane.xlu0 %844  ;;  %v847_v17 = vpop.xlane.xlu1 %846 }
  0xd2   : > { %v869_v15 = vmul.f32 0.0078125, %v845_v14  ;;  %v899_v16 = vmul.f32 %v6451_v11, %v6451_v11  ;;  %v870_v18 = vmul.f32 0.0078125, %v847_v17  ;;  %v900_v20 = vmul.f32 %v6456_v13, %v6456_v13 }
  0xd4   : > { %v6461_v19 = vsub.f32 %v6374_v28, %v869_v15  ;;  %919 = vadd.xlane.f32.xlu1 %v898_v12  ;;  %921 = vadd.xlane.f32.xlu0 %v899_v16  ;;  %v6466_v21 = vsub.f32 %v6377_v29, %v870_v18  ;;  %v6505_v18 = vld [vmem:[%s8865_s5] ss:$0 sm:$0xff] }
  0xd5   : > { %v849_v22 = vpop.xlane.xlu0 %848  ;;  %v851_v25 = vpop.xlane.xlu1 %850 }
  0xd6   : > { %v871_v23 = vmul.f32 0.0078125, %v849_v22  ;;  %v901_v24 = vmul.f32 %v6461_v19, %v6461_v19  ;;  %v872_v26 = vmul.f32 0.0078125, %v851_v25  ;;  %v902_v28 = vmul.f32 %v6466_v21, %v6466_v21 }
  0xd8   : > { %v6471_v27 = vsub.f32 %v6388_v34, %v871_v23  ;;  %923 = vadd.xlane.f32.xlu1 %v900_v20  ;;  %925 = vadd.xlane.f32.xlu0 %v901_v24  ;;  %v6476_v30 = vsub.f32 %v6391_v35, %v872_v26  ;;  %v6511_v24 = vld [vmem:[%s8866_s18] ss:$0 sm:$0xff] }
  0xd9   : > { %v853_v29 = vpop.xlane.xlu0 %852  ;;  %v855_v33 = vpop.xlane.xlu1 %854 }
  0xda   : > { %v873_v31 = vmul.f32 0.0078125, %v853_v29  ;;  %v903_v32 = vmul.f32 %v6471_v27, %v6471_v27  ;;  %v874_v36 = vmul.f32 0.0078125, %v855_v33  ;;  %v904_v34 = vmul.f32 %v6476_v30, %v6476_v30 }
  0xdc   : > { %v6481_v37 = vsub.f32 %v6402_v40, %v873_v31  ;;  %927 = vadd.xlane.f32.xlu1 %v902_v28  ;;  %929 = vadd.xlane.f32.xlu0 %v903_v32  ;;  %v6486_v38 = vsub.f32 %v6405_v41, %v874_v36 }
  0xdd   : > { %v857_v35 = vpop.xlane.xlu0 %856  ;;  %v859_v43 = vpop.xlane.xlu1 %858 }
  0xde   : > { %v875_v39 = vmul.f32 0.0078125, %v857_v35  ;;  %v905_v42 = vmul.f32 %v6481_v37, %v6481_v37  ;;  %v876_v44 = vmul.f32 0.0078125, %v859_v43  ;;  %v906_v40 = vmul.f32 %v6486_v38, %v6486_v38 }
  0xe0   : > { %v6491_v45 = vsub.f32 %v6416_v46, %v875_v39  ;;  %931 = vadd.xlane.f32.xlu1 %v904_v34  ;;  %933 = vadd.xlane.f32.xlu0 %v905_v42  ;;  %v6496_v48 = vsub.f32 %v6419_v47, %v876_v44 }
  0xe2   : > { %v907_v41 = vmul.f32 %v6491_v45, %v6491_v45  ;;  %v908_v49 = vmul.f32 %v6496_v48, %v6496_v48 }
  0xe4   : > { %935 = vadd.xlane.f32.xlu1 %v906_v40  ;;  %937 = vadd.xlane.f32.xlu0 %v907_v41 }
  0xe8   : > { %939 = vadd.xlane.f32.xlu1 %v908_v49 }
 0x151   : > { %v910_v50 = vpop.xlane.xlu0 %909 }
 0x152   : > { %v941_v46 = vmul.f32 0.0078125, %v910_v50 }
 0x154   : > { %v957_v51 = vadd.f32 1e-12, %v941_v46 }
 0x155   : > { %v912_v54 = vpop.xlane.xlu1 %911  ;;  %v914_v55 = vpop.xlane.xlu0 %913 }
 0x156   : > { %5541 = vrsqrt.f32 %v957_v51  ;;  %v942_v56 = vmul.f32 0.0078125, %v912_v54  ;;  %v943_v57 = vmul.f32 0.0078125, %v914_v55 }
 0x158   : > { %v958_v58 = vadd.f32 1e-12, %v942_v56  ;;  %v959_v47 = vadd.f32 1e-12, %v943_v57 }
 0x159   : > { %v916_v60 = vpop.xlane.xlu1 %915  ;;  %v918_v62 = vpop.xlane.xlu0 %917 }
 0x15a   : > { %5543 = vrsqrt.f32 %v958_v58  ;;  %v944_v63 = vmul.f32 0.0078125, %v916_v60  ;;  %v945_v0 = vmul.f32 0.0078125, %v918_v62 }
 0x15b   : > { %5545 = vrsqrt.f32 %v959_v47 }
 0x15c   : > { %v960_v1 = vadd.f32 1e-12, %v944_v63  ;;  %v961_v2 = vadd.f32 1e-12, %v945_v0 }
 0x15d   : > { %v920_v4 = vpop.xlane.xlu1 %919  ;;  %v922_v6 = vpop.xlane.xlu0 %921 }
 0x15e   : > { %5547 = vrsqrt.f32 %v960_v1  ;;  %v946_v7 = vmul.f32 0.0078125, %v920_v4  ;;  %v947_v8 = vmul.f32 0.0078125, %v922_v6 }
 0x15f   : > { %5549 = vrsqrt.f32 %v961_v2 }
 0x160   : > { %v962_v9 = vadd.f32 1e-12, %v946_v7  ;;  %v963_v10 = vadd.f32 1e-12, %v947_v8 }
 0x161   : > { %v924_v12 = vpop.xlane.xlu1 %923  ;;  %v926_v14 = vpop.xlane.xlu0 %925 }
 0x162   : > { %5551 = vrsqrt.f32 %v962_v9  ;;  %v948_v15 = vmul.f32 0.0078125, %v924_v12  ;;  %v949_v16 = vmul.f32 0.0078125, %v926_v14 }
 0x163   : > { %v5542_v17 = vpop.eup %5541  ;;  %5553 = vrsqrt.f32 %v963_v10 }
 0x164   : > { %v989_v20 = vmul.f32 %v5542_v17, %v6424_v52  ;;  %v964_v22 = vadd.f32 1e-12, %v948_v15  ;;  %v965_v23 = vadd.f32 1e-12, %v949_v16 }
 0x165   : > { %v928_v25 = vpop.xlane.xlu1 %927  ;;  %v930_v26 = vpop.xlane.xlu0 %929 }
 0x166   : > { %v1011_v28 = vmul.f32 %v6505_v18, %v989_v20  ;;  %5555 = vrsqrt.f32 %v964_v22  ;;  %v950_v29 = vmul.f32 0.0078125, %v928_v25  ;;  %v951_v31 = vmul.f32 0.0078125, %v930_v26 }
 0x167   : > { %v5544_v32 = vpop.eup %5543  ;;  %5557 = vrsqrt.f32 %v965_v23 }
 0x168   : > { %v5546_v33 = vpop.eup %5545  ;;  %v1033_v52 = vadd.f32 %v6511_v24, %v1011_v28  ;;  %v990_v36 = vmul.f32 %v5544_v32, %v6431_v59  ;;  %v966_v34 = vadd.f32 1e-12, %v950_v29  ;;  %v967_v35 = vadd.f32 1e-12, %v951_v31 }
 0x169   : > { %v991_v39 = vmul.f32 %v5546_v33, %v6426_v53  ;;  %v932_v42 = vpop.xlane.xlu1 %931  ;;  %v934_v43 = vpop.xlane.xlu0 %933 }
 0x16a   : > { %1049 = vst [vmem:[%s6311_s12] sm:$0xff] %v1033_v52  ;;  %v1012_v44 = vmul.f32 %v6505_v18, %v990_v36  ;;  %5559 = vrsqrt.f32 %v966_v34  ;;  %v952_v40 = vmul.f32 0.0078125, %v932_v42  ;;  %v953_v41 = vmul.f32 0.0078125, %v934_v43 }
 0x16b   : > { %v5548_v49 = vpop.eup %5547  ;;  %v1013_v50 = vmul.f32 %v6505_v18, %v991_v39  ;;  %5561 = vrsqrt.f32 %v967_v35 }
 0x16c   : > { %v5550_v46 = vpop.eup %5549  ;;  %v1034_v59 = vadd.f32 %v6511_v24, %v1012_v44  ;;  %v992_v51 = vmul.f32 %v5548_v49, %v6436_v61  ;;  %v968_v53 = vadd.f32 1e-12, %v952_v40  ;;  %v969_v54 = vadd.f32 1e-12, %v953_v41 }
 0x16d   : > { %v1035_v55 = vadd.f32 %v6511_v24, %v1013_v50  ;;  %v993_v56 = vmul.f32 %v5550_v46, %v6441_v3  ;;  %v936_v57 = vpop.xlane.xlu1 %935  ;;  %v938_v58 = vpop.xlane.xlu0 %937 }
 0x16e   : > { %1050 = vst [vmem:[%s6311_s12 + $0x8] sm:$0xff] %v1034_v59  ;;  %v1014_v47 = vmul.f32 %v6505_v18, %v992_v51  ;;  %5563 = vrsqrt.f32 %v968_v53  ;;  %v954_v60 = vmul.f32 0.0078125, %v936_v57  ;;  %v955_v62 = vmul.f32 0.0078125, %v938_v58 }
 0x16f   : > { %v5552_v63 = vpop.eup %5551  ;;  %1051 = vst [vmem:[%s6311_s12 + $0x10] sm:$0xff] %v1035_v55  ;;  %v1015_v61 = vmul.f32 %v6505_v18, %v993_v56  ;;  %5565 = vrsqrt.f32 %v969_v54 }
 0x170   : > { %v5554_v0 = vpop.eup %5553  ;;  %v1036_v1 = vadd.f32 %v6511_v24, %v1014_v47  ;;  %v994_v3 = vmul.f32 %v5552_v63, %v6446_v5  ;;  %v970_v2 = vadd.f32 1e-12, %v954_v60  ;;  %v971_v4 = vadd.f32 1e-12, %v955_v62 }
 0x171   : > { %v1037_v6 = vadd.f32 %v6511_v24, %v1015_v61  ;;  %v995_v7 = vmul.f32 %v5554_v0, %v6451_v11  ;;  %v940_v8 = vpop.xlane.xlu1 %939 }
 0x172   : > { %1052 = vst [vmem:[%s6311_s12 + $0x18] sm:$0xff] %v1036_v1  ;;  %v1016_v9 = vmul.f32 %v6505_v18, %v994_v3  ;;  %5567 = vrsqrt.f32 %v970_v2  ;;  %v956_v10 = vmul.f32 0.0078125, %v940_v8 }
 0x173   : > { %v5556_v12 = vpop.eup %5555  ;;  %1053 = vst [vmem:[%s6311_s12 + $0x20] sm:$0xff] %v1037_v6  ;;  %v1017_v14 = vmul.f32 %v6505_v18, %v995_v7  ;;  %5569 = vrsqrt.f32 %v971_v4 }
 0x174   : > { %v5558_v5 = vpop.eup %5557  ;;  %v1038_v15 = vadd.f32 %v6511_v24, %v1016_v9  ;;  %v996_v16 = vmul.f32 %v5556_v12, %v6456_v13  ;;  %v972_v11 = vadd.f32 1e-12, %v956_v10 }
 0x175   : > { %v1039_v17 = vadd.f32 %v6511_v24, %v1017_v14  ;;  %v997_v20 = vmul.f32 %v5558_v5, %v6461_v19 }
 0x176   : > { %1054 = vst [vmem:[%s6311_s12 + $0x28] sm:$0xff] %v1038_v15  ;;  %v1018_v22 = vmul.f32 %v6505_v18, %v996_v16  ;;  %5571 = vrsqrt.f32 %v972_v11 }
 0x177   : > { %v5560_v23 = vpop.eup %5559  ;;  %1055 = vst [vmem:[%s6311_s12 + $0x30] sm:$0xff] %v1039_v17  ;;  %v1019_v25 = vmul.f32 %v6505_v18, %v997_v20 }
 0x178   : > { %v5562_v26 = vpop.eup %5561  ;;  %v1040_v28 = vadd.f32 %v6511_v24, %v1018_v22  ;;  %v998_v13 = vmul.f32 %v5560_v23, %v6466_v21 }
 0x179   : > { %v1041_v29 = vadd.f32 %v6511_v24, %v1019_v25  ;;  %v999_v31 = vmul.f32 %v5562_v26, %v6471_v27 }
 0x17a   : > { %1056 = vst [vmem:[%s6311_s12 + $0x38] sm:$0xff] %v1040_v28  ;;  %v1020_v19 = vmul.f32 %v6505_v18, %v998_v13 }
 0x17b   : > { %v5564_v32 = vpop.eup %5563  ;;  %1057 = vst [vmem:[%s6311_s12 + $0x40] sm:$0xff] %v1041_v29  ;;  %v1021_v33 = vmul.f32 %v6505_v18, %v999_v31 }
 0x17c   : > { %v5566_v52 = vpop.eup %5565  ;;  %v1042_v36 = vadd.f32 %v6511_v24, %v1020_v19  ;;  %v1000_v34 = vmul.f32 %v5564_v32, %v6476_v30 }
 0x17d   : > { %v1043_v21 = vadd.f32 %v6511_v24, %v1021_v33  ;;  %v1001_v35 = vmul.f32 %v5566_v52, %v6481_v37 }
 0x17e   : > { %1058 = vst [vmem:[%s6311_s12 + $0x48] sm:$0xff] %v1042_v36  ;;  %v1022_v27 = vmul.f32 %v6505_v18, %v1000_v34 }
 0x17f   : > { %v5568_v39 = vpop.eup %5567  ;;  %1059 = vst [vmem:[%s6311_s12 + $0x50] sm:$0xff] %v1043_v21  ;;  %v1023_v42 = vmul.f32 %v6505_v18, %v1001_v35 }
 0x180   : > { %v5570_v43 = vpop.eup %5569  ;;  %v1044_v44 = vadd.f32 %v6511_v24, %v1022_v27  ;;  %v1002_v30 = vmul.f32 %v5568_v39, %v6486_v38 }
 0x181   : > { %v1045_v40 = vadd.f32 %v6511_v24, %v1023_v42  ;;  %v1003_v41 = vmul.f32 %v5570_v43, %v6491_v45 }
 0x182   : > { %1060 = vst [vmem:[%s6311_s12 + $0x58] sm:$0xff] %v1044_v44  ;;  %v1024_v37 = vmul.f32 %v6505_v18, %v1002_v30 }
 0x183   : > { %v5572_v49 = vpop.eup %5571  ;;  %1061 = vst [vmem:[%s6311_s12 + $0x60] sm:$0xff] %v1045_v40  ;;  %v1025_v50 = vmul.f32 %v6505_v18, %v1003_v41 }
 0x184   : > { %v1046_v46 = vadd.f32 %v6511_v24, %v1024_v37  ;;  %v1004_v59 = vmul.f32 %v5572_v49, %v6496_v48 }
 0x185   : > { %v1047_v51 = vadd.f32 %v6511_v24, %v1025_v50 }
 0x186   : > { %1062 = vst [vmem:[%s6311_s12 + $0x68] sm:$0xff] %v1046_v46  ;;  %v1026_v38 = vmul.f32 %v6505_v18, %v1004_v59 }
 0x187   : > { %1063 = vst [vmem:[%s6311_s12 + $0x70] sm:$0xff] %v1047_v51 }
 0x188   : > { %v1048_v53 = vadd.f32 %v6511_v24, %v1026_v38 }
 0x18a   : > { %1064 = vst [vmem:[%s6311_s12 + $0x78] sm:$0xff] %v1048_v53 }
 0x18b PF: > { %v5613_v45 = vld [vmem:[%s6255_s3 + $0xac] ss:$12 sps:$4 sm:$0xff]   ;;  %v5615_v48 = vld [vmem:[%s6255_s3 + $0xa8] ss:$12 sps:$4 sm:$0xff]   ;;  %v6109_v54 = vmov 0   ;;  %v1065_v58 = vld [vmem:[%s6311_s12] sm:$0xff]  ;;  %v1123_v39 = vlaneseq  ;;  %s8870_s21 = scalar_lea.vmem %s8771_s8, %s6237_s30  ;;  %s8871_s2 = scalar_lea.vmem %s8772_s9, %s6237_s30 }
 0x18c   : > { %1298 = vmatprep.mubr.bf16.mxu0 %v6109_v54  ;;  %1266 = vmatprep.subr.bf16.mxu0 %v5613_v45  ;;  %v5616_v18 = vld [vmem:[%s6255_s3 + $0x94] ss:$12 sps:$4 sm:$0xff]   ;;  %v5618_v24 = vld [vmem:[%s6255_s3 + $0x90] ss:$12 sps:$4 sm:$0xff]   ;;  %v5621_v56 = vld [vmem:[%s6255_s3 + $0x78] ss:$12 sps:$4 sm:$0xff]   ;;  %s8872_s6 = scalar_lea.vmem %s8773_s10, %s6237_s30 }
 0x18d   : > { %1267 = vmatpush1.bf16.msra.mxu0 %v5615_v48  ;;  %v5619_v55 = vld [vmem:[%s6255_s3 + $0x7c] ss:$12 sps:$4 sm:$0xff]   ;;  %v5622_v57 = vld [vmem:[%s6255_s3 + $0x64] ss:$12 sps:$4 sm:$0xff]   ;;  %v5624_v47 = vld [vmem:[%s6255_s3 + $0x60] ss:$12 sps:$4 sm:$0xff]  }
 0x18e   : > { %1268 = vmatprep.subr.bf16.mxu0 %v5616_v18  ;;  %v1066_v60 = vld [vmem:[%s6311_s12 + $0x8] sm:$0xff]  ;;  %v5628_v0 = vld [vmem:[%s6255_s3 + $0x34] ss:$12 sps:$4 sm:$0xff]   ;;  %v5637_v1 = vld [vmem:[%s6255_s3 + $0xb0] ss:$12 sps:$4 sm:$0xff]   ;;  %v6624_v42 = vshrl.u32 %v1123_v39, 7 }
 0x18f   : > { %v5625_v62 = vld [vmem:[%s6255_s3 + $0x4c] ss:$12 sps:$4 sm:$0xff]   ;;  %v1081_v63 = vpack.c.bf16 %v1066_v60, %v1065_v58  ;;  %v5627_v61 = vld [vmem:[%s6255_s3 + $0x48] ss:$12 sps:$4 sm:$0xff]   ;;  %v5630_v2 = vld [vmem:[%s6255_s3 + $0x30] ss:$12 sps:$4 sm:$0xff]   ;;  %5273 = vmatprep.subr.bf16.mxu1 %v5637_v1 }
 0x190   : > { %v5638_v3 = vld [vmem:[%s6255_s3 + $0x98] ss:$12 sps:$4 sm:$0xff]   ;;  %v5631_v4 = vld [vmem:[%s6255_s3 + $0x1c] ss:$12 sps:$4 sm:$0xff]   ;;  %5274 = vmatpush3.bf16.msra.mxu1 %v5637_v1  ;;  %v5639_v6 = vld [vmem:[%s6255_s3 + $0x80] ss:$12 sps:$4 sm:$0xff]  }
 0x191   : > { %1269 = vmatpush1.bf16.msra.mxu0 %v5618_v24  ;;  %5289 = vmatprep.mubr.bf16.mxu1 %v1081_v63  ;;  %v5633_v7 = vld [vmem:[%s6255_s3 + $0x18] ss:$12 sps:$4 sm:$0xff]   ;;  %v5640_v9 = vld [vmem:[%s6255_s3 + $0x68] ss:$12 sps:$4 sm:$0xff]   ;;  %v5636_v10 = vld [vmem:[%s6255_s3] ss:$12 sps:$4 sm:$0xff]  }
 0x192   : > { %1270 = vmatprep.subr.bf16.mxu0 %v5619_v55  ;;  %5275 = vmatprep.subr.bf16.mxu1 %v5638_v3  ;;  %v5634_v8 = vld [vmem:[%s6255_s3 + $0x4] ss:$12 sps:$4 sm:$0xff]   ;;  %v1068_v15 = vld [vmem:[%s6311_s12 + $0x18] sm:$0xff]  ;;  %v5643_v16 = vld [vmem:[%s6255_s3 + $0x20] ss:$12 sps:$4 sm:$0xff]   ;;  %v1129_v43 = vsub.s32 1, %v6624_v42 }
 0x193   : > { %v5641_v12 = vld [vmem:[%s6255_s3 + $0x50] ss:$12 sps:$4 sm:$0xff]   ;;  %v5642_v14 = vld [vmem:[%s6255_s3 + $0x38] ss:$12 sps:$4 sm:$0xff]   ;;  %v5644_v17 = vld [vmem:[%s6255_s3 + $0x8] ss:$12 sps:$4 sm:$0xff]  }
 0x194   : > { %5276 = vmatpush3.bf16.msra.mxu1 %v5638_v3  ;;  %v1067_v5 = vld [vmem:[%s6311_s12 + $0x10] sm:$0xff]  ;;  %v1069_v20 = vld [vmem:[%s6311_s12 + $0x20] sm:$0xff]  ;;  %v1070_v22 = vld [vmem:[%s6311_s12 + $0x28] sm:$0xff]  ;;  %v1125_v44 = vsub.s32 0, %v6624_v42  ;;  %vm1501_vm0 = vcmask 523264   ;;  %s6110_s3 = smov 64  }
 0x195   : > { %1271 = vmatpush1.bf16.msra.mxu0 %v5621_v56  ;;  %5277 = vmatprep.subr.bf16.mxu1 %v5639_v6  ;;  %v1082_v11 = vpack.c.bf16 %v1068_v15, %v1067_v5  ;;  %v1083_v23 = vpack.c.bf16 %v1070_v22, %v1069_v20  ;;  %v1071_v25 = vld [vmem:[%s6311_s12 + $0x30] sm:$0xff]  ;;  %v1072_v26 = vld [vmem:[%s6311_s12 + $0x38] sm:$0xff]  ;;  %v1073_v28 = vld [vmem:[%s6311_s12 + $0x40] sm:$0xff]  ;;  %s8868_s26 = sld [smem:[#allocation52_spill]] }
 0x196   : > { %1272 = vmatprep.subr.bf16.mxu0 %v5622_v57  ;;  %v1074_v13 = vld [vmem:[%s6311_s12 + $0x48] sm:$0xff]  ;;  %v1084_v29 = vpack.c.bf16 %v1072_v26, %v1071_v25  ;;  %v1075_v19 = vld [vmem:[%s6311_s12 + $0x50] sm:$0xff]  ;;  %v1076_v32 = vld [vmem:[%s6311_s12 + $0x58] sm:$0xff] }
 0x197   : > { %v1085_v31 = vpack.c.bf16 %v1074_v13, %v1073_v28  ;;  %v1077_v33 = vld [vmem:[%s6311_s12 + $0x60] sm:$0xff]  ;;  %v1078_v52 = vld [vmem:[%s6311_s12 + $0x68] sm:$0xff]  ;;  %v1086_v36 = vpack.c.bf16 %v1076_v32, %v1075_v19  ;;  %v1079_v21 = vld [vmem:[%s6311_s12 + $0x70] sm:$0xff]  ;;  %v1133_v13 = vsub.s32 2, %v6624_v42 }
 0x198   : > { %5278 = vmatpush3.bf16.msra.mxu1 %v5639_v6  ;;  %v1087_v34 = vpack.c.bf16 %v1078_v52, %v1077_v33  ;;  %v1080_v35 = vld [vmem:[%s6311_s12 + $0x78] sm:$0xff]  ;;  %v1121_v30 = vld [vmem:[%s6265_s22] sm:$0x7]  ;;  %s8867_s22 = sld [smem:[#allocation8_spill]] }
 0x199   : > { %1273 = vmatpush1.bf16.msra.mxu0 %v5624_v47  ;;  %5279 = vmatprep.subr.bf16.mxu1 %v5640_v9  ;;  %v1088_v27 = vpack.c.bf16 %v1080_v35, %v1079_v21  ;;  %v6631_v40 = vrot.slane %v1121_v30, %v1129_v43  ;;  %v6635_v37 = vrot.slane %v1121_v30, %v1125_v44 }
 0x19a   : > { %1274 = vmatprep.subr.bf16.mxu0 %v5625_v62 }
 0x19c   : > { %5280 = vmatpush3.bf16.msra.mxu1 %v5640_v9 }
 0x19d   : > { %1275 = vmatpush1.bf16.msra.mxu0 %v5627_v61  ;;  %5281 = vmatprep.subr.bf16.mxu1 %v5641_v12 }
 0x19e   : > { %1276 = vmatprep.subr.bf16.mxu0 %v5628_v0  ;;  %s8869_s27 = scalar_lea.vmem %s8868_s26, %s8867_s22 }
 0x1a0   : > { %5282 = vmatpush3.bf16.msra.mxu1 %v5641_v12 }
 0x1a1   : > { %1277 = vmatpush1.bf16.msra.mxu0 %v5630_v2  ;;  %5283 = vmatprep.subr.bf16.mxu1 %v5642_v14 }
 0x1a2   : > { %1278 = vmatprep.subr.bf16.mxu0 %v5631_v4 }
 0x1a4   : > { %5284 = vmatpush3.bf16.msra.mxu1 %v5642_v14 }
 0x1a5   : > { %1279 = vmatpush1.bf16.msra.mxu0 %v5633_v7  ;;  %5285 = vmatprep.subr.bf16.mxu1 %v5643_v16 }
 0x1a6   : > { %1280 = vmatprep.subr.bf16.mxu0 %v5634_v8 }
 0x1a8   : > { %5286 = vmatpush3.bf16.msra.mxu1 %v5643_v16 }
 0x1a9   : > { %1281 = vmatpush1.bf16.msra.mxu0 %v5636_v10  ;;  %5287 = vmatprep.subr.bf16.mxu1 %v5644_v17 }
 0x1ac   : > { %1299 = vmatmul.mubr.bf16.vlgmr.msra.gmra.mxu0 %v1081_v63  ;;  %5288 = vmatpush3.bf16.msra.mxu1 %v5644_v17 }
 0x1ad   : > { %1308 = vmatprep.mubr.bf16.mxu0 %v6109_v54 }
 0x1af   : > { %5290 = vmatmul.mubr.bf16.vlgmr.msra.gmra.mxu1 %v1082_v11 }
 0x1b0   : > { %5293 = vmatprep.mubr.bf16.mxu1 %v1083_v23 }
 0x1b4   : > { %1309 = vmatmul.mubr.bf16.gmra.mxu0 %v1082_v11 }
 0x1b5   : > { %1318 = vmatprep.mubr.bf16.mxu0 %v6109_v54 }
 0x1b7   : > { %5294 = vmatmul.mubr.bf16.gmra.mxu1 %v1084_v29 }
 0x1b8   : > { %5297 = vmatprep.mubr.bf16.mxu1 %v1085_v31 }
 0x1bc   : > { %1319 = vmatmul.mubr.bf16.gmra.mxu0 %v1083_v23 }
 0x1bd   : > { %1328 = vmatprep.mubr.bf16.mxu0 %v6109_v54 }
 0x1bf   : > { %5298 = vmatmul.mubr.bf16.gmra.mxu1 %v1086_v36 }
 0x1c0   : > { %5301 = vmatprep.mubr.bf16.mxu1 %v1087_v34 }
 0x1c4   : > { %1329 = vmatmul.mubr.bf16.gmra.mxu0 %v1084_v29 }
 0x1c5   : > { %1338 = vmatprep.mubr.bf16.mxu0 %v6109_v54 }
 0x1c7   : > { %5302 = vmatmul.mubr.bf16.gmra.mxu1 %v1088_v27 }
 0x1cc   : > { %1339 = vmatmul.mubr.bf16.gmra.mxu0 %v1085_v31 }
 0x1cd   : > { %1348 = vmatprep.mubr.bf16.mxu0 %v6109_v54 }
 0x1d4   : > { %1349 = vmatmul.mubr.bf16.gmra.mxu0 %v1086_v36  ;;  %v6694_v36 = vrot.slane %v1121_v30, %v1133_v13 }
 0x1d5   : > { %1358 = vmatprep.mubr.bf16.mxu0 %v6109_v54 }
 0x1dc   : > { %1359 = vmatmul.mubr.bf16.gmra.mxu0 %v1087_v34 }
 0x1dd   : > { %1368 = vmatprep.mubr.bf16.mxu0 %v6109_v54 }
 0x1e4   : > { %1369 = vmatmul.mubr.bf16.gmra.mxu0 %v1088_v27 }
 0x26c   : > { %v1300_v41 = vpop.f32.mrf.mxu0 }
 0x26d   : > { %v1301_v59 = vadd.f32 %v1300_v41, %v6635_v37 }
 0x26e   : > { %v1302_v49 = vpop.f32.mrf.mxu0 }
 0x26f   : > { %v1303_v50 = vadd.f32 %v1302_v49, %v6631_v40  ;;  %v6655_v62 = vpop.f32.mrf.mxu1 }
 0x270   : > { %v1304_v46 = vpop.f32.mrf.mxu0 }
 0x271   : > { %v1305_v51 = vadd.f32 %v1304_v46, %v6635_v37  ;;  %v6660_v0 = vpop.f32.mrf.mxu1 }
 0x272   : > { %v1306_v38 = vpop.f32.mrf.mxu0 }
 0x273   : > { %v6640_v53 = vpack.c.bf16 %v1305_v51, %v1301_v59  ;;  %v1307_v45 = vadd.f32 %v1306_v38, %v6631_v40  ;;  %v6662_v3 = vpop.f32.mrf.mxu1 }
 0x274   : > { %v1310_v48 = vpop.f32.mrf.mxu0 }
 0x275   : > { %v6643_v18 = vpack.c.bf16 %v1307_v45, %v1303_v50  ;;  %v1311_v24 = vadd.f32 %v1310_v48, %v6635_v37  ;;  %5321 = vmatprep.mubr.msk.bf16.mxu0 %vm1501_vm0, %v6640_v53  ;;  %v6667_v6 = vpop.f32.mrf.mxu1 }
 0x276   : > { %v6648_v55 = vpop.f32.mrf.mxu0 }
 0x277   : > { %v5295_v9 = vpop.f32.mrf.mxu1 }
 0x278   : > { %v1314_v56 = vpop.f32.mrf.mxu0 }
 0x279   : > { %v1315_v57 = vadd.f32 %v1314_v56, %v6635_v37  ;;  %v6674_v14 = vpop.f32.mrf.mxu1 }
 0x27a   : > { %v6651_v58 = vpop.f32.mrf.mxu0 }
 0x27b   : > { %v6653_v47 = vpack.c.bf16 %v1315_v57, %v1311_v24  ;;  %v5296_v15 = vpop.f32.mrf.mxu1 }
 0x27c   : > { %v1320_v60 = vpop.f32.mrf.mxu0 }
 0x27d   : > { %v1321_v63 = vadd.f32 %v1320_v60, %v6635_v37  ;;  %v6679_v17 = vpop.f32.mrf.mxu1 }
 0x27e   : > { %v6658_v61 = vpop.f32.mrf.mxu0 }
 0x27f   : > { %v5299_v23 = vpop.f32.mrf.mxu1 }
 0x280   : > { %v1324_v1 = vpop.f32.mrf.mxu0  ;;  %v1454_v45 = vadd.f32 %v5299_v23, %v6694_v36 }
 0x281   : > { %v1325_v2 = vadd.f32 %v1324_v1, %v6635_v37  ;;  %v1445_v28 = vpop.f32.mrf.mxu1 }
 0x282   : > { %v6665_v4 = vpop.f32.mrf.mxu0 }
 0x283   : > { %v6669_v7 = vpack.c.bf16 %v1325_v2, %v1321_v63  ;;  %v5300_v31 = vpop.f32.mrf.mxu1 }
 0x284   : > { %v1330_v8 = vpop.f32.mrf.mxu0  ;;  %v1457_v48 = vadd.f32 %v5300_v31, %v6694_v36 }
 0x285   : > { %v1331_v10 = vadd.f32 %v1330_v8, %v6635_v37  ;;  %v1448_v33 = vpop.f32.mrf.mxu1 }
 0x286   : > { %v6672_v12 = vpop.f32.mrf.mxu0  ;;  %v1449_v23 = vadd.f32 %v1448_v33, %v6694_v36 }
 0x287   : > { %v5303_v21 = vpop.f32.mrf.mxu1 }
 0x288   : > { %v1334_v5 = vpop.f32.mrf.mxu0  ;;  %v1470_v41 = vadd.f32 %v5303_v21, %v6694_v36 }
 0x289   : > { %v1335_v16 = vadd.f32 %v1334_v5, %v6635_v37  ;;  %v1461_v39 = vpop.f32.mrf.mxu1 }
 0x28a   : > { %v6677_v11 = vpop.f32.mrf.mxu0  ;;  %v1462_v59 = vadd.f32 %v1461_v39, %v6694_v36 }
 0x28b   : > { %v6681_v20 = vpack.c.bf16 %v1335_v16, %v1331_v10  ;;  %v5304_v50 = vpop.f32.mrf.mxu1  ;;  %v1446_v16 = vadd.f32 %v1445_v28, %v6694_v36 }
 0x28c   : > { %v1340_v22 = vpop.f32.mrf.mxu0  ;;  %v1473_v51 = vadd.f32 %v5304_v50, %v6694_v36  ;;  %v1430_v50 = vadd.f32 %v6674_v14, %v6694_v36  ;;  %v1425_v14 = vadd.f32 %v6662_v3, %v6694_v36  ;;  %v1417_v3 = vadd.f32 %v6667_v6, %v6694_v36 }
 0x28d   : > { %v1341_v25 = vadd.f32 %v1340_v22, %v6635_v37  ;;  %v1464_v24 = vpop.f32.mrf.mxu1  ;;  %v6720_v22 = vpack.c.bf16 %v1457_v48, %v1454_v45 }
 0x28e   : > { %v6684_v26 = vpop.f32.mrf.mxu0  ;;  %v6707_v60 = vpack.c.bf16 %v1473_v51, %v1470_v41  ;;  %v1465_v63 = vadd.f32 %v1464_v24, %v6694_v36  ;;  %v1414_v24 = vadd.f32 %v6660_v0, %v6694_v36 }
 0x290   : > { %v1344_v29 = vpop.f32.mrf.mxu0  ;;  %v6713_v10 = vpack.c.bf16 %v1465_v63, %v1462_v59  ;;  %5337 = vmatprep.subr.bf16.mxu1 %v6707_v60  ;;  %v6771_v63 = vpack.c.bf16 %v1417_v3, %v1414_v24 }
 0x291   : > { %v1345_v19 = vadd.f32 %v1344_v29, %v6635_v37  ;;  %5338 = vmatpush3.bf16.msra.mxu1 %v6707_v60 }
 0x292   : > { %v6688_v32 = vpop.f32.mrf.mxu0  ;;  %5339 = vmatprep.subr.bf16.mxu1 %v6713_v10 }
 0x293   : > { %v6690_v52 = vpack.c.bf16 %v1345_v19, %v1341_v25  ;;  %v1438_v19 = vadd.f32 %v5295_v9, %v6694_v36  ;;  %v1347_v6 = vadd.f32 %v6688_v32, %v6631_v40  ;;  %v1327_v32 = vadd.f32 %v6665_v4, %v6631_v40 }
 0x294   : > { %v1350_v34 = vpop.f32.mrf.mxu0 }
 0x295   : > { %v1351_v35 = vadd.f32 %v1350_v34, %v6635_v37  ;;  %v1441_v34 = vadd.f32 %v5296_v15, %v6694_v36  ;;  %5340 = vmatpush3.bf16.msra.mxu1 %v6713_v10 }
 0x296   : > { %v1352_v27 = vpop.f32.mrf.mxu0  ;;  %5341 = vmatprep.subr.bf16.mxu1 %v6720_v22 }
 0x297   : > { %v1353_v38 = vadd.f32 %v1352_v27, %v6631_v40  ;;  %v6732_v27 = vpack.c.bf16 %v1449_v23, %v1446_v16  ;;  %v6738_v9 = vpack.c.bf16 %v1441_v34, %v1438_v19  ;;  %v1333_v16 = vadd.f32 %v6672_v12, %v6631_v40  ;;  %v6851_v34 = vld [vmem:[%s8869_s27] ss:$0 sm:$0xff] }
 0x298   : > { %v1354_v49 = vpop.f32.mrf.mxu0 }
 0x299   : > { %v1355_v46 = vadd.f32 %v1354_v49, %v6635_v37  ;;  %5342 = vmatpush3.bf16.msra.mxu1 %v6720_v22 }
 0x29a   : > { %v1356_v30 = vpop.f32.mrf.mxu0  ;;  %5343 = vmatprep.subr.bf16.mxu1 %v6732_v27 }
 0x29b   : > { %v6704_v56 = vpack.c.bf16 %v1355_v46, %v1351_v35  ;;  %v1357_v57 = vadd.f32 %v1356_v30, %v6631_v40  ;;  %v1433_v46 = vadd.f32 %v6679_v17, %v6694_v36 }
 0x29c   : > { %v1360_v1 = vpop.f32.mrf.mxu0 }
 0x29d   : > { %v6710_v2 = vpack.c.bf16 %v1357_v57, %v1353_v38  ;;  %v1361_v8 = vadd.f32 %v1360_v1, %v6635_v37  ;;  %v1422_v38 = vadd.f32 %v6655_v62, %v6694_v36  ;;  %5344 = vmatpush3.bf16.msra.mxu1 %v6732_v27  ;;  %v6756_v17 = vpack.c.bf16 %v1433_v46, %v1430_v50 }
 0x29e   : > { %v1362_v5 = vpop.f32.mrf.mxu0  ;;  %5345 = vmatprep.subr.bf16.mxu1 %v6738_v9  ;;  %v1343_v36 = vadd.f32 %v6684_v26, %v6631_v40 }
 0x29f   : > { %1976 = vrot.lane.b32.xlu0 %v6710_v2, %s6110_s3  ;;  %v1363_v21 = vadd.f32 %v1362_v5, %v6631_v40  ;;  %v6764_v57 = vpack.c.bf16 %v1425_v14, %v1422_v38  ;;  %v1337_v5 = vadd.f32 %v6677_v11, %v6631_v40  ;;  %v1317_v11 = vadd.f32 %v6651_v58, %v6631_v40 }
 0x2a0   : > { %v1364_v25 = vpop.f32.mrf.mxu0  ;;  %v6784_v1 = vpack.c.bf16 %v1347_v6, %v1343_v36 }
 0x2a1   : > { %v1365_v29 = vadd.f32 %v1364_v25, %v6635_v37  ;;  %5346 = vmatpush3.bf16.msra.mxu1 %v6738_v9  ;;  %v6794_v23 = vpack.c.bf16 %v1337_v5, %v1333_v16 }
 0x2a2   : > { %v1366_v31 = vpop.f32.mrf.mxu0  ;;  %5347 = vmatprep.subr.bf16.mxu1 %v6756_v17  ;;  %v1539_v26 = vsel %vm1501_vm0, %v6784_v1, 0 }
 0x2a3   : > { %v6729_v35 = vpack.c.bf16 %v1365_v29, %v1361_v8  ;;  %v1367_v28 = vadd.f32 %v1366_v31, %v6631_v40  ;;  %v1542_v8 = vsel %vm1501_vm0, %v6710_v2, 0  ;;  %v1536_v12 = vsel %vm1501_vm0, %v6794_v23, 0 }
 0x2a4   : > { %v1370_v33 = vpop.f32.mrf.mxu0  ;;  %v1313_v29 = vadd.f32 %v6648_v55, %v6631_v40 }
 0x2a5   : > { %v1491_v39 = vpack.c.bf16 %v1367_v28, %v1363_v21  ;;  %v1371_v41 = vadd.f32 %v1370_v33, %v6635_v37  ;;  %5348 = vmatpush3.bf16.msra.mxu1 %v6756_v17 }
 0x2a6   : > { %v1372_v49 = vpop.f32.mrf.mxu0  ;;  %5349 = vmatprep.subr.bf16.mxu1 %v6764_v57  ;;  %v6814_v31 = vpack.c.bf16 %v1317_v11, %v1313_v29 }
 0x2a7   : > { %1978 = vrot.lane.b32.xlu1 %v1491_v39, %s6110_s3  ;;  %v1373_v30 = vadd.f32 %v1372_v49, %v6631_v40  ;;  %v1545_v0 = vsel %vm1501_vm0, %v1491_v39, 0 }
 0x2a8   : > { %v1374_v15 = vpop.f32.mrf.mxu0  ;;  %v1530_v4 = vsel %vm1501_vm0, %v6814_v31, 0 }
 0x2a9   : > { %v1375_v59 = vadd.f32 %v1374_v15, %v6635_v37  ;;  %5350 = vmatpush3.bf16.msra.mxu1 %v6764_v57 }
 0x2aa   : > { %v1376_v51 = vpop.f32.mrf.mxu0  ;;  %5351 = vmatprep.subr.bf16.mxu1 %v6771_v63 }
 0x2ab   : > { %v6750_v45 = vpack.c.bf16 %v1375_v59, %v1371_v41  ;;  %v1377_v48 = vadd.f32 %v1376_v51, %v6631_v40 }
 0x2ad   : > { %v1492_v37 = vpack.c.bf16 %v1377_v48, %v1373_v30  ;;  %5352 = vmatpush3.bf16.msra.mxu1 %v6771_v63 }
 0x2af   : > { %5481 = vmatprep.subr.msk.bf16.mxu0 %vm1501_vm0, %v1492_v37  ;;  %1980 = vrot.lane.b32.xlu0 %v1492_v37, %s6110_s3  ;;  %v1548_v62 = vsel %vm1501_vm0, %v1492_v37, 0 }
 0x2b0   : > { %5306 = vmatpush3.bf16.xpose.msra.mxu0 %v1548_v62 }
 0x2b1   : > { %5482 = vmatprep.subr.msk.bf16.mxu0 %vm1501_vm0, %v1491_v39 }
 0x2b8   : > { %5308 = vmatpush3.bf16.xpose.msra.mxu0 %v1545_v0 }
 0x2b9   : > { %5483 = vmatprep.subr.msk.bf16.mxu0 %vm1501_vm0, %v6710_v2  ;;  %v1323_v2 = vadd.f32 %v6658_v61, %v6631_v40  ;;  %v1527_v40 = vsel %vm1501_vm0, %v6643_v18, 0 }
 0x2bb   : > { %v6804_v25 = vpack.c.bf16 %v1327_v32, %v1323_v2 }
 0x2bd   : > { %v1533_v61 = vsel %vm1501_vm0, %v6804_v25, 0 }
 0x2c0   : > { %5310 = vmatpush3.bf16.xpose.msra.mxu0 %v1542_v8 }
 0x2c1   : > { %5484 = vmatprep.subr.msk.bf16.mxu0 %vm1501_vm0, %v6784_v1 }
 0x2c8   : > { %5312 = vmatpush3.bf16.xpose.msra.mxu0 %v1539_v26 }
 0x2c9   : > { %5485 = vmatprep.subr.msk.bf16.mxu0 %vm1501_vm0, %v6794_v23 }
 0x2d0   : > { %5314 = vmatpush3.bf16.xpose.msra.mxu0 %v1536_v12 }
 0x2d1   : > { %5486 = vmatprep.subr.msk.bf16.mxu0 %vm1501_vm0, %v6804_v25 }
 0x2d8   : > { %5316 = vmatpush3.bf16.xpose.msra.mxu0 %v1533_v61 }
 0x2d9   : > { %5487 = vmatprep.subr.msk.bf16.mxu0 %vm1501_vm0, %v6814_v31 }
 0x2e0   : > { %5318 = vmatpush3.bf16.xpose.msra.mxu0 %v1530_v4 }
 0x2e1   : > { %5488 = vmatprep.subr.msk.bf16.mxu0 %vm1501_vm0, %v6643_v18 }
 0x2e8   : > { %5320 = vmatpush3.bf16.xpose.msra.mxu0 %v1527_v40 }
 0x2ef   : > { %5322 = vmatmul.mubr.msk.bf16.vlgmr.msra.gmra.mxu0 %vm1501_vm0, %v6653_v47 }
 0x2f0   : > { %5325 = vmatprep.mubr.msk.bf16.mxu0 %vm1501_vm0, %v6669_v7 }
 0x2f7   : > { %5326 = vmatmul.mubr.msk.bf16.gmra.mxu0 %vm1501_vm0, %v6681_v20 }
 0x2f8   : > { %5329 = vmatprep.mubr.msk.bf16.mxu0 %vm1501_vm0, %v6690_v52 }
 0x2ff   : > { %5330 = vmatmul.mubr.msk.bf16.gmra.mxu0 %vm1501_vm0, %v6704_v56 }
 0x300   : > { %5333 = vmatprep.mubr.msk.bf16.mxu0 %vm1501_vm0, %v6729_v35 }
 0x307   : > { %5334 = vmatmul.mubr.msk.bf16.gmra.mxu0 %vm1501_vm0, %v6750_v45 }
 0x311   : > { %v6840_v55 = vpop.permute.xlu0 %1976 }
 0x321   : > { %v6842_v58 = vpop.permute.xlu0 %1980 }
 0x322   : > { %5489 = vmatprep.subr.msk.bf16.mxu1 %vm1501_vm0, %v6842_v58 }
 0x3af   : > { %v5323_v19 = vpop.f32.mrf.mxu0 }
 0x3b0   : > { %v1649_v21 = vmul.f32 0.125, %v5323_v19 }
 0x3b1   : > { %v1584_v28 = vpop.f32.mrf.mxu0 }
 0x3b2   : > { %v1647_v33 = vmul.f32 0.125, %v1584_v28  ;;  %v6854_v39 = vadd.f32 %v6851_v34, %v1649_v21 }
 0x3b3   : > { %v5324_v41 = vpop.f32.mrf.mxu0 }
 0x3b4   : > { %v1650_v49 = vmul.f32 0.125, %v5324_v41  ;;  %1689 = vmax.xlane.f32.xlu1 %v6854_v39  ;;  %v6858_v15 = vadd.f32 %v6851_v34, %v1647_v33 }
 0x3b5   : > { %v1587_v50 = vpop.f32.mrf.mxu0 }
 0x3b6   : > { %v1648_v46 = vmul.f32 0.125, %v1587_v50  ;;  %1685 = vmax.xlane.f32.xlu0 %v6858_v15  ;;  %v6862_v59 = vadd.f32 %v6851_v34, %v1650_v49 }
 0x3b7   : > { %v5327_v51 = vpop.f32.mrf.mxu0 }
 0x3b8   : > { %v1653_v38 = vmul.f32 0.125, %v5327_v51  ;;  %1691 = vmax.xlane.f32.xlu1 %v6862_v59  ;;  %v6866_v30 = vadd.f32 %v6851_v34, %v1648_v46 }
 0x3b9   : > { %v1600_v48 = vpop.f32.mrf.mxu0 }
 0x3ba   : > { %v1651_v14 = vmul.f32 0.125, %v1600_v48  ;;  %1687 = vmax.xlane.f32.xlu0 %v6866_v30  ;;  %v6870_v37 = vadd.f32 %v6851_v34, %v1653_v38 }
 0x3bb   : > { %v5328_v62 = vpop.f32.mrf.mxu0 }
 0x3bc   : > { %1697 = vmax.xlane.f32.xlu1 %v6870_v37  ;;  %v1654_v3 = vmul.f32 0.125, %v5328_v62  ;;  %v6874_v0 = vadd.f32 %v6851_v34, %v1651_v14 }
 0x3bd   : > { %v1603_v24 = vpop.f32.mrf.mxu0 }
 0x3be   : > { %v1652_v8 = vmul.f32 0.125, %v1603_v24  ;;  %v6878_v5 = vadd.f32 %v6851_v34, %v1654_v3 }
 0x3bf   : > { %v5331_v6 = vpop.f32.mrf.mxu0 }
 0x3c0   : > { %1693 = vmax.xlane.f32.xlu1 %v6874_v0  ;;  %v6882_v2 = vadd.f32 %v6851_v34, %v1652_v8 }
 0x3c1   : > { %v1616_v36 = vpop.f32.mrf.mxu0 }
 0x3c2   : > { %v1655_v46 = vmul.f32 0.125, %v1616_v36 }
 0x3c3   : > { %v5332_v16 = vpop.f32.mrf.mxu0 }
 0x3c4   : > { %1699 = vmax.xlane.f32.xlu1 %v6878_v5  ;;  %v1658_v38 = vmul.f32 0.125, %v5332_v16  ;;  %v6916_v48 = vadd.f32 %v6851_v34, %v1655_v46  ;;  %v2022_v46 = vsel %vm1501_vm0, %v6840_v55, 0 }
 0x3c5   : > { %v1619_v26 = vpop.f32.mrf.mxu0 }
 0x3c6   : > { %v1656_v32 = vmul.f32 0.125, %v1619_v26  ;;  %v6922_v14 = vadd.f32 %v6851_v34, %v1658_v38 }
 0x3c7   : > { %v5335_v12 = vpop.f32.mrf.mxu0 }
 0x3c8   : > { %1695 = vmax.xlane.f32.xlu1 %v6882_v2  ;;  %v1661_v11 = vmul.f32 0.125, %v5335_v12  ;;  %v6886_v29 = vadd.f32 %v6851_v34, %v1656_v32 }
 0x3c9   : > { %v1632_v61 = vpop.f32.mrf.mxu0 }
 0x3ca   : > { %v1659_v4 = vmul.f32 0.125, %v1632_v61  ;;  %v6890_v40 = vadd.f32 %v6851_v34, %v1661_v11 }
 0x3cb   : > { %v5336_v19 = vpop.f32.mrf.mxu0 }
 0x3cc   : > { %1703 = vmax.xlane.f32.xlu1 %v6886_v29  ;;  %v1662_v21 = vmul.f32 0.125, %v5336_v19  ;;  %v6896_v28 = vadd.f32 %v6851_v34, %v1659_v4 }
 0x3cd   : > { %v1635_v33 = vpop.f32.mrf.mxu0 }
 0x3ce   : > { %v1660_v41 = vmul.f32 0.125, %v1635_v33  ;;  %v6900_v49 = vadd.f32 %v6851_v34, %v1662_v21 }
 0x3d0   : > { %1974 = vrot.lane.b32.xlu0 %v6784_v1, %s6110_s3  ;;  %1713 = vmax.xlane.f32.xlu1 %v6890_v40  ;;  %v6904_v50 = vadd.f32 %v6851_v34, %v1660_v41  ;;  %v1657_v1 = vmul.f32 0.125, %v5331_v6 }
 0x3d2   : > { %v6910_v51 = vadd.f32 %v6851_v34, %v1657_v1 }
 0x3d4   : > { %1709 = vmax.xlane.f32.xlu1 %v6896_v28 }
 0x3d8   : > { %1715 = vmax.xlane.f32.xlu1 %v6900_v49 }
 0x3dc   : > { %1711 = vmax.xlane.f32.xlu1 %v6904_v50 }
 0x3ed   : > { %1972 = vrot.lane.b32.xlu1 %v6794_v23, %s6110_s3 }
 0x3ef   : > { %1705 = vmax.xlane.f32.xlu0 %v6910_v51 }
 0x3f1   : > { %1944 = vrot.lane.b32.xlu1 %v6653_v47, %s6110_s3  ;;  %v1979_v47 = vpop.permute.xlu1 %1978 }
 0x3f2   : > { %v2025_v4 = vsel %vm1501_vm0, %v1979_v47, 0 }
 0x3f3   : > { %1701 = vmax.xlane.f32.xlu0 %v6916_v48 }
 0x3f5   : > { %1948 = vrot.lane.b32.xlu1 %v6681_v20, %s6110_s3 }
 0x3f7   : > { %1707 = vmax.xlane.f32.xlu0 %v6922_v14 }
 0x3f9   : > { %1952 = vrot.lane.b32.xlu1 %v6704_v56, %s6110_s3 }
 0x3fd   : > { %1956 = vrot.lane.b32.xlu1 %v6750_v45, %s6110_s3 }
 0x401   : > { %2299 = vrot.lane.b32.xlu1 %v6713_v10, %s6110_s3 }
 0x405   : > { %2297 = vrot.lane.b32.xlu1 %v6720_v22, %s6110_s3 }
 0x409   : > { %2295 = vrot.lane.b32.xlu1 %v6732_v27, %s6110_s3 }
 0x40d   : > { %1970 = vrot.lane.b32.xlu0 %v6804_v25, %s6110_s3 }
 0x411   : > { %1968 = vrot.lane.b32.xlu0 %v6814_v31, %s6110_s3 }
 0x415   : > { %1966 = vrot.lane.b32.xlu0 %v6643_v18, %s6110_s3 }
 0x419   : > { %1942 = vrot.lane.b32.xlu0 %v6640_v53, %s6110_s3 }
 0x41d   : > { %1946 = vrot.lane.b32.xlu0 %v6669_v7, %s6110_s3 }
 0x421   : > { %1950 = vrot.lane.b32.xlu0 %v6690_v52, %s6110_s3 }
 0x425   : > { %1954 = vrot.lane.b32.xlu0 %v6729_v35, %s6110_s3 }
 0x429   : > { %2301 = vrot.lane.b32.xlu0 %v6707_v60, %s6110_s3 }
 0x43d   : > { %v1690_v20 = vpop.xlane.xlu1 %1689 }
 0x43e   : > { %v1719_v10 = vsub.f32 %v6854_v39, %v1690_v20 }
 0x43f   : > { %v1686_v56 = vpop.xlane.xlu0 %1685 }
 0x440   : > { %v1717_v18 = vsub.f32 %v6858_v15, %v1686_v56  ;;  %v1737_v23 = vmul.f32 1.442695, %v1719_v10 }
 0x441   : > { %v1692_v53 = vpop.xlane.xlu1 %1691 }
 0x442   : > { %v1733_v22 = vmul.f32 1.442695, %v1717_v18  ;;  %v1720_v7 = vsub.f32 %v6862_v59, %v1692_v53 }
 0x443   : > { %v1688_v27 = vpop.xlane.xlu0 %1687 }
 0x444   : > { %v1739_v45 = vmul.f32 1.442695, %v1720_v7  ;;  %v1718_v52 = vsub.f32 %v6866_v30, %v1688_v27  ;;  %5733 = vpow2.f32 %v1733_v22 }
 0x445   : > { %v1698_v35 = vpop.xlane.xlu1 %1697 }
 0x446   : > { %v1735_v25 = vmul.f32 1.442695, %v1718_v52  ;;  %5735 = vpow2.f32 %v1739_v45  ;;  %v1723_v62 = vsub.f32 %v6870_v37, %v1698_v35 }
 0x447   : > { %v1975_v38 = vpop.permute.xlu0 %1974 }
 0x448   : > { %5737 = vpow2.f32 %v1735_v25  ;;  %v1745_v36 = vmul.f32 1.442695, %v1723_v62  ;;  %v2019_v20 = vsel %vm1501_vm0, %v1975_v38, 0 }
 0x449   : > { %5739 = vpow2.f32 %v1737_v23  ;;  %v1694_v60 = vpop.xlane.xlu1 %1693 }
 0x44a   : > { %v1721_v31 = vsub.f32 %v6874_v0, %v1694_v60 }
 0x44c   : > { %v1741_v59 = vmul.f32 1.442695, %v1721_v31 }
 0x44d   : > { %v1700_v15 = vpop.xlane.xlu1 %1699 }
 0x44e   : > { %v1724_v39 = vsub.f32 %v6878_v5, %v1700_v15  ;;  %5741 = vpow2.f32 %v1741_v59 }
 0x450   : > { %v1747_v24 = vmul.f32 1.442695, %v1724_v39 }
 0x451   : > { %v1696_v3 = vpop.xlane.xlu1 %1695  ;;  %v6959_v6 = vpop.eup %5733 }
 0x452   : > { %v1722_v30 = vsub.f32 %v6882_v2, %v1696_v3  ;;  %5743 = vpow2.f32 %v1747_v24  ;;  %v2028_v2 = vsel %vm1501_vm0, %v6842_v58, 0 }
 0x453   : > { %v6961_v8 = vpop.eup %5735 }
 0x454   : > { %v1743_v16 = vmul.f32 1.442695, %v1722_v30 }
 0x455   : > { %v6963_v26 = vpop.eup %5737  ;;  %v1704_v0 = vpop.xlane.xlu1 %1703 }
 0x456   : > { %v6965_v32 = vpop.eup %5739  ;;  %5745 = vpow2.f32 %v1743_v16  ;;  %v1797_v37 = vpack.c.bf16 %v6963_v26, %v6959_v6  ;;  %v1726_v18 = vsub.f32 %v6886_v29, %v1704_v0 }
 0x457   : > { %5747 = vpow2.f32 %v1745_v36  ;;  %v1798_v5 = vpack.c.bf16 %v6961_v8, %v6965_v32 }
 0x458   : > { %5353 = vmatprep.mubr.bf16.mxu1 %v1797_v37 }
 0x459   : > { %5354 = vmatmul.mubr.bf16.vlgmr.msra.gmra.mxu1 %v1798_v5  ;;  %v1714_v12 = vpop.xlane.xlu1 %1713 }
 0x45a   : > { %5370 = vmatpush3.bf16.xpose.msra.mxu1 %v2028_v2  ;;  %v1731_v39 = vsub.f32 %v6890_v40, %v1714_v12 }
 0x45b   : > { %5490 = vmatprep.subr.msk.bf16.mxu1 %vm1501_vm0, %v1979_v47  ;;  %v6974_v61 = vpop.eup %5741 }
 0x45d   : > { %v1710_v11 = vpop.xlane.xlu1 %1709 }
 0x45e   : > { %v1729_v52 = vsub.f32 %v6896_v28, %v1710_v11 }
 0x45f   : > { %v6977_v19 = vpop.eup %5743 }
 0x460   : > { %v1757_v31 = vmul.f32 1.442695, %v1729_v52 }
 0x461   : > { %v1716_v1 = vpop.xlane.xlu1 %1715 }
 0x462   : > { %5372 = vmatpush3.bf16.xpose.msra.mxu1 %v2025_v4  ;;  %v1732_v15 = vsub.f32 %v6900_v49, %v1716_v1 }
 0x463   : > { %v6979_v21 = vpop.eup %5745  ;;  %5491 = vmatprep.subr.msk.bf16.mxu1 %vm1501_vm0, %v6840_v55  ;;  %v1751_v55 = vmul.f32 1.442695, %v1726_v18 }
 0x464   : > { %v6983_v33 = vpop.eup %5747  ;;  %v1799_v58 = vpack.c.bf16 %v6979_v21, %v6974_v61  ;;  %v1763_v62 = vmul.f32 1.442695, %v1732_v15 }
 0x465   : > { %v1800_v41 = vpack.c.bf16 %v6977_v19, %v6983_v33  ;;  %v1712_v47 = vpop.xlane.xlu1 %1711  ;;  %5749 = vpow2.f32 %v1751_v55 }
 0x466   : > { %5357 = vmatprep.mubr.bf16.mxu1 %v1799_v58  ;;  %v1730_v22 = vsub.f32 %v6904_v50, %v1712_v47 }
 0x467   : > { %5358 = vmatmul.mubr.bf16.gmra.mxu1 %v1800_v41 }
 0x468   : > { %v1759_v23 = vmul.f32 1.442695, %v1730_v22 }
 0x469   : > { %v1973_v56 = vpop.permute.xlu1 %1972 }
 0x46a   : > { %5374 = vmatpush3.bf16.xpose.msra.mxu1 %v2022_v46  ;;  %v2016_v53 = vsel %vm1501_vm0, %v1973_v56, 0 }
 0x46b   : > { %5492 = vmatprep.subr.msk.bf16.mxu1 %vm1501_vm0, %v1975_v38 }
 0x472   : > { %5376 = vmatpush3.bf16.xpose.msra.mxu1 %v2019_v20  ;;  %v7006_v3 = vpop.eup %5749 }
 0x473   : > { %5493 = vmatprep.subr.msk.bf16.mxu1 %vm1501_vm0, %v1973_v56 }
 0x478   : > { %v1706_v10 = vpop.xlane.xlu0 %1705 }
 0x479   : > { %v1727_v7 = vsub.f32 %v6910_v51, %v1706_v10 }
 0x47a   : > { %5378 = vmatpush3.bf16.xpose.msra.mxu1 %v2016_v53 }
 0x47b   : > { %v1753_v25 = vmul.f32 1.442695, %v1727_v7 }
 0x47c   : > { %v1702_v27 = vpop.xlane.xlu0 %1701 }
 0x47d   : > { %v1725_v45 = vsub.f32 %v6916_v48, %v1702_v27  ;;  %v1945_v48 = vpop.permute.xlu1 %1944 }
 0x47f   : > { %v1749_v35 = vmul.f32 1.442695, %v1725_v45 }
 0x480   : > { %v1708_v60 = vpop.xlane.xlu0 %1707 }
 0x481   : > { %5751 = vpow2.f32 %v1749_v35  ;;  %v1728_v29 = vsub.f32 %v6922_v14, %v1708_v60  ;;  %v1761_v14 = vmul.f32 1.442695, %v1731_v39  ;;  %v1949_v49 = vpop.permute.xlu1 %1948 }
 0x482   : > { %5753 = vpow2.f32 %v1759_v23 }
 0x483   : > { %v1755_v50 = vmul.f32 1.442695, %v1728_v29  ;;  %5755 = vpow2.f32 %v1753_v25 }
 0x484   : > { %v1971_v51 = vpop.permute.xlu0 %1970 }
 0x485   : > { %5757 = vpow2.f32 %v1755_v50  ;;  %5494 = vmatprep.subr.msk.bf16.mxu1 %vm1501_vm0, %v1971_v51  ;;  %v2013_v28 = vsel %vm1501_vm0, %v1971_v51, 0  ;;  %v1953_v2 = vpop.permute.xlu1 %1952 }
 0x486   : > { %5759 = vpow2.f32 %v1757_v31  ;;  %5380 = vmatpush3.bf16.xpose.msra.mxu1 %v2013_v28 }
 0x487   : > { %5761 = vpow2.f32 %v1763_v62 }
 0x488   : > { %v1969_v59 = vpop.permute.xlu0 %1968  ;;  %5763 = vpow2.f32 %v1761_v14 }
 0x489   : > { %5495 = vmatprep.subr.msk.bf16.mxu1 %vm1501_vm0, %v1969_v59  ;;  %v2010_v40 = vsel %vm1501_vm0, %v1969_v59, 0  ;;  %v1957_v46 = vpop.permute.xlu1 %1956 }
 0x48c   : > { %v1967_v24 = vpop.permute.xlu0 %1966 }
 0x48d   : > { %v2007_v41 = vsel %vm1501_vm0, %v1967_v24, 0  ;;  %v2300_v18 = vpop.permute.xlu1 %2299 }
 0x48e   : > { %v7009_v30 = vpop.eup %5751  ;;  %5382 = vmatpush3.bf16.xpose.msra.mxu1 %v2010_v40 }
 0x48f   : > { %5496 = vmatprep.subr.msk.bf16.mxu1 %vm1501_vm0, %v1967_v24  ;;  %v1801_v36 = vpack.c.bf16 %v7006_v3, %v7009_v30  ;;  %v7014_v16 = vpop.eup %5753 }
 0x490   : > { %v1943_v0 = vpop.permute.xlu0 %1942  ;;  %v7016_v37 = vpop.eup %5755 }
 0x491   : > { %5361 = vmatprep.mubr.bf16.mxu1 %v1801_v36  ;;  %v2298_v53 = vpop.permute.xlu1 %2297 }
 0x492   : > { %v7018_v5 = vpop.eup %5757 }
 0x493   : > { %v7020_v12 = vpop.eup %5759  ;;  %v1802_v11 = vpack.c.bf16 %v7018_v5, %v7016_v37 }
 0x494   : > { %v1947_v4 = vpop.permute.xlu0 %1946  ;;  %v1803_v58 = vpack.c.bf16 %v7014_v16, %v7020_v12  ;;  %v7027_v1 = vpop.eup %5761 }
 0x495   : > { %5362 = vmatmul.mubr.bf16.gmra.mxu1 %v1802_v11  ;;  %v7029_v47 = vpop.eup %5763  ;;  %v2296_v22 = vpop.permute.xlu1 %2295 }
 0x496   : > { %5365 = vmatprep.mubr.bf16.mxu1 %v1803_v58  ;;  %5384 = vmatpush3.bf16.xpose.msra.mxu1 %v2007_v41  ;;  %v1804_v20 = vpack.c.bf16 %v7027_v1, %v7029_v47 }
 0x498   : > { %v1951_v38 = vpop.permute.xlu0 %1950 }
 0x49c   : > { %v1955_v56 = vpop.permute.xlu0 %1954 }
 0x49d   : > { %5366 = vmatmul.mubr.bf16.gmra.mxu1 %v1804_v20 }
 0x49e   : > { %5385 = vmatprep.mubr.msk.bf16.mxu1 %vm1501_vm0, %v1943_v0 }
 0x4a0   : > { %v2302_v10 = vpop.permute.xlu0 %2301 }
 0x4a1   : > { %5401 = vmatprep.subr.bf16.mxu0 %v2302_v10 }
 0x4a2   : > { %5402 = vmatpush3.bf16.msra.mxu0 %v2302_v10 }
 0x4a3   : > { %5403 = vmatprep.subr.bf16.mxu0 %v2300_v18 }
 0x4a5   : > { %5386 = vmatmul.mubr.msk.bf16.vlgmr.msra.gmra.mxu1 %vm1501_vm0, %v1945_v48 }
 0x4a6   : > { %5389 = vmatprep.mubr.msk.bf16.mxu1 %vm1501_vm0, %v1947_v4  ;;  %5404 = vmatpush3.bf16.msra.mxu0 %v2300_v18 }
 0x4a7   : > { %5405 = vmatprep.subr.bf16.mxu0 %v2298_v53 }
 0x4aa   : > { %5406 = vmatpush3.bf16.msra.mxu0 %v2298_v53 }
 0x4ab   : > { %5407 = vmatprep.subr.bf16.mxu0 %v2296_v22 }
 0x4ad   : > { %5390 = vmatmul.mubr.msk.bf16.gmra.mxu1 %vm1501_vm0, %v1949_v49 }
 0x4ae   : > { %5393 = vmatprep.mubr.msk.bf16.mxu1 %vm1501_vm0, %v1951_v38  ;;  %5408 = vmatpush3.bf16.msra.mxu0 %v2296_v22 }
 0x4b5   : > { %5394 = vmatmul.mubr.msk.bf16.gmra.mxu1 %vm1501_vm0, %v1953_v2 }
 0x4b6   : > { %5397 = vmatprep.mubr.msk.bf16.mxu1 %vm1501_vm0, %v1955_v56 }
 0x4bd   : > { %5398 = vmatmul.mubr.msk.bf16.gmra.mxu1 %vm1501_vm0, %v1957_v46 }
 0x4be   : > { %3189 = vmatprep.mubr.bf16.mxu1 %v6109_v54 }
 0x519   : > { %v7042_v55 = vpop.f32.mrf.mxu1 }
 0x51b   : > { %v7044_v7 = vpop.f32.mrf.mxu1 }
 0x51d   : > { %v7046_v27 = vpop.f32.mrf.mxu1 }
 0x51f   : > { %v7048_v45 = vpop.f32.mrf.mxu1 }
 0x527   : > { %v7050_v52 = vpop.f32.mrf.mxu1 }
 0x529   : > { %v7052_v23 = vpop.f32.mrf.mxu1 }
 0x52b   : > { %v7054_v35 = vpop.f32.mrf.mxu1 }
 0x52d   : > { %v7056_v25 = vpop.f32.mrf.mxu1 }
 0x555   : > { %v7058_v60 = vpop.f32.mrf.mxu1 }
 0x557   : > { %v7060_v29 = vpop.f32.mrf.mxu1 }
 0x559   : > { %v7062_v31 = vpop.f32.mrf.mxu1 }
 0x55b   : > { %v7064_v15 = vpop.f32.mrf.mxu1 }
 0x55d   : > { %v7066_v50 = vpop.f32.mrf.mxu1 }
 0x55f   : > { %v7068_v51 = vpop.f32.mrf.mxu1 }
 0x561   : > { %v7070_v39 = vpop.f32.mrf.mxu1 }
 0x563   : > { %v7072_v28 = vpop.f32.mrf.mxu1 }
 0x565   : > { %v5387_v48 = vpop.f32.mrf.mxu1 }
 0x566   : > { %v2129_v62 = vmul.f32 0.125, %v5387_v48 }
 0x567   : > { %v2064_v59 = vpop.f32.mrf.mxu1 }
 0x568   : > { %v2127_v14 = vmul.f32 0.125, %v2064_v59  ;;  %v7075_v49 = vadd.f32 %v6851_v34, %v2129_v62 }
 0x569   : > { %v5388_v24 = vpop.f32.mrf.mxu1 }
 0x56a   : > { %2163 = vmax.xlane.f32.xlu0 %v7075_v49  ;;  %v2130_v36 = vmul.f32 0.125, %v5388_v24  ;;  %v7079_v2 = vadd.f32 %v6851_v34, %v2127_v14 }
 0x56b   : > { %v2067_v40 = vpop.f32.mrf.mxu1 }
 0x56c   : > { %v2128_v0 = vmul.f32 0.125, %v2067_v40  ;;  %v7087_v41 = vadd.f32 %v6851_v34, %v2130_v36 }
 0x56d   : > { %v5391_v11 = vpop.f32.mrf.mxu1 }
 0x56e   : > { %2159 = vmax.xlane.f32.xlu0 %v7079_v2  ;;  %v7083_v4 = vadd.f32 %v6851_v34, %v2128_v0  ;;  %v2133_v58 = vmul.f32 0.125, %v5391_v11 }
 0x56f   : > { %v2080_v46 = vpop.f32.mrf.mxu1 }
 0x570   : > { %2161 = vmax.xlane.f32.xlu1 %v7083_v4  ;;  %v2131_v38 = vmul.f32 0.125, %v2080_v46  ;;  %v7091_v20 = vadd.f32 %v6851_v34, %v2133_v58 }
 0x571   : > { %v5392_v56 = vpop.f32.mrf.mxu1 }
 0x572   : > { %2165 = vmax.xlane.f32.xlu0 %v7087_v41  ;;  %v2134_v18 = vmul.f32 0.125, %v5392_v56  ;;  %v7095_v10 = vadd.f32 %v6851_v34, %v2131_v38 }
 0x573   : > { %v2083_v22 = vpop.f32.mrf.mxu1 }
 0x574   : > { %v7099_v53 = vadd.f32 %v6851_v34, %v2134_v18  ;;  %v2132_v62 = vmul.f32 0.125, %v2083_v22 }
 0x575   : > { %v5395_v48 = vpop.f32.mrf.mxu1 }
 0x576   : > { %2171 = vmax.xlane.f32.xlu0 %v7091_v20  ;;  %v7109_v14 = vadd.f32 %v6851_v34, %v2132_v62  ;;  %v2137_v0 = vmul.f32 0.125, %v5395_v48 }
 0x577   : > { %v2096_v59 = vpop.f32.mrf.mxu1 }
 0x578   : > { %v2135_v40 = vmul.f32 0.125, %v2096_v59  ;;  %v7117_v11 = vadd.f32 %v6851_v34, %v2137_v0 }
 0x579   : > { %v5396_v24 = vpop.f32.mrf.mxu1 }
 0x57a   : > { %2167 = vmax.xlane.f32.xlu0 %v7095_v10 }
 0x57b   : > { %v2099_v36 = vpop.f32.mrf.mxu1 }
 0x57c   : > { %v2136_v48 = vmul.f32 0.125, %v2099_v36 }
 0x57e   : > { %2173 = vmax.xlane.f32.xlu0 %v7099_v53 }
 0x581   : > { %2291 = vrot.lane.b32.xlu1 %v6756_v17, %s6110_s3  ;;  %v7113_v17 = vadd.f32 %v6851_v34, %v2135_v40 }
 0x585   : > { %2289 = vrot.lane.b32.xlu1 %v6764_v57, %s6110_s3  ;;  %v5399_v57 = vpop.f32.mrf.mxu1 }
 0x586   : > { %v2141_v56 = vmul.f32 0.125, %v5399_v57 }
 0x587   : > { %v2112_v58 = vpop.f32.mrf.mxu1 }
 0x588   : > { %v2139_v46 = vmul.f32 0.125, %v2112_v58  ;;  %v7131_v22 = vadd.f32 %v6851_v34, %v2141_v56 }
 0x58a   : > { %v7127_v18 = vadd.f32 %v6851_v34, %v2139_v46 }
 0x594   : > { %2293 = vrot.lane.b32.xlu0 %v6738_v9, %s6110_s3  ;;  %v2138_v9 = vmul.f32 0.125, %v5396_v24  ;;  %v7140_v24 = vadd.f32 %v6851_v34, %v2136_v48 }
 0x596   : > { %v7121_v38 = vadd.f32 %v6851_v34, %v2138_v9 }
 0x5a9   : > { %2169 = vmax.xlane.f32.xlu1 %v7109_v14 }
 0x5b3   : > { %2175 = vmax.xlane.f32.xlu0 %v7113_v17 }
 0x5b7   : > { %2179 = vmax.xlane.f32.xlu0 %v7117_v11 }
 0x5ba   : > { %2287 = vrot.lane.b32.xlu1 %v6771_v63, %s6110_s3  ;;  %v5400_v63 = vpop.f32.mrf.mxu1 }
 0x5bb   : > { %2181 = vmax.xlane.f32.xlu0 %v7121_v38  ;;  %v2142_v40 = vmul.f32 0.125, %v5400_v63 }
 0x5bc   : > { %v2115_v62 = vpop.f32.mrf.mxu1 }
 0x5bd   : > { %v2140_v59 = vmul.f32 0.125, %v2115_v62 }
 0x5bf   : > { %2183 = vmax.xlane.f32.xlu0 %v7127_v18 }
 0x5c3   : > { %2187 = vmax.xlane.f32.xlu0 %v7131_v22 }
 0x5c7   : > { %1765 = vadd.xlane.f32.xlu0 %v6959_v6  ;;  %v7144_v6 = vadd.f32 %v6851_v34, %v2140_v59 }
 0x5cb   : > { %1769 = vadd.xlane.f32.xlu0 %v6965_v32  ;;  %v7148_v32 = vadd.f32 %v6851_v34, %v2142_v40 }
 0x5cf   : > { %1773 = vadd.xlane.f32.xlu0 %v6974_v61 }
 0x5d3   : > { %1777 = vadd.xlane.f32.xlu0 %v6983_v33 }
 0x5d7   : > { %1783 = vadd.xlane.f32.xlu0 %v7006_v3 }
 0x5de   : > { %2177 = vmax.xlane.f32.xlu1 %v7140_v24 }
 0x5e2   : > { %2185 = vmax.xlane.f32.xlu1 %v7144_v6 }
 0x5e6   : > { %2189 = vmax.xlane.f32.xlu1 %v7148_v32 }
 0x5ea   : > { %1767 = vadd.xlane.f32.xlu1 %v6963_v26 }
 0x5ee   : > { %1771 = vadd.xlane.f32.xlu1 %v6961_v8 }
 0x5f2   : > { %1775 = vadd.xlane.f32.xlu1 %v6979_v21 }
 0x5f3   : > { %v2164_v61 = vpop.xlane.xlu0 %2163 }
 0x5f4   : > { %v2193_v33 = vsub.f32 %v7075_v49, %v2164_v61 }
 0x5f6   : > { %v2211_v3 = vmul.f32 1.442695, %v2193_v33  ;;  %1779 = vadd.xlane.f32.xlu1 %v6977_v19 }
 0x5f7   : > { %v2160_v36 = vpop.xlane.xlu0 %2159 }
 0x5f8   : > { %5765 = vpow2.f32 %v2211_v3  ;;  %v2191_v0 = vsub.f32 %v7079_v2, %v2160_v36 }
 0x5f9   : > { %v2162_v34 = vpop.xlane.xlu1 %2161 }
 0x5fa   : > { %v2207_v57 = vmul.f32 1.442695, %v2191_v0  ;;  %v2192_v9 = vsub.f32 %v7083_v4, %v2162_v34  ;;  %1781 = vadd.xlane.f32.xlu1 %v7009_v30 }
 0x5fb   : > { %v2166_v26 = vpop.xlane.xlu0 %2165 }
 0x5fc   : > { %5767 = vpow2.f32 %v2207_v57  ;;  %v2209_v8 = vmul.f32 1.442695, %v2192_v9  ;;  %v2194_v21 = vsub.f32 %v7087_v41, %v2166_v26 }
 0x5fd   : > { %v2292_v40 = vpop.permute.xlu1 %2291 }
 0x5fe   : > { %5769 = vpow2.f32 %v2209_v8  ;;  %v2213_v49 = vmul.f32 1.442695, %v2194_v21  ;;  %1787 = vadd.xlane.f32.xlu1 %v7018_v5 }
 0x5ff   : > { %v2172_v19 = vpop.xlane.xlu0 %2171 }
 0x600   : > { %5771 = vpow2.f32 %v2213_v49  ;;  %v2197_v58 = vsub.f32 %v7091_v20, %v2172_v19 }
 0x602   : > { %v2219_v46 = vmul.f32 1.442695, %v2197_v58 }
 0x603   : > { %v2168_v2 = vpop.xlane.xlu0 %2167 }
 0x604   : > { %v2195_v56 = vsub.f32 %v7095_v10, %v2168_v2  ;;  %5773 = vpow2.f32 %v2219_v46  ;;  %v2290_v10 = vpop.permute.xlu1 %2289 }
 0x605   : > { %v5766_v4 = vpop.eup %5765 }
 0x606   : > { %2243 = vadd.xlane.f32.xlu0 %v5766_v4  ;;  %v2215_v30 = vmul.f32 1.442695, %v2195_v56 }
 0x607   : > { %v2174_v63 = vpop.xlane.xlu0 %2173 }
 0x608   : > { %v2198_v48 = vsub.f32 %v7099_v53, %v2174_v63  ;;  %5775 = vpow2.f32 %v2215_v30 }
 0x609   : > { %v5768_v41 = vpop.eup %5767 }
 0x60a   : > { %v2221_v62 = vmul.f32 1.442695, %v2198_v48  ;;  %2239 = vadd.xlane.f32.xlu0 %v5768_v41 }
 0x60b   : > { %v5770_v59 = vpop.eup %5769  ;;  %v2294_v5 = vpop.permute.xlu0 %2293 }
 0x60c   : > { %5777 = vpow2.f32 %v2221_v62  ;;  %5409 = vmatprep.subr.bf16.mxu0 %v2294_v5  ;;  %v2271_v20 = vpack.c.bf16 %v5770_v59, %v5768_v41 }
 0x60d   : > { %v5772_v61 = vpop.eup %5771  ;;  %5410 = vmatpush3.bf16.msra.mxu0 %v2294_v5 }
 0x60e   : > { %1785 = vadd.xlane.f32.xlu0 %v7016_v37  ;;  %2245 = vadd.xlane.f32.xlu1 %v5772_v61 }
 0x60f   : > { %5411 = vmatprep.subr.bf16.mxu0 %v2292_v40  ;;  %5417 = vmatprep.mubr.bf16.mxu0 %v2271_v20 }
 0x611   : > { %5412 = vmatpush3.bf16.msra.mxu0 %v2292_v40  ;;  %v5774_v53 = vpop.eup %5773 }
 0x612   : > { %1791 = vadd.xlane.f32.xlu0 %v7014_v16  ;;  %2241 = vadd.xlane.f32.xlu1 %v5770_v59  ;;  %v2272_v16 = vpack.c.bf16 %v5772_v61, %v5766_v4 }
 0x613   : > { %5413 = vmatprep.subr.bf16.mxu0 %v2290_v10 }
 0x615   : > { %5414 = vmatpush3.bf16.msra.mxu0 %v2290_v10  ;;  %v5776_v33 = vpop.eup %5775 }
 0x616   : > { %2251 = vadd.xlane.f32.xlu0 %v5774_v53  ;;  %1789 = vadd.xlane.f32.xlu1 %v7020_v12 }
 0x619   : > { %v5778_v3 = vpop.eup %5777 }
 0x61a   : > { %2247 = vadd.xlane.f32.xlu0 %v5776_v33  ;;  %2253 = vadd.xlane.f32.xlu1 %v5778_v3  ;;  %v2274_v2 = vpack.c.bf16 %v5778_v3, %v5774_v53 }
 0x632   : > { %v2170_v36 = vpop.xlane.xlu1 %2169 }
 0x633   : > { %v2196_v37 = vsub.f32 %v7109_v14, %v2170_v36 }
 0x635   : > { %v2217_v0 = vmul.f32 1.442695, %v2196_v37 }
 0x636   : > { %v2288_v34 = vpop.permute.xlu1 %2287 }
 0x637   : > { %5779 = vpow2.f32 %v2217_v0  ;;  %5415 = vmatprep.subr.bf16.mxu0 %v2288_v34 }
 0x638   : > { %5416 = vmatpush3.bf16.msra.mxu0 %v2288_v34 }
 0x63b   : > { %5418 = vmatmul.mubr.bf16.vlgmr.msra.gmra.mxu0 %v2272_v16 }
 0x63c   : > { %v2176_v57 = vpop.xlane.xlu0 %2175 }
 0x63d   : > { %v2199_v9 = vsub.f32 %v7113_v17, %v2176_v57 }
 0x63f   : > { %v2223_v49 = vmul.f32 1.442695, %v2199_v9 }
 0x640   : > { %v2180_v26 = vpop.xlane.xlu0 %2179 }
 0x641   : > { %v2201_v12 = vsub.f32 %v7117_v11, %v2180_v26 }
 0x643   : > { %v2227_v8 = vmul.f32 1.442695, %v2201_v12 }
 0x644   : > { %v5780_v21 = vpop.eup %5779  ;;  %v2182_v19 = vpop.xlane.xlu0 %2181 }
 0x645   : > { %5781 = vpow2.f32 %v2227_v8  ;;  %v2202_v14 = vsub.f32 %v7121_v38, %v2182_v19  ;;  %2249 = vadd.xlane.f32.xlu1 %v5780_v21  ;;  %v2273_v58 = vpack.c.bf16 %v5780_v21, %v5776_v33  ;;  %v5645_v8 = vld [vmem:[%s6260_s19 + $0x38] sm:$0xff]   ;;  %v5646_v21 = vld [vmem:[%s6260_s19 + $0x30] sm:$0xff]  }
 0x646   : > { %5783 = vpow2.f32 %v2223_v49  ;;  %5433 = vmatprep.subr.bf16.mxu0 %v5645_v8 }
 0x647   : > { %v2229_v46 = vmul.f32 1.442695, %v2202_v14  ;;  %5421 = vmatprep.mubr.bf16.mxu0 %v2273_v58  ;;  %5434 = vmatpush3.bf16.msra.mxu0 %v5645_v8  ;;  %v5647_v14 = vld [vmem:[%s6260_s19 + $0x28] sm:$0xff]  }
 0x648   : > { %v2184_v56 = vpop.xlane.xlu0 %2183  ;;  %5422 = vmatmul.mubr.bf16.gmra.mxu0 %v2274_v2  ;;  %5435 = vmatprep.subr.bf16.mxu0 %v5646_v21  ;;  %v5648_v2 = vld [vmem:[%s6260_s19 + $0x20] sm:$0xff]  }
 0x649   : > { %5785 = vpow2.f32 %v2229_v46  ;;  %v2203_v4 = vsub.f32 %v7127_v18, %v2184_v56 }
 0x64b   : > { %v2231_v63 = vmul.f32 1.442695, %v2203_v4  ;;  %5436 = vmatpush3.bf16.msra.mxu0 %v5646_v21 }
 0x64c   : > { %v2188_v17 = vpop.xlane.xlu0 %2187  ;;  %5437 = vmatprep.subr.bf16.mxu0 %v5647_v14 }
 0x64d   : > { %v2205_v11 = vsub.f32 %v7131_v22, %v2188_v17  ;;  %v5649_v17 = vld [vmem:[%s6260_s19 + $0x18] sm:$0xff]  }
 0x64f   : > { %v2235_v30 = vmul.f32 1.442695, %v2205_v11  ;;  %5438 = vmatpush3.bf16.msra.mxu0 %v5647_v14  ;;  %v5650_v11 = vld [vmem:[%s6260_s19 + $0x10] sm:$0xff]  }
 0x650   : > { %5439 = vmatprep.subr.bf16.mxu0 %v5648_v2 }
 0x651   : > { %5787 = vpow2.f32 %v2235_v30 }
 0x652   : > { %v5782_v48 = vpop.eup %5781  ;;  %5789 = vpow2.f32 %v2231_v63 }
 0x653   : > { %2259 = vadd.xlane.f32.xlu0 %v5782_v48  ;;  %v5784_v38 = vpop.eup %5783  ;;  %5440 = vmatpush3.bf16.msra.mxu0 %v5648_v2 }
 0x654   : > { %5441 = vmatprep.subr.bf16.mxu0 %v5649_v17 }
 0x656   : > { %v5786_v41 = vpop.eup %5785 }
 0x657   : > { %2255 = vadd.xlane.f32.xlu0 %v5784_v38  ;;  %2261 = vadd.xlane.f32.xlu1 %v5786_v41  ;;  %v2276_v37 = vpack.c.bf16 %v5786_v41, %v5782_v48 }
 0x658   : > { %5442 = vmatpush3.bf16.msra.mxu0 %v5649_v17 }
 0x659   : > { %5443 = vmatprep.subr.bf16.mxu0 %v5650_v11 }
 0x65c   : > { %5444 = vmatpush3.bf16.msra.mxu0 %v5650_v11 }
 0x65e   : > { %v5788_v62 = vpop.eup %5787 }
 0x65f   : > { %2267 = vadd.xlane.f32.xlu0 %v5788_v62  ;;  %v5790_v59 = vpop.eup %5789 }
 0x663   : > { %2263 = vadd.xlane.f32.xlu0 %v5790_v59 }
 0x667   : > { %v2178_v5 = vpop.xlane.xlu1 %2177 }
 0x668   : > { %v2200_v40 = vsub.f32 %v7140_v24, %v2178_v5 }
 0x66a   : > { %v2225_v18 = vmul.f32 1.442695, %v2200_v40 }
 0x66b   : > { %v2186_v20 = vpop.xlane.xlu1 %2185 }
 0x66c   : > { %5791 = vpow2.f32 %v2225_v18  ;;  %v2204_v22 = vsub.f32 %v7144_v6, %v2186_v20  ;;  %v5652_v18 = vld [vmem:[%s6260_s19] sm:$0xff]  }
 0x66e   : > { %v2233_v61 = vmul.f32 1.442695, %v2204_v22 }
 0x66f   : > { %v2190_v10 = vpop.xlane.xlu1 %2189 }
 0x670   : > { %5793 = vpow2.f32 %v2233_v61  ;;  %v2206_v53 = vsub.f32 %v7148_v32, %v2190_v10  ;;  %v7176_v32 = vpop.xlane.xlu0 %1765 }
 0x672   : > { %v2237_v33 = vmul.f32 1.442695, %v2206_v53 }
 0x673   : > { %v7178_v16 = vpop.xlane.xlu1 %1767 }
 0x674   : > { %5795 = vpow2.f32 %v2237_v33  ;;  %v7180_v57 = vpop.xlane.xlu0 %1769 }
 0x677   : > { %v7182_v9 = vpop.xlane.xlu1 %1771 }
 0x678   : > { %v7184_v26 = vpop.xlane.xlu0 %1773 }
 0x679   : > { %v5792_v3 = vpop.eup %5791 }
 0x67a   : > { %2257 = vadd.xlane.f32.xlu1 %v5792_v3  ;;  %v2275_v36 = vpack.c.bf16 %v5792_v3, %v5784_v38 }
 0x67b   : > { %v7186_v12 = vpop.xlane.xlu1 %1775 }
 0x67c   : > { %5425 = vmatprep.mubr.bf16.mxu0 %v2275_v36  ;;  %v7190_v49 = vpop.xlane.xlu0 %1777 }
 0x67d   : > { %v5794_v0 = vpop.eup %5793  ;;  %5426 = vmatmul.mubr.bf16.gmra.mxu0 %v2276_v37 }
 0x67e   : > { %v2277_v24 = vpack.c.bf16 %v5794_v0, %v5790_v59  ;;  %v5651_v59 = vld [vmem:[%s6260_s19 + $0x8] sm:$0xff]  }
 0x67f   : > { %v7192_v19 = vpop.xlane.xlu1 %1779  ;;  %5445 = vmatprep.subr.bf16.mxu0 %v5651_v59 }
 0x680   : > { %5429 = vmatprep.mubr.bf16.mxu0 %v2277_v24  ;;  %v7195_v58 = vpop.xlane.xlu0 %1783  ;;  %5446 = vmatpush3.bf16.msra.mxu0 %v5651_v59 }
 0x681   : > { %v5796_v34 = vpop.eup %5795  ;;  %5447 = vmatprep.subr.bf16.mxu0 %v5652_v18 }
 0x682   : > { %2269 = vadd.xlane.f32.xlu1 %v5796_v34  ;;  %v2278_v6 = vpack.c.bf16 %v5796_v34, %v5788_v62 }
 0x683   : > { %v7198_v46 = vpop.xlane.xlu1 %1781 }
 0x684   : > { %5448 = vmatpush3.bf16.msra.mxu0 %v5652_v18 }
 0x685   : > { %5430 = vmatmul.mubr.bf16.gmra.mxu0 %v2278_v6 }
 0x686   : > { %2265 = vadd.xlane.f32.xlu1 %v5794_v0 }
 0x687   : > { %v7201_v4 = vpop.xlane.xlu1 %1787 }
 0x68f   : > { %v2244_v56 = vpop.xlane.xlu0 %2243 }
 0x690   : > { %5797 = vrcp.f32 %v2244_v56 }
 0x693   : > { %v2240_v30 = vpop.xlane.xlu0 %2239 }
 0x697   : > { %v2246_v63 = vpop.xlane.xlu1 %2245  ;;  %v7204_v48 = vpop.xlane.xlu0 %1785 }
 0x698   : > { %5799 = vrcp.f32 %v2246_v63 }
 0x699   : > { %5801 = vrcp.f32 %v2240_v30 }
 0x69b   : > { %v2242_v38 = vpop.xlane.xlu1 %2241  ;;  %v7206_v41 = vpop.xlane.xlu0 %1791 }
 0x69c   : > { %5803 = vrcp.f32 %v2242_v38 }
 0x69d   : > { %v5798_v10 = vpop.eup %5797 }
 0x69f   : > { %v7208_v62 = vpop.xlane.xlu1 %1789  ;;  %v2252_v5 = vpop.xlane.xlu0 %2251 }
 0x6a0   : > { %5805 = vrcp.f32 %v2252_v5 }
 0x6a3   : > { %v2254_v40 = vpop.xlane.xlu1 %2253  ;;  %v2248_v22 = vpop.xlane.xlu0 %2247 }
 0x6a4   : > { %5807 = vrcp.f32 %v2254_v40 }
 0x6a5   : > { %v5800_v33 = vpop.eup %5799  ;;  %5809 = vrcp.f32 %v2248_v22 }
 0x6a6   : > { %v5802_v36 = vpop.eup %5801 }
 0x6a9   : > { %v5804_v24 = vpop.eup %5803 }
 0x6ad   : > { %v5806_v17 = vpop.eup %5805 }
 0x6b1   : > { %v5808_v11 = vpop.eup %5807 }
 0x6b2   : > { %v5810_v63 = vpop.eup %5809 }
 0x6ce   : > { %v2250_v53 = vpop.xlane.xlu1 %2249 }
 0x6cf   : > { %5811 = vrcp.f32 %v2250_v53 }
 0x6dc   : > { %v5812_v5 = vpop.eup %5811 }
 0x6e0   : > { %v2262_v53 = vpop.xlane.xlu1 %2261 }
 0x6fb   : > { %v5419_v20 = vpop.f32.mrf.mxu0 }
 0x6fc   : > { %v2426_v37 = vmul.f32 %v5798_v10, %v5419_v20  ;;  %v2260_v10 = vpop.xlane.xlu0 %2259 }
 0x6fd   : > { %v2345_v61 = vpop.f32.mrf.mxu0  ;;  %5813 = vrcp.f32 %v2260_v10 }
 0x6fe   : > { %v2424_v6 = vmul.f32 %v5802_v36, %v2345_v61  ;;  %5815 = vrcp.f32 %v2262_v53 }
 0x6ff   : > { %v5420_v3 = vpop.f32.mrf.mxu0 }
 0x700   : > { %v2427_v0 = vmul.f32 %v5800_v33, %v5420_v3  ;;  %v2256_v33 = vpop.xlane.xlu0 %2255 }
 0x701   : > { %v2348_v34 = vpop.f32.mrf.mxu0  ;;  %5817 = vrcp.f32 %v2256_v33 }
 0x702   : > { %v5573_v8 = vpack.i.bf16 %v2427_v0, %v2426_v37  ;;  %v2425_v21 = vmul.f32 %v5804_v24, %v2348_v34 }
 0x703   : > { %v2258_v3 = vpop.xlane.xlu1 %2257 }
 0x704   : > { %v5578_v14 = vpack.i.bf16 %v2425_v21, %v2424_v6  ;;  %5574 = vrot.lane.b32.xlu1 %v5573_v8, %s6110_s3  ;;  %v2268_v36 = vpop.xlane.xlu0 %2267  ;;  %5819 = vrcp.f32 %v2258_v3 }
 0x706   : > { %5579 = vrot.lane.b32.xlu0 %v5578_v14, %s6110_s3 }
 0x708   : > { %v5423_v2 = vpop.f32.mrf.mxu0  ;;  %v2264_v0 = vpop.xlane.xlu0 %2263 }
 0x709   : > { %v2430_v38 = vmul.f32 %v5806_v17, %v5423_v2  ;;  %5821 = vrcp.f32 %v2264_v0 }
 0x70a   : > { %v2361_v56 = vpop.f32.mrf.mxu0  ;;  %v5814_v8 = vpop.eup %5813 }
 0x70b   : > { %v2428_v18 = vmul.f32 %v5810_v63, %v2361_v56  ;;  %v2270_v37 = vpop.xlane.xlu1 %2269  ;;  %v5816_v21 = vpop.eup %5815 }
 0x70c   : > { %v5424_v30 = vpop.f32.mrf.mxu0 }
 0x70d   : > { %v2431_v59 = vmul.f32 %v5808_v11, %v5424_v30 }
 0x70e   : > { %v2364_v40 = vpop.f32.mrf.mxu0  ;;  %v5818_v2 = vpop.eup %5817 }
 0x70f   : > { %v5583_v20 = vpack.i.bf16 %v2431_v59, %v2430_v38  ;;  %v2429_v22 = vmul.f32 %v5812_v5, %v2364_v40  ;;  %v2266_v24 = vpop.xlane.xlu1 %2265 }
 0x710   : > { %5823 = vrcp.f32 %v2266_v24 }
 0x711   : > { %v5588_v61 = vpack.i.bf16 %v2429_v22, %v2428_v18  ;;  %5584 = vrot.lane.b32.xlu1 %v5583_v20, %s6110_s3  ;;  %5825 = vrcp.f32 %v2270_v37  ;;  %v5820_v17 = vpop.eup %5819 }
 0x712   : > { %5827 = vrcp.f32 %v2268_v36 }
 0x713   : > { %5589 = vrot.lane.b32.xlu0 %v5588_v61, %s6110_s3  ;;  %5829 = vrcp.f32 %v7176_v32 }
 0x714   : > { %5831 = vrcp.f32 %v7180_v57 }
 0x715   : > { %5833 = vrcp.f32 %v7182_v9 }
 0x716   : > { %v5822_v18 = vpop.eup %5821  ;;  %5835 = vrcp.f32 %v7178_v16 }
 0x717   : > { %5837 = vrcp.f32 %v7184_v26 }
 0x718   : > { %5839 = vrcp.f32 %v7190_v49 }
 0x719   : > { %5841 = vrcp.f32 %v7192_v19 }
 0x71a   : > { %5843 = vrcp.f32 %v7186_v12 }
 0x71b   : > { %5845 = vrcp.f32 %v7195_v58 }
 0x71c   : > { %5847 = vrcp.f32 %v7198_v46 }
 0x71d   : > { %v5824_v20 = vpop.eup %5823  ;;  %5849 = vrcp.f32 %v7201_v4 }
 0x71e   : > { %v5826_v53 = vpop.eup %5825  ;;  %5851 = vrcp.f32 %v7204_v48 }
 0x71f   : > { %v5828_v36 = vpop.eup %5827  ;;  %5853 = vrcp.f32 %v7206_v41 }
 0x720   : > { %v5830_v24 = vpop.eup %5829  ;;  %5855 = vrcp.f32 %v7208_v62 }
 0x732   : > { %1793 = vadd.xlane.f32.xlu0 %v7029_v47 }
 0x735   : > { %1795 = vadd.xlane.f32.xlu1 %v7027_v1 }
 0x73d   : > { %v5427_v34 = vpop.f32.mrf.mxu0 }
 0x73e   : > { %v2434_v47 = vmul.f32 %v5814_v8, %v5427_v34  ;;  %v5832_v34 = vpop.eup %5831 }
 0x73f   : > { %v2377_v6 = vpop.f32.mrf.mxu0  ;;  %v1920_v57 = vmul.f32 %v5832_v34, %v7042_v55 }
 0x740   : > { %v2432_v30 = vmul.f32 %v5818_v2, %v2377_v6  ;;  %v5834_v6 = vpop.eup %5833 }
 0x741   : > { %v5428_v14 = vpop.f32.mrf.mxu0  ;;  %v5836_v8 = vpop.eup %5835  ;;  %v1921_v9 = vmul.f32 %v5834_v6, %v7046_v27 }
 0x742   : > { %v2435_v56 = vmul.f32 %v5816_v21, %v5428_v14  ;;  %v1919_v49 = vmul.f32 %v5836_v8, %v7048_v45  ;;  %v5838_v55 = vpop.eup %5837 }
 0x743   : > { %v2380_v11 = vpop.f32.mrf.mxu0  ;;  %v5840_v27 = vpop.eup %5839 }
 0x744   : > { %v5598_v63 = vpack.i.bf16 %v2435_v56, %v2434_v47  ;;  %v2433_v1 = vmul.f32 %v5820_v17, %v2380_v11  ;;  %v1918_v47 = vmul.f32 %v5830_v24, %v7044_v7  ;;  %v1924_v45 = vmul.f32 %v5840_v27, %v7050_v52 }
 0x745   : > { %v5431_v38 = vpop.f32.mrf.mxu0 }
 0x746   : > { %v5593_v59 = vpack.i.bf16 %v2433_v1, %v2432_v30  ;;  %5599 = vrot.lane.b32.xlu1 %v5598_v63, %s6110_s3  ;;  %v2438_v37 = vmul.f32 %v5828_v36, %v5431_v38  ;;  %v5842_v63 = vpop.eup %5841 }
 0x747   : > { %v2393_v5 = vpop.f32.mrf.mxu0  ;;  %v5844_v1 = vpop.eup %5843 }
 0x748   : > { %5594 = vrot.lane.b32.xlu0 %v5593_v59, %s6110_s3  ;;  %v2436_v61 = vmul.f32 %v5822_v18, %v2393_v5  ;;  %v1925_v5 = vmul.f32 %v5842_v63, %v7054_v35  ;;  %v1922_v18 = vmul.f32 %v5838_v55, %v7052_v23  ;;  %v5846_v23 = vpop.eup %5845 }
 0x749   : > { %v5432_v40 = vpop.f32.mrf.mxu0  ;;  %v5848_v35 = vpop.eup %5847  ;;  %v1927_v4 = vmul.f32 %v5846_v23, %v7064_v15 }
 0x74a   : > { %v2439_v33 = vmul.f32 %v5826_v53, %v5432_v40  ;;  %v1926_v46 = vmul.f32 %v5848_v35, %v7060_v29 }
 0x74b   : > { %v2396_v22 = vpop.f32.mrf.mxu0 }
 0x74c   : > { %v2437_v10 = vmul.f32 %v5824_v20, %v2396_v22  ;;  %v5608_v0 = vpack.i.bf16 %v2439_v33, %v2438_v37  ;;  %v1923_v20 = vmul.f32 %v5844_v1, %v7056_v25 }
 0x74e   : > { %v5603_v3 = vpack.i.bf16 %v2437_v10, %v2436_v61 }
 0x750   : > { %5604 = vrot.lane.b32.xlu1 %v5603_v3, %s6110_s3 }
 0x754   : > { %5609 = vrot.lane.b32.xlu1 %v5608_v0, %s6110_s3  ;;  %v5850_v0 = vpop.eup %5849 }
 0x755   : > { %v5852_v34 = vpop.eup %5851  ;;  %v1929_v8 = vmul.f32 %v5850_v0, %v7062_v31 }
 0x776   : > { %v5575_v21 = vpop.permute.xlu1 %5574 }
 0x777   : > { %v5577_v32 = vunpack.i.h.bf16 %v5575_v21  ;;  %v5576_v14 = vunpack.i.l.bf16 %v5575_v21  ;;  %v5854_v21 = vpop.eup %5853 }
 0x778   : > { %v5580_v16 = vpop.permute.xlu0 %5579  ;;  %v1931_v31 = vmul.f32 %v5854_v21, %v7072_v28 }
 0x779   : > { %v5582_v2 = vunpack.i.h.bf16 %v5580_v16  ;;  %v5581_v26 = vunpack.i.l.bf16 %v5580_v16  ;;  %v2507_v19 = vsel %vm1501_vm0, %v1921_v9, %v5577_v32  ;;  %v2506_v56 = vsel %vm1501_vm0, %v1920_v57, %v5576_v14  ;;  %v5856_v16 = vpop.eup %5855 }
 0x77a   : > { %v2521_v30 = vpack.c.bf16 %v2507_v19, %v2506_v56  ;;  %v1928_v9 = vmul.f32 %v5852_v34, %v7058_v60  ;;  %v1930_v19 = vmul.f32 %v5856_v16, %v7068_v51 }
 0x77b   : > { %v2504_v12 = vsel %vm1501_vm0, %v1918_v47, %v5581_v26  ;;  %v2505_v17 = vsel %vm1501_vm0, %v1919_v49, %v5582_v2 }
 0x77c   : > { %v2520_v11 = vpack.c.bf16 %v2505_v17, %v2504_v12 }
 0x77e   : > { %5449 = vmatprep.mubr.bf16.mxu0 %v2520_v11 }
 0x77f   : > { %5450 = vmatmul.mubr.bf16.vlgmr.msra.gmra.mxu0 %v2521_v30 }
 0x783   : > { %v5585_v38 = vpop.permute.xlu1 %5584 }
 0x784   : > { %v5587_v7 = vunpack.i.h.bf16 %v5585_v38  ;;  %v5586_v59 = vunpack.i.l.bf16 %v5585_v38 }
 0x785   : > { %v5590_v40 = vpop.permute.xlu0 %5589 }
 0x786   : > { %v5592_v22 = vunpack.i.h.bf16 %v5590_v40  ;;  %v5591_v61 = vunpack.i.l.bf16 %v5590_v40  ;;  %v2510_v10 = vsel %vm1501_vm0, %v1924_v45, %v5586_v59  ;;  %v2511_v53 = vsel %vm1501_vm0, %v1925_v5, %v5587_v7  ;;  %v6053_v40 = vld [vmem:[%s6311_s12] sm:$0xff] }
 0x787   : > { %v2523_v33 = vpack.c.bf16 %v2511_v53, %v2510_v10  ;;  %v6054_v10 = vld [vmem:[%s6311_s12 + $0x8] sm:$0xff] }
 0x788   : > { %v2508_v3 = vsel %vm1501_vm0, %v1922_v18, %v5591_v61  ;;  %v2509_v36 = vsel %vm1501_vm0, %v1923_v20, %v5592_v22 }
 0x789   : > { %v2522_v37 = vpack.c.bf16 %v2509_v36, %v2508_v3  ;;  %v6056_v36 = vld [vmem:[%s6311_s12 + $0x18] sm:$0xff] }
 0x78b   : > { %5453 = vmatprep.mubr.bf16.mxu0 %v2522_v37 }
 0x78c   : > { %5454 = vmatmul.mubr.bf16.gmra.mxu0 %v2523_v33  ;;  %v6055_v33 = vld [vmem:[%s6311_s12 + $0x10] sm:$0xff] }
 0x7bb   : > { %v1794_v52 = vpop.xlane.xlu0 %1793 }
 0x7bc   : > { %5857 = vrcp.f32 %v1794_v52 }
 0x7be   : > { %v1796_v25 = vpop.xlane.xlu1 %1795 }
 0x7bf   : > { %5859 = vrcp.f32 %v1796_v25  ;;  %v5595_v24 = vpop.permute.xlu0 %5594 }
 0x7c0   : > { %v5597_v58 = vunpack.i.h.bf16 %v5595_v24  ;;  %v5596_v6 = vunpack.i.l.bf16 %v5595_v24  ;;  %v6057_v24 = vld [vmem:[%s6311_s12 + $0x20] sm:$0xff] }
 0x7c2   : > { %v5600_v48 = vpop.permute.xlu1 %5599  ;;  %v2512_v41 = vsel %vm1501_vm0, %v1926_v46, %v5596_v6  ;;  %v2513_v62 = vsel %vm1501_vm0, %v1927_v4, %v5597_v58  ;;  %v6058_v46 = vld [vmem:[%s6311_s12 + $0x30] sm:$0xff] }
 0x7c3   : > { %v5602_v32 = vunpack.i.h.bf16 %v5600_v48  ;;  %v5601_v14 = vunpack.i.l.bf16 %v5600_v48  ;;  %v2524_v57 = vpack.c.bf16 %v2513_v62, %v2512_v41  ;;  %v6059_v41 = vld [vmem:[%s6311_s12 + $0x28] sm:$0xff] }
 0x7c5   : > { %5457 = vmatprep.mubr.bf16.mxu0 %v2524_v57  ;;  %v2514_v2 = vsel %vm1501_vm0, %v1928_v9, %v5601_v14  ;;  %v2515_v29 = vsel %vm1501_vm0, %v1929_v8, %v5602_v32  ;;  %v6060_v8 = vld [vmem:[%s6311_s12 + $0x38] sm:$0xff] }
 0x7c6   : > { %v5605_v15 = vpop.permute.xlu1 %5604  ;;  %v2525_v26 = vpack.c.bf16 %v2515_v29, %v2514_v2  ;;  %v6061_v2 = vld [vmem:[%s6311_s12 + $0x40] sm:$0xff] }
 0x7c7   : > { %v5607_v47 = vunpack.i.h.bf16 %v5605_v15  ;;  %v5606_v49 = vunpack.i.l.bf16 %v5605_v15 }
 0x7c8   : > { %5458 = vmatmul.mubr.bf16.gmra.mxu0 %v2525_v26 }
 0x7c9   : > { %v5858_v56 = vpop.eup %5857  ;;  %v2516_v12 = vsel %vm1501_vm0, %v1930_v19, %v5606_v49  ;;  %v2517_v60 = vsel %vm1501_vm0, %v1931_v31, %v5607_v47  ;;  %v6062_v47 = vld [vmem:[%s6311_s12 + $0x50] sm:$0xff]  ;;  %v6063_v31 = vld [vmem:[%s6311_s12 + $0x48] sm:$0xff] }
 0x7ca   : > { %v5610_v17 = vpop.permute.xlu1 %5609  ;;  %v2526_v11 = vpack.c.bf16 %v2517_v60, %v2516_v12  ;;  %v1932_v55 = vmul.f32 %v5858_v56, %v7066_v50  ;;  %v7274_v50 = vld [vmem:[%s8870_s21] ss:$0 sm:$0xff] }
 0x7cb   : > { %v5611_v30 = vunpack.i.l.bf16 %v5610_v17  ;;  %v5612_v63 = vunpack.i.h.bf16 %v5610_v17  ;;  %v6064_v17 = vld [vmem:[%s6311_s12 + $0x58] sm:$0xff] }
 0x7cc   : > { %v5860_v27 = vpop.eup %5859  ;;  %5461 = vmatprep.mubr.bf16.mxu0 %v2526_v11 }
 0x7cd   : > { %v1933_v51 = vmul.f32 %v5860_v27, %v7070_v39  ;;  %v2518_v28 = vsel %vm1501_vm0, %v1932_v55, %v5611_v30 }
 0x7cf   : > { %v2519_v1 = vsel %vm1501_vm0, %v1933_v51, %v5612_v63  ;;  %v6065_v63 = vld [vmem:[%s6311_s12 + $0x60] sm:$0xff] }
 0x7d0   : > { %v2527_v38 = vpack.c.bf16 %v2519_v1, %v2518_v28 }
 0x7d2   : > { %5462 = vmatmul.mubr.bf16.gmra.mxu0 %v2527_v38  ;;  %v6066_v38 = vld [vmem:[%s6311_s12 + $0x70] sm:$0xff] }
 0x7d3   : > { %3302 = vmatprep.mubr.bf16.mxu0 %v6109_v54 }
 0x83f   : > { %v5451_v7 = vpop.f32.mrf.mxu0 }
 0x840   : > { %v2642_v5 = vadd.f32 %v5451_v7, %v7274_v50 }
 0x841   : > { %v2633_v59 = vpop.f32.mrf.mxu0 }
 0x842   : > { %v2634_v39 = vadd.f32 %v7274_v50, %v2633_v59  ;;  %v7288_v3 = vadd.f32 %v6055_v33, %v2642_v5  ;;  %v6068_v5 = vld [vmem:[%s6311_s12 + $0x78] sm:$0xff] }
 0x843   : > { %v5452_v45 = vpop.f32.mrf.mxu0 }
 0x844   : > { %v7279_v18 = vadd.f32 %v6053_v40, %v2634_v39  ;;  %v2645_v61 = vadd.f32 %v5452_v45, %v7274_v50  ;;  %v6067_v39 = vld [vmem:[%s6311_s12 + $0x68] sm:$0xff] }
 0x845   : > { %v2636_v20 = vpop.f32.mrf.mxu0 }
 0x846   : > { %v2637_v22 = vadd.f32 %v7274_v50, %v2636_v20  ;;  %2714 = vadd.xlane.f32.xlu0 %v7279_v18  ;;  %v7293_v37 = vadd.f32 %v6056_v36, %v2645_v61  ;;  %v5653_v20 = vld [vmem:[%s6284_s1 + $0xe0] ss:$16 sps:$4 sm:$0xff]   ;;  %v5656_v61 = vld [vmem:[%s6284_s1 + $0xe8] ss:$16 sps:$4 sm:$0xff]  }
 0x848   : > { %v7285_v53 = vadd.f32 %v6054_v10, %v2637_v22  ;;  %v5655_v22 = vld [vmem:[%s6284_s1 + $0xe4] ss:$16 sps:$4 sm:$0xff]   ;;  %v5658_v10 = vld [vmem:[%s6284_s1 + $0xec] ss:$16 sps:$4 sm:$0xff]  }
 0x849   : > { %3157 = vmatprep.subr.bf16.mxu1 %v5655_v22  ;;  %3270 = vmatprep.subr.bf16.mxu0 %v5658_v10  ;;  %v5685_v22 = vld [vmem:[%s6284_s1 + $0x44] ss:$16 sps:$4 sm:$0xff]   ;;  %v5683_v10 = vld [vmem:[%s6284_s1 + $0x40] ss:$16 sps:$4 sm:$0xff]  }
 0x84a   : > { %2716 = vadd.xlane.f32.xlu1 %v7285_v53  ;;  %2718 = vadd.xlane.f32.xlu0 %v7288_v3 }
 0x84b   : > { %3158 = vmatpush1.bf16.msra.mxu1 %v5653_v20  ;;  %3271 = vmatpush1.bf16.msra.mxu0 %v5656_v61  ;;  %v5680_v20 = vld [vmem:[%s6284_s1 + $0x68] ss:$16 sps:$4 sm:$0xff]   ;;  %v5688_v61 = vld [vmem:[%s6284_s1 + $0x4c] ss:$16 sps:$4 sm:$0xff]  }
 0x84c   : > { %v5455_v52 = vpop.f32.mrf.mxu0 }
 0x84d   : > { %v2658_v0 = vadd.f32 %v5455_v52, %v7274_v50 }
 0x84e   : > { %v2649_v23 = vpop.f32.mrf.mxu0  ;;  %2720 = vadd.xlane.f32.xlu0 %v7293_v37 }
 0x84f   : > { %v2650_v35 = vadd.f32 %v7274_v50, %v2649_v23  ;;  %v7304_v4 = vadd.f32 %v6058_v46, %v2658_v0 }
 0x850   : > { %v5456_v25 = vpop.f32.mrf.mxu0 }
 0x851   : > { %v7299_v34 = vadd.f32 %v6057_v24, %v2650_v35  ;;  %v2661_v48 = vadd.f32 %v5456_v25, %v7274_v50 }
 0x852   : > { %v2652_v58 = vpop.f32.mrf.mxu0 }
 0x853   : > { %v2653_v6 = vadd.f32 %v7274_v50, %v2652_v58  ;;  %2722 = vadd.xlane.f32.xlu0 %v7299_v34  ;;  %v7313_v21 = vadd.f32 %v6060_v8, %v2661_v48 }
 0x855   : > { %v7308_v62 = vadd.f32 %v6059_v41, %v2653_v6 }
 0x857   : > { %2724 = vadd.xlane.f32.xlu1 %v7308_v62  ;;  %2726 = vadd.xlane.f32.xlu0 %v7304_v4 }
 0x85b   : > { %2728 = vadd.xlane.f32.xlu1 %v7313_v21 }
 0x888   : > { %v5459_v32 = vpop.f32.mrf.mxu0 }
 0x889   : > { %v2674_v16 = vadd.f32 %v5459_v32, %v7274_v50 }
 0x88a   : > { %v2665_v14 = vpop.f32.mrf.mxu0 }
 0x88b   : > { %v2666_v57 = vadd.f32 %v7274_v50, %v2665_v14  ;;  %v7324_v49 = vadd.f32 %v6062_v47, %v2674_v16  ;;  %v5662_v47 = vld [vmem:[%s6284_s1 + $0xc8] ss:$16 sps:$4 sm:$0xff]  }
 0x88c   : > { %v5460_v9 = vpop.f32.mrf.mxu0 }
 0x88d   : > { %v7319_v29 = vadd.f32 %v6061_v2, %v2666_v57  ;;  %v2677_v19 = vadd.f32 %v5460_v9, %v7274_v50  ;;  %v5661_v2 = vld [vmem:[%s6284_s1 + $0xc4] ss:$16 sps:$4 sm:$0xff]  }
 0x88e   : > { %v2668_v15 = vpop.f32.mrf.mxu0  ;;  %3159 = vmatprep.subr.bf16.mxu1 %v5661_v2 }
 0x88f   : > { %v2669_v26 = vadd.f32 %v7274_v50, %v2668_v15  ;;  %2730 = vadd.xlane.f32.xlu0 %v7319_v29  ;;  %v7333_v11 = vadd.f32 %v6064_v17, %v2677_v19  ;;  %v5664_v15 = vld [vmem:[%s6284_s1 + $0xcc] ss:$16 sps:$4 sm:$0xff]  }
 0x890   : > { %3272 = vmatprep.subr.bf16.mxu0 %v5664_v15 }
 0x891   : > { %v7328_v56 = vadd.f32 %v6063_v31, %v2669_v26  ;;  %v5659_v26 = vld [vmem:[%s6284_s1 + $0xc0] ss:$16 sps:$4 sm:$0xff]   ;;  %3273 = vmatpush1.bf16.msra.mxu0 %v5662_v47 }
 0x892   : > { %v5463_v12 = vpop.f32.mrf.mxu0  ;;  %3160 = vmatpush1.bf16.msra.mxu1 %v5659_v26 }
 0x893   : > { %2732 = vadd.xlane.f32.xlu1 %v7328_v56  ;;  %2734 = vadd.xlane.f32.xlu0 %v7324_v49  ;;  %v2690_v27 = vadd.f32 %v5463_v12, %v7274_v50 }
 0x894   : > { %v2681_v60 = vpop.f32.mrf.mxu0 }
 0x895   : > { %v2682_v30 = vadd.f32 %v7274_v50, %v2681_v60  ;;  %v7344_v7 = vadd.f32 %v6066_v38, %v2690_v27  ;;  %v5671_v38 = vld [vmem:[%s6284_s1 + $0x80] ss:$16 sps:$4 sm:$0xff]  }
 0x896   : > { %v5464_v55 = vpop.f32.mrf.mxu0 }
 0x897   : > { %v7338_v51 = vadd.f32 %v6065_v63, %v2682_v30  ;;  %2736 = vadd.xlane.f32.xlu1 %v7333_v11  ;;  %v2693_v59 = vadd.f32 %v5464_v55, %v7274_v50  ;;  %v5665_v30 = vld [vmem:[%s6284_s1 + $0xa0] ss:$16 sps:$4 sm:$0xff]   ;;  %v5668_v55 = vld [vmem:[%s6284_s1 + $0xa8] ss:$16 sps:$4 sm:$0xff]  }
 0x898   : > { %v2684_v28 = vpop.f32.mrf.mxu0 }
 0x899   : > { %v2685_v1 = vadd.f32 %v7274_v50, %v2684_v28  ;;  %2738 = vadd.xlane.f32.xlu0 %v7338_v51  ;;  %v7353_v40 = vadd.f32 %v6068_v5, %v2693_v59  ;;  %v5673_v28 = vld [vmem:[%s6284_s1 + $0x84] ss:$16 sps:$4 sm:$0xff]   ;;  %v5677_v5 = vld [vmem:[%s6284_s1 + $0x60] ss:$16 sps:$4 sm:$0xff]  }
 0x89a   : > { %v5679_v59 = vld [vmem:[%s6284_s1 + $0x64] ss:$16 sps:$4 sm:$0xff]  }
 0x89b   : > { %v7348_v45 = vadd.f32 %v6067_v39, %v2685_v1  ;;  %v5676_v1 = vld [vmem:[%s6284_s1 + $0x8c] ss:$16 sps:$4 sm:$0xff]  }
 0x89c   : > { %v5682_v39 = vld [vmem:[%s6284_s1 + $0x6c] ss:$16 sps:$4 sm:$0xff]  }
 0x89d   : > { %2740 = vadd.xlane.f32.xlu1 %v7348_v45  ;;  %2742 = vadd.xlane.f32.xlu0 %v7344_v7 }
 0x8a1   : > { %2744 = vadd.xlane.f32.xlu1 %v7353_v40 }
 0x8cf   : > { %v2715_v50 = vpop.xlane.xlu0 %2714 }
 0x8d0   : > { %v2747_v33 = vmul.f32 0.0078125, %v2715_v50  ;;  %v5686_v50 = vld [vmem:[%s6284_s1 + $0x48] ss:$16 sps:$4 sm:$0xff]  }
 0x8d2   : > { %v7361_v36 = vsub.f32 %v7279_v18, %v2747_v33  ;;  %v5691_v33 = vld [vmem:[%s6284_s1 + $0x24] ss:$16 sps:$4 sm:$0xff]  }
 0x8d3   : > { %v2717_v52 = vpop.xlane.xlu1 %2716  ;;  %v2719_v23 = vpop.xlane.xlu0 %2718 }
 0x8d4   : > { %v2748_v35 = vmul.f32 0.0078125, %v2717_v52  ;;  %v2749_v25 = vmul.f32 0.0078125, %v2719_v23  ;;  %v2779_v0 = vmul.f32 %v7361_v36, %v7361_v36  ;;  %v5694_v52 = vld [vmem:[%s6284_s1 + $0x2c] ss:$16 sps:$4 sm:$0xff]   ;;  %v5689_v23 = vld [vmem:[%s6284_s1 + $0x20] ss:$16 sps:$4 sm:$0xff]  }
 0x8d6   : > { %v7366_v24 = vsub.f32 %v7285_v53, %v2748_v35  ;;  %v7369_v58 = vsub.f32 %v7288_v3, %v2749_v25  ;;  %2795 = vadd.xlane.f32.xlu0 %v2779_v0  ;;  %v5692_v35 = vld [vmem:[%s6284_s1 + $0x28] ss:$16 sps:$4 sm:$0xff]   ;;  %v5695_v25 = vld [vmem:[%s6284_s1] ss:$16 sps:$4 sm:$0xff]   ;;  %v5697_v0 = vld [vmem:[%s6284_s1 + $0x4] ss:$16 sps:$4 sm:$0xff]  }
 0x8d7   : > { %v2721_v6 = vpop.xlane.xlu0 %2720 }
 0x8d8   : > { %v2750_v46 = vmul.f32 0.0078125, %v2721_v6  ;;  %v2780_v18 = vmul.f32 %v7366_v24, %v7366_v24  ;;  %v2781_v48 = vmul.f32 %v7369_v58, %v7369_v58  ;;  %v5698_v6 = vld [vmem:[%s6284_s1 + $0x8] ss:$16 sps:$4 sm:$0xff]  }
 0x8da   : > { %v7376_v41 = vsub.f32 %v7293_v37, %v2750_v46  ;;  %2797 = vadd.xlane.f32.xlu1 %v2780_v18  ;;  %2799 = vadd.xlane.f32.xlu0 %v2781_v48  ;;  %v5700_v46 = vld [vmem:[%s6284_s1 + $0xc] ss:$16 sps:$4 sm:$0xff]  }
 0x8dc   : > { %v2723_v53 = vpop.xlane.xlu0 %2722  ;;  %v2782_v3 = vmul.f32 %v7376_v41, %v7376_v41 }
 0x8dd   : > { %v2751_v8 = vmul.f32 0.0078125, %v2723_v53 }
 0x8de   : > { %2801 = vadd.xlane.f32.xlu1 %v2782_v3 }
 0x8df   : > { %v7381_v32 = vsub.f32 %v7299_v34, %v2751_v8 }
 0x8e0   : > { %v2725_v14 = vpop.xlane.xlu1 %2724  ;;  %v2727_v57 = vpop.xlane.xlu0 %2726 }
 0x8e1   : > { %v2752_v9 = vmul.f32 0.0078125, %v2725_v14  ;;  %v2753_v16 = vmul.f32 0.0078125, %v2727_v57  ;;  %v2783_v37 = vmul.f32 %v7381_v32, %v7381_v32 }
 0x8e3   : > { %v7390_v19 = vsub.f32 %v7308_v62, %v2752_v9  ;;  %v7393_v34 = vsub.f32 %v7304_v4, %v2753_v16  ;;  %2803 = vadd.xlane.f32.xlu0 %v2783_v37  ;;  %v5667_v62 = vld [vmem:[%s6284_s1 + $0xa4] ss:$16 sps:$4 sm:$0xff]   ;;  %v5670_v4 = vld [vmem:[%s6284_s1 + $0xac] ss:$16 sps:$4 sm:$0xff]  }
 0x8e4   : > { %v2729_v31 = vpop.xlane.xlu1 %2728  ;;  %3161 = vmatprep.subr.bf16.mxu1 %v5667_v62  ;;  %3274 = vmatprep.subr.bf16.mxu0 %v5670_v4 }
 0x8e5   : > { %v2754_v12 = vmul.f32 0.0078125, %v2729_v31  ;;  %v2784_v60 = vmul.f32 %v7390_v19, %v7390_v19  ;;  %v2785_v17 = vmul.f32 %v7393_v34, %v7393_v34  ;;  %3162 = vmatpush1.bf16.msra.mxu1 %v5665_v30  ;;  %3275 = vmatpush1.bf16.msra.mxu0 %v5668_v55 }
 0x8e6   : > { %3163 = vmatprep.subr.bf16.mxu1 %v5673_v28  ;;  %3276 = vmatprep.subr.bf16.mxu0 %v5676_v1 }
 0x8e7   : > { %v7404_v27 = vsub.f32 %v7313_v21, %v2754_v12  ;;  %2805 = vadd.xlane.f32.xlu1 %v2784_v60  ;;  %2807 = vadd.xlane.f32.xlu0 %v2785_v17  ;;  %v5674_v21 = vld [vmem:[%s6284_s1 + $0x88] ss:$16 sps:$4 sm:$0xff]  }
 0x8e9   : > { %v2786_v63 = vmul.f32 %v7404_v27, %v7404_v27  ;;  %3164 = vmatpush1.bf16.msra.mxu1 %v5671_v38  ;;  %3277 = vmatpush1.bf16.msra.mxu0 %v5674_v21 }
 0x8ea   : > { %3165 = vmatprep.subr.bf16.mxu1 %v5679_v59  ;;  %3278 = vmatprep.subr.bf16.mxu0 %v5682_v39 }
 0x8eb   : > { %2809 = vadd.xlane.f32.xlu1 %v2786_v63 }
 0x8ed   : > { %3166 = vmatpush1.bf16.msra.mxu1 %v5677_v5  ;;  %3279 = vmatpush1.bf16.msra.mxu0 %v5680_v20 }
 0x8ee   : > { %3167 = vmatprep.subr.bf16.mxu1 %v5685_v22  ;;  %3280 = vmatprep.subr.bf16.mxu0 %v5688_v61 }
 0x8f1   : > { %3168 = vmatpush1.bf16.msra.mxu1 %v5683_v10  ;;  %3281 = vmatpush1.bf16.msra.mxu0 %v5686_v50 }
 0x8f2   : > { %3169 = vmatprep.subr.bf16.mxu1 %v5691_v33  ;;  %3282 = vmatprep.subr.bf16.mxu0 %v5694_v52 }
 0x8f5   : > { %3170 = vmatpush1.bf16.msra.mxu1 %v5689_v23  ;;  %3283 = vmatpush1.bf16.msra.mxu0 %v5692_v35 }
 0x8f6   : > { %3171 = vmatprep.subr.bf16.mxu1 %v5697_v0  ;;  %3284 = vmatprep.subr.bf16.mxu0 %v5700_v46 }
 0x8f9   : > { %3172 = vmatpush1.bf16.msra.mxu1 %v5695_v25  ;;  %3285 = vmatpush1.bf16.msra.mxu0 %v5698_v6 }
 0x918   : > { %v2731_v18 = vpop.xlane.xlu0 %2730 }
 0x919   : > { %v2755_v48 = vmul.f32 0.0078125, %v2731_v18 }
 0x91b   : > { %v7429_v53 = vsub.f32 %v7319_v29, %v2755_v48 }
 0x91c   : > { %v2733_v3 = vpop.xlane.xlu1 %2732  ;;  %v2735_v8 = vpop.xlane.xlu0 %2734 }
 0x91d   : > { %v2756_v14 = vmul.f32 0.0078125, %v2733_v3  ;;  %v2757_v57 = vmul.f32 0.0078125, %v2735_v8  ;;  %v2787_v9 = vmul.f32 %v7429_v53, %v7429_v53  ;;  %v7474_v8 = vld [vmem:[%s8871_s2] ss:$0 sm:$0xff] }
 0x91f   : > { %v7434_v16 = vsub.f32 %v7328_v56, %v2756_v14  ;;  %v7437_v37 = vsub.f32 %v7324_v49, %v2757_v57  ;;  %2811 = vadd.xlane.f32.xlu0 %v2787_v9 }
 0x920   : > { %v2737_v2 = vpop.xlane.xlu1 %2736 }
 0x921   : > { %v2758_v15 = vmul.f32 0.0078125, %v2737_v2  ;;  %v2788_v29 = vmul.f32 %v7434_v16, %v7434_v16  ;;  %v2789_v26 = vmul.f32 %v7437_v37, %v7437_v37 }
 0x922   : > { %v2739_v47 = vpop.xlane.xlu0 %2738 }
 0x923   : > { %v7444_v31 = vsub.f32 %v7333_v11, %v2758_v15  ;;  %v2759_v12 = vmul.f32 0.0078125, %v2739_v47  ;;  %2813 = vadd.xlane.f32.xlu1 %v2788_v29  ;;  %2815 = vadd.xlane.f32.xlu0 %v2789_v26 }
 0x925   : > { %v7447_v56 = vsub.f32 %v7338_v51, %v2759_v12  ;;  %v2790_v49 = vmul.f32 %v7444_v31, %v7444_v31 }
 0x926   : > { %v2741_v60 = vpop.xlane.xlu1 %2740  ;;  %v2743_v17 = vpop.xlane.xlu0 %2742 }
 0x927   : > { %v2760_v62 = vmul.f32 0.0078125, %v2741_v60  ;;  %v2761_v4 = vmul.f32 0.0078125, %v2743_v17  ;;  %2817 = vadd.xlane.f32.xlu1 %v2790_v49  ;;  %v2791_v30 = vmul.f32 %v7447_v56, %v7447_v56 }
 0x929   : > { %v7454_v11 = vsub.f32 %v7348_v45, %v2760_v62  ;;  %v7457_v55 = vsub.f32 %v7344_v7, %v2761_v4  ;;  %2819 = vadd.xlane.f32.xlu0 %v2791_v30 }
 0x92a   : > { %v2745_v51 = vpop.xlane.xlu1 %2744 }
 0x92b   : > { %v2762_v63 = vmul.f32 0.0078125, %v2745_v51  ;;  %v2792_v28 = vmul.f32 %v7454_v11, %v7454_v11  ;;  %v2793_v1 = vmul.f32 %v7457_v55, %v7457_v55 }
 0x92d   : > { %v7464_v38 = vsub.f32 %v7353_v40, %v2762_v63  ;;  %2821 = vadd.xlane.f32.xlu1 %v2792_v28  ;;  %2823 = vadd.xlane.f32.xlu0 %v2793_v1 }
 0x92f   : > { %v2794_v45 = vmul.f32 %v7464_v38, %v7464_v38 }
 0x931   : > { %2825 = vadd.xlane.f32.xlu1 %v2794_v45 }
 0x95f   : > { %v2796_v7 = vpop.xlane.xlu0 %2795 }
 0x960   : > { %v2827_v21 = vmul.f32 0.0078125, %v2796_v7 }
 0x962   : > { %v2843_v59 = vadd.f32 1e-12, %v2827_v21 }
 0x963   : > { %v2798_v39 = vpop.xlane.xlu1 %2797  ;;  %v2800_v5 = vpop.xlane.xlu0 %2799 }
 0x964   : > { %5861 = vrsqrt.f32 %v2843_v59  ;;  %v2828_v20 = vmul.f32 0.0078125, %v2798_v39  ;;  %v2829_v22 = vmul.f32 0.0078125, %v2800_v5 }
 0x966   : > { %v2844_v61 = vadd.f32 1e-12, %v2828_v20  ;;  %v2845_v10 = vadd.f32 1e-12, %v2829_v22 }
 0x967   : > { %v2802_v50 = vpop.xlane.xlu1 %2801 }
 0x968   : > { %5863 = vrsqrt.f32 %v2844_v61  ;;  %v2830_v40 = vmul.f32 0.0078125, %v2802_v50 }
 0x969   : > { %5865 = vrsqrt.f32 %v2845_v10 }
 0x96a   : > { %v2846_v33 = vadd.f32 1e-12, %v2830_v40 }
 0x96c   : > { %5867 = vrsqrt.f32 %v2846_v33  ;;  %v2804_v52 = vpop.xlane.xlu0 %2803 }
 0x96d   : > { %v2831_v23 = vmul.f32 0.0078125, %v2804_v52 }
 0x96f   : > { %v2847_v35 = vadd.f32 1e-12, %v2831_v23 }
 0x970   : > { %v2806_v25 = vpop.xlane.xlu1 %2805  ;;  %v2808_v0 = vpop.xlane.xlu0 %2807 }
 0x971   : > { %v5862_v6 = vpop.eup %5861  ;;  %v2832_v46 = vmul.f32 0.0078125, %v2806_v25  ;;  %v2833_v18 = vmul.f32 0.0078125, %v2808_v0  ;;  %5869 = vrsqrt.f32 %v2847_v35 }
 0x972   : > { %v2875_v48 = vmul.f32 %v5862_v6, %v7361_v36  ;;  %v7483_v36 = vld [vmem:[%s8872_s6] ss:$0 sm:$0xff] }
 0x973   : > { %v2848_v3 = vadd.f32 1e-12, %v2832_v46  ;;  %v2849_v14 = vadd.f32 1e-12, %v2833_v18 }
 0x974   : > { %v2810_v57 = vpop.xlane.xlu1 %2809  ;;  %v2897_v29 = vmul.f32 %v7474_v8, %v2875_v48 }
 0x975   : > { %v5864_v9 = vpop.eup %5863  ;;  %5871 = vrsqrt.f32 %v2848_v3  ;;  %v2834_v2 = vmul.f32 0.0078125, %v2810_v57 }
 0x976   : > { %v2876_v15 = vmul.f32 %v5864_v9, %v7366_v24  ;;  %v5866_v26 = vpop.eup %5865  ;;  %5873 = vrsqrt.f32 %v2849_v14  ;;  %v7487_v60 = vadd.f32 %v7483_v36, %v2897_v29 }
 0x977   : > { %v2850_v47 = vadd.f32 1e-12, %v2834_v2  ;;  %v2877_v17 = vmul.f32 %v5866_v26, %v7369_v58 }
 0x978   : > { %v2898_v12 = vmul.f32 %v7474_v8, %v2876_v15  ;;  %8873 = vst [vmem:[#allocation10_spill] sm:$0xff] %v7487_v60 }
 0x979   : > { %v5868_v49 = vpop.eup %5867  ;;  %5875 = vrsqrt.f32 %v2850_v47  ;;  %v2899_v51 = vmul.f32 %v7474_v8, %v2877_v17 }
 0x97a   : > { %v7490_v24 = vadd.f32 %v7483_v36, %v2898_v12  ;;  %v2878_v62 = vmul.f32 %v5868_v49, %v7376_v41 }
 0x97b   : > { %v7504_v41 = vadd.f32 %v7483_v36, %v2899_v51 }
 0x97c   : > { %8874 = vst [vmem:[#allocation11_spill] sm:$0xff] %v7490_v24  ;;  %v2935_v4 = vpack.c.bf16 %v7490_v24, %v7487_v60  ;;  %v2900_v30 = vmul.f32 %v7474_v8, %v2878_v62 }
 0x97d   : > { %8876 = vst [vmem:[#allocation13_spill] sm:$0xff] %v7504_v41 }
 0x97e   : > { %3190 = vmatmul.mubr.bf16.vlgmr.msra.gmra.mxu1 %v2935_v4  ;;  %3303 = vmatmul.mubr.bf16.vlgmr.msra.gmra.mxu0 %v2935_v4  ;;  %v5870_v63 = vpop.eup %5869  ;;  %v7501_v28 = vadd.f32 %v7483_v36, %v2900_v30 }
 0x97f   : > { %3199 = vmatprep.mubr.bf16.mxu1 %v6109_v54  ;;  %3312 = vmatprep.mubr.bf16.mxu0 %v6109_v54  ;;  %v2879_v1 = vmul.f32 %v5870_v63, %v7381_v32 }
 0x980   : > { %8875 = vst [vmem:[#allocation12_spill] sm:$0xff] %v7501_v28  ;;  %v2936_v7 = vpack.c.bf16 %v7501_v28, %v7504_v41 }
 0x981   : > { %v2901_v5 = vmul.f32 %v7474_v8, %v2879_v1 }
 0x982   : > { %v5872_v58 = vpop.eup %5871 }
 0x983   : > { %v2880_v45 = vmul.f32 %v5872_v58, %v7390_v19  ;;  %v5874_v21 = vpop.eup %5873  ;;  %v7519_v19 = vadd.f32 %v7483_v36, %v2901_v5 }
 0x984   : > { %v2881_v22 = vmul.f32 %v5874_v21, %v7393_v34 }
 0x985   : > { %v2902_v59 = vmul.f32 %v7474_v8, %v2880_v45  ;;  %8878 = vst [vmem:[#allocation15_spill] sm:$0xff] %v7519_v19 }
 0x986   : > { %v5876_v39 = vpop.eup %5875  ;;  %3200 = vmatmul.mubr.bf16.gmra.mxu1 %v2936_v7  ;;  %3313 = vmatmul.mubr.bf16.gmra.mxu0 %v2936_v7  ;;  %v2903_v50 = vmul.f32 %v7474_v8, %v2881_v22 }
 0x987   : > { %3209 = vmatprep.mubr.bf16.mxu1 %v6109_v54  ;;  %3322 = vmatprep.mubr.bf16.mxu0 %v6109_v54  ;;  %v7515_v20 = vadd.f32 %v7483_v36, %v2902_v59  ;;  %v2882_v32 = vmul.f32 %v5876_v39, %v7404_v27 }
 0x988   : > { %v7532_v40 = vadd.f32 %v7483_v36, %v2903_v50  ;;  %v7558_v50 = vld [vmem:[%s6294_s25 + $0xf8] sm:$0xff]  }
 0x989   : > { %8877 = vst [vmem:[#allocation14_spill] sm:$0xff] %v7515_v20  ;;  %v2937_v61 = vpack.c.bf16 %v7515_v20, %v7519_v19  ;;  %v2904_v10 = vmul.f32 %v7474_v8, %v2882_v32  ;;  %5209 = vmatprep.subr.bf16.mxu0 %v7558_v50 }
 0x98a   : > { %8880 = vst [vmem:[#allocation17_spill] sm:$0xff] %v7532_v40 }
 0x98b   : > { %v7529_v27 = vadd.f32 %v7483_v36, %v2904_v10 }
 0x98d   : > { %8879 = vst [vmem:[#allocation16_spill] sm:$0xff] %v7529_v27  ;;  %v2938_v34 = vpack.c.bf16 %v7529_v27, %v7532_v40 }
 0x98e   : > { %3210 = vmatmul.mubr.bf16.gmra.mxu1 %v2937_v61  ;;  %3323 = vmatmul.mubr.bf16.gmra.mxu0 %v2937_v61 }
 0x98f   : > { %3219 = vmatprep.mubr.bf16.mxu1 %v6109_v54  ;;  %3332 = vmatprep.mubr.bf16.mxu0 %v6109_v54 }
 0x996   : > { %3220 = vmatmul.mubr.bf16.gmra.mxu1 %v2938_v34  ;;  %3333 = vmatmul.mubr.bf16.gmra.mxu0 %v2938_v34 }
 0x997   : > { %3229 = vmatprep.mubr.bf16.mxu1 %v6109_v54  ;;  %3342 = vmatprep.mubr.bf16.mxu0 %v6109_v54 }
 0x9a8   : > { %v2812_v33 = vpop.xlane.xlu0 %2811 }
 0x9a9   : > { %v2835_v52 = vmul.f32 0.0078125, %v2812_v33  ;;  %v5703_v33 = vld [vmem:[%s6294_s25 + $0x38] sm:$0xff]  }
 0x9ab   : > { %v2851_v23 = vadd.f32 1e-12, %v2835_v52  ;;  %v7566_v52 = vld [vmem:[%s6294_s25 + $0xb8] sm:$0xff]  }
 0x9ac   : > { %v2814_v35 = vpop.xlane.xlu1 %2813  ;;  %v2816_v25 = vpop.xlane.xlu0 %2815  ;;  %8884 = vst [vmem:[#allocation21_spill] sm:$0xff] %v7566_v52  ;;  %5210 = vmatpush3.bf16.msra.mxu0 %v7566_v52 }
 0x9ad   : > { %5877 = vrsqrt.f32 %v2851_v23  ;;  %v2836_v0 = vmul.f32 0.0078125, %v2814_v35  ;;  %v2837_v6 = vmul.f32 0.0078125, %v2816_v25 }
 0x9af   : > { %v2852_v46 = vadd.f32 1e-12, %v2836_v0  ;;  %v2853_v18 = vadd.f32 1e-12, %v2837_v6  ;;  %v7579_v6 = vld [vmem:[%s6294_s25 + $0xf0] sm:$0xff]  }
 0x9b0   : > { %v2818_v48 = vpop.xlane.xlu1 %2817  ;;  %8886 = vst [vmem:[#allocation23_spill] sm:$0xff] %v7579_v6  ;;  %5211 = vmatprep.subr.bf16.mxu0 %v7579_v6 }
 0x9b1   : > { %5879 = vrsqrt.f32 %v2852_v46  ;;  %v2838_v3 = vmul.f32 0.0078125, %v2818_v48  ;;  %v7583_v48 = vld [vmem:[%s6294_s25 + $0xb0] sm:$0xff]  }
 0x9b2   : > { %v2820_v14 = vpop.xlane.xlu0 %2819  ;;  %5881 = vrsqrt.f32 %v2853_v18  ;;  %v5707_v18 = vld [vmem:[%s6294_s25 + $0x30] sm:$0xff]   ;;  %8887 = vst [vmem:[#allocation24_spill] sm:$0xff] %v7583_v48  ;;  %5212 = vmatpush3.bf16.msra.mxu0 %v7583_v48 }
 0x9b3   : > { %v2854_v57 = vadd.f32 1e-12, %v2838_v3  ;;  %v2839_v9 = vmul.f32 0.0078125, %v2820_v14 }
 0x9b5   : > { %5883 = vrsqrt.f32 %v2854_v57  ;;  %v2855_v2 = vadd.f32 1e-12, %v2839_v9  ;;  %v5709_v9 = vld [vmem:[%s6294_s25 + $0x68] sm:$0xff]  }
 0x9b6   : > { %v2822_v15 = vpop.xlane.xlu1 %2821  ;;  %v2824_v26 = vpop.xlane.xlu0 %2823 }
 0x9b7   : > { %v2840_v29 = vmul.f32 0.0078125, %v2822_v15  ;;  %5885 = vrsqrt.f32 %v2855_v2  ;;  %v2841_v49 = vmul.f32 0.0078125, %v2824_v26  ;;  %v7595_v2 = vld [vmem:[%s6294_s25 + $0xe8] sm:$0xff]  }
 0x9b8   : > { %8889 = vst [vmem:[#allocation26_spill] sm:$0xff] %v7595_v2  ;;  %v5711_v15 = vld [vmem:[%s6294_s25 + $0x28] sm:$0xff]   ;;  %5213 = vmatprep.subr.bf16.mxu0 %v7595_v2 }
 0x9b9   : > { %v2856_v47 = vadd.f32 1e-12, %v2840_v29  ;;  %v2857_v63 = vadd.f32 1e-12, %v2841_v49  ;;  %v7600_v29 = vld [vmem:[%s6294_s25 + $0xa8] sm:$0xff]   ;;  %v5713_v49 = vld [vmem:[%s6294_s25 + $0x60] sm:$0xff]  }
 0x9ba   : > { %v5878_v12 = vpop.eup %5877  ;;  %v2826_v17 = vpop.xlane.xlu1 %2825  ;;  %8890 = vst [vmem:[#allocation27_spill] sm:$0xff] %v7600_v29  ;;  %5214 = vmatpush3.bf16.msra.mxu0 %v7600_v29 }
 0x9bb   : > { %5887 = vrsqrt.f32 %v2856_v47  ;;  %v2842_v62 = vmul.f32 0.0078125, %v2826_v17  ;;  %v2883_v4 = vmul.f32 %v5878_v12, %v7429_v53  ;;  %v7613_v17 = vld [vmem:[%s6294_s25 + $0xe0] sm:$0xff]  }
 0x9bc   : > { %8892 = vst [vmem:[#allocation29_spill] sm:$0xff] %v7613_v17  ;;  %5215 = vmatprep.subr.bf16.mxu0 %v7613_v17 }
 0x9bd   : > { %v2858_v30 = vadd.f32 1e-12, %v2842_v62  ;;  %v2905_v1 = vmul.f32 %v7474_v8, %v2883_v4  ;;  %v5715_v62 = vld [vmem:[%s6294_s25 + $0x20] sm:$0xff]  }
 0x9be   : > { %v5880_v51 = vpop.eup %5879  ;;  %v7618_v4 = vld [vmem:[%s6294_s25 + $0xa0] sm:$0xff]  }
 0x9bf   : > { %v2884_v58 = vmul.f32 %v5880_v51, %v7434_v16  ;;  %v5882_v45 = vpop.eup %5881  ;;  %5889 = vrsqrt.f32 %v2858_v30  ;;  %v7543_v59 = vadd.f32 %v7483_v36, %v2905_v1  ;;  %8893 = vst [vmem:[#allocation30_spill] sm:$0xff] %v7618_v4  ;;  %5216 = vmatpush3.bf16.msra.mxu0 %v7618_v4  ;;  %v7638_v1 = vld [vmem:[%s6294_s25 + $0x98] sm:$0xff]  }
 0x9c0   : > { %5891 = vrsqrt.f32 %v2857_v63  ;;  %v2885_v39 = vmul.f32 %v5882_v45, %v7437_v37  ;;  %v5701_v37 = vld [vmem:[%s6294_s25 + $0x78] sm:$0xff]   ;;  %8897 = vst [vmem:[#allocation34_spill] sm:$0xff] %v7638_v1  ;;  %v7644_v45 = vld [vmem:[%s6294_s25 + $0xd0] sm:$0xff]  }
 0x9c1   : > { %v2906_v7 = vmul.f32 %v7474_v8, %v2884_v58  ;;  %8881 = vst [vmem:[#allocation18_spill] sm:$0xff] %v7543_v59  ;;  %5145 = vmatprep.subr.bf16.mxu1 %v5701_v37  ;;  %v7634_v63 = vld [vmem:[%s6294_s25 + $0xd8] sm:$0xff]   ;;  %8898 = vst [vmem:[#allocation35_spill] sm:$0xff] %v7644_v45  ;;  %v7668_v37 = vld [vmem:[%s6294_s25 + $0x80] sm:$0xff]  }
 0x9c2   : > { %v5884_v21 = vpop.eup %5883  ;;  %v2907_v61 = vmul.f32 %v7474_v8, %v2885_v39  ;;  %5146 = vmatpush3.bf16.msra.mxu1 %v5703_v33  ;;  %8896 = vst [vmem:[#allocation33_spill] sm:$0xff] %v7634_v63  ;;  %v5719_v58 = vld [vmem:[%s6294_s25 + $0x18] sm:$0xff]   ;;  %5217 = vmatprep.subr.bf16.mxu0 %v7634_v63  ;;  %v5725_v39 = vld [vmem:[%s6294_s25 + $0x48] sm:$0xff]   ;;  %8903 = vst [vmem:[#allocation40_spill] sm:$0xff] %v7668_v37 }
 0x9c3   : > { %v7546_v53 = vadd.f32 %v7483_v36, %v2906_v7  ;;  %v2886_v16 = vmul.f32 %v5884_v21, %v7444_v31  ;;  %5218 = vmatpush3.bf16.msra.mxu0 %v7638_v1  ;;  %v5723_v7 = vld [vmem:[%s6294_s25 + $0x10] sm:$0xff]  }
 0x9c4   : > { %v5886_v22 = vpop.eup %5885  ;;  %v7570_v23 = vadd.f32 %v7483_v36, %v2907_v61  ;;  %v7648_v21 = vld [vmem:[%s6294_s25 + $0x90] sm:$0xff]   ;;  %5219 = vmatprep.subr.bf16.mxu0 %v7644_v45  ;;  %v7664_v61 = vld [vmem:[%s6294_s25 + $0xc0] sm:$0xff]  }
 0x9c5   : > { %8882 = vst [vmem:[#allocation19_spill] sm:$0xff] %v7546_v53  ;;  %v2939_v5 = vpack.c.bf16 %v7546_v53, %v7543_v59  ;;  %v2908_v32 = vmul.f32 %v7474_v8, %v2886_v16  ;;  %v2887_v35 = vmul.f32 %v5886_v22, %v7447_v56  ;;  %8899 = vst [vmem:[#allocation36_spill] sm:$0xff] %v7648_v21  ;;  %v7654_v16 = vld [vmem:[%s6294_s25 + $0xc8] sm:$0xff]   ;;  %v5729_v22 = vld [vmem:[%s6294_s25 + $0x40] sm:$0xff]  }
 0x9c6   : > { %8885 = vst [vmem:[#allocation22_spill] sm:$0xff] %v7570_v23  ;;  %8900 = vst [vmem:[#allocation37_spill] sm:$0xff] %v7654_v16 }
 0x9c7   : > { %3230 = vmatmul.mubr.bf16.gmra.mxu1 %v2939_v5  ;;  %3343 = vmatmul.mubr.bf16.gmra.mxu0 %v2939_v5  ;;  %v7561_v31 = vadd.f32 %v7483_v36, %v2908_v32  ;;  %v2909_v3 = vmul.f32 %v7474_v8, %v2887_v35  ;;  %v5727_v5 = vld [vmem:[%s6294_s25 + $0x8] sm:$0xff]   ;;  %8902 = vst [vmem:[#allocation39_spill] sm:$0xff] %v7664_v61 }
 0x9c8   : > { %v5888_v10 = vpop.eup %5887  ;;  %3239 = vmatprep.mubr.bf16.mxu1 %v6109_v54  ;;  %3352 = vmatprep.mubr.bf16.mxu0 %v6109_v54  ;;  %v7658_v32 = vld [vmem:[%s6294_s25 + $0x88] sm:$0xff]  }
 0x9c9   : > { %8883 = vst [vmem:[#allocation20_spill] sm:$0xff] %v7561_v31  ;;  %v2888_v34 = vmul.f32 %v5888_v10, %v7454_v11  ;;  %v2940_v25 = vpack.c.bf16 %v7561_v31, %v7570_v23  ;;  %v5705_v11 = vld [vmem:[%s6294_s25 + $0x70] sm:$0xff]   ;;  %v7603_v26 = vadd.f32 %v7483_v36, %v2909_v3  ;;  %5220 = vmatpush3.bf16.msra.mxu0 %v7648_v21  ;;  %8901 = vst [vmem:[#allocation38_spill] sm:$0xff] %v7658_v32  ;;  %v5731_v10 = vld [vmem:[%s6294_s25] sm:$0xff]  }
 0x9ca   : > { %5147 = vmatprep.subr.bf16.mxu1 %v5705_v11  ;;  %5221 = vmatprep.subr.bf16.mxu0 %v7654_v16 }
 0x9cb   : > { %v2910_v0 = vmul.f32 %v7474_v8, %v2888_v34  ;;  %5148 = vmatpush3.bf16.msra.mxu1 %v5707_v18  ;;  %8891 = vst [vmem:[#allocation28_spill] sm:$0xff] %v7603_v26  ;;  %v2975_v34 = vld [vmem:[%s6289_s20] sm:$0xf] }
 0x9cc   : > { %v5890_v46 = vpop.eup %5889  ;;  %5149 = vmatprep.subr.bf16.mxu1 %v5709_v9  ;;  %v7676_v33 = vrot.slane %v2975_v34, %v1125_v44  ;;  %v7680_v35 = vrot.slane %v2975_v34, %v1133_v13 }
 0x9cd   : > { %v5892_v56 = vpop.eup %5891  ;;  %v7589_v14 = vadd.f32 %v7483_v36, %v2910_v0  ;;  %v2890_v57 = vmul.f32 %v5890_v46, %v7464_v38  ;;  %5222 = vmatpush3.bf16.msra.mxu0 %v7658_v32  ;;  %v7685_v46 = vrot.slane %v2975_v34, %v1129_v43 }
 0x9ce   : > { %v2889_v38 = vmul.f32 %v5892_v56, %v7457_v55  ;;  %5223 = vmatprep.subr.bf16.mxu0 %v7664_v61  ;;  %8904 = vst [vmem:[#allocation41_spill] sm:$0xff] %v7676_v33  ;;  %8905 = vst [vmem:[#allocation42_spill] sm:$0xff] %v7680_v35 }
 0x9cf   : > { %3240 = vmatmul.mubr.bf16.gmra.mxu1 %v2940_v25  ;;  %3353 = vmatmul.mubr.bf16.gmra.mxu0 %v2940_v25  ;;  %8888 = vst [vmem:[#allocation25_spill] sm:$0xff] %v7589_v14  ;;  %v2941_v47 = vpack.c.bf16 %v7589_v14, %v7603_v26  ;;  %v2912_v12 = vmul.f32 %v7474_v8, %v2890_v57  ;;  %v2991_v25 = vsub.s32 3, %v6624_v42 }
 0x9d0   : > { %3249 = vmatprep.mubr.bf16.mxu1 %v6109_v54  ;;  %3362 = vmatprep.mubr.bf16.mxu0 %v6109_v54  ;;  %v2911_v55 = vmul.f32 %v7474_v8, %v2889_v38 }
 0x9d1   : > { %5150 = vmatpush3.bf16.msra.mxu1 %v5711_v15  ;;  %v7623_v30 = vadd.f32 %v7483_v36, %v2912_v12  ;;  %5224 = vmatpush3.bf16.msra.mxu0 %v7668_v37  ;;  %v7689_v3 = vrot.slane %v2975_v34, %v2991_v25 }
 0x9d2   : > { %5151 = vmatprep.subr.bf16.mxu1 %v5713_v49  ;;  %v7628_v8 = vadd.f32 %v7483_v36, %v2911_v55  ;;  %v5721_v36 = vld [vmem:[%s6294_s25 + $0x50] sm:$0xff]  }
 0x9d3   : > { %8894 = vst [vmem:[#allocation31_spill] sm:$0xff] %v7623_v30  ;;  %8906 = vst [vmem:[#allocation43_spill] sm:$0xff] %v7689_v3 }
 0x9d4   : > { %8895 = vst [vmem:[#allocation32_spill] sm:$0xff] %v7628_v8  ;;  %v2942_v51 = vpack.c.bf16 %v7623_v30, %v7628_v8 }
 0x9d5   : > { %5152 = vmatpush3.bf16.msra.mxu1 %v5715_v62 }
 0x9d7   : > { %3250 = vmatmul.mubr.bf16.gmra.mxu1 %v2941_v47  ;;  %3363 = vmatmul.mubr.bf16.gmra.mxu0 %v2941_v47 }
 0x9d8   : > { %3259 = vmatprep.mubr.bf16.mxu1 %v6109_v54  ;;  %3372 = vmatprep.mubr.bf16.mxu0 %v6109_v54  ;;  %v5717_v54 = vld [vmem:[%s6294_s25 + $0x58] sm:$0xff]  }
 0x9d9   : > { %5153 = vmatprep.subr.bf16.mxu1 %v5717_v54 }
 0x9da   : > { %5154 = vmatpush3.bf16.msra.mxu1 %v5719_v58 }
 0x9db   : > { %5155 = vmatprep.subr.bf16.mxu1 %v5721_v36 }
 0x9de   : > { %5156 = vmatpush3.bf16.msra.mxu1 %v5723_v7 }
 0x9df   : > { %3260 = vmatmul.mubr.bf16.gmra.mxu1 %v2942_v51  ;;  %3373 = vmatmul.mubr.bf16.gmra.mxu0 %v2942_v51 }
 0x9e0   : > { %5157 = vmatprep.subr.bf16.mxu1 %v5725_v39 }
 0x9e2   : > { %5158 = vmatpush3.bf16.msra.mxu1 %v5727_v5 }
 0x9e3   : > { %5159 = vmatprep.subr.bf16.mxu1 %v5729_v22 }
 0x9e6   : > { %5160 = vmatpush3.bf16.msra.mxu1 %v5731_v10 }
 0x9e7   : > { %5465 = vmatprep.subr.bf16.mxu1 %v7558_v50 }
 0xa3e   : > { %v3191_v0 = vpop.f32.mrf.mxu1  ;;  %v3304_v11 = vpop.f32.mrf.mxu0 }
 0xa3f   : > { %v3192_v18 = vadd.f32 %v3191_v0, %v7676_v33  ;;  %v3305_v50 = vadd.f32 %v3304_v11, %v7680_v35 }
 0xa40   : > { %v3193_v56 = vpop.f32.mrf.mxu1  ;;  %v3306_v44 = vpop.f32.mrf.mxu0 }
 0xa41   : > { %v3447_v57 = vmul.f32 0.044715, %v3192_v18  ;;  %v3449_v9 = vmul.f32 0.044715, %v3305_v50  ;;  %v7692_v13 = vadd.f32 %v3193_v56, %v7685_v46  ;;  %v7697_v49 = vadd.f32 %v3306_v44, %v7689_v3 }
 0xa42   : > { %v3195_v15 = vpop.f32.mrf.mxu1  ;;  %v3308_v38 = vpop.f32.mrf.mxu0 }
 0xa43   : > { %v3511_v47 = vmul.f32 %v3447_v57, %v3192_v18  ;;  %v3513_v12 = vmul.f32 %v3449_v9, %v3305_v50  ;;  %v3196_v42 = vadd.f32 %v3195_v15, %v7676_v33  ;;  %v3309_v43 = vadd.f32 %v3308_v38, %v7680_v35 }
 0xa44   : > { %v3197_v55 = vpop.f32.mrf.mxu1  ;;  %v3310_v62 = vpop.f32.mrf.mxu0  ;;  %v3448_v58 = vmul.f32 0.044715, %v7692_v13  ;;  %v3450_v34 = vmul.f32 0.044715, %v7697_v49  ;;  %v7707_v57 = vmul.f32 0.5, %v3192_v18  ;;  %v7709_v38 = vmul.f32 0.5, %v3305_v50 }
 0xa45   : > { %v3577_v51 = vmul.f32 %v3513_v12, %v3305_v50  ;;  %v3451_v54 = vmul.f32 0.044715, %v3196_v42  ;;  %v3453_v36 = vmul.f32 0.044715, %v3309_v43  ;;  %v3575_v5 = vmul.f32 %v3511_v47, %v3192_v18 }
 0xa46   : > { %v3201_v7 = vpop.f32.mrf.mxu1  ;;  %v3314_v39 = vpop.f32.mrf.mxu0  ;;  %v7702_v0 = vadd.f32 %v3197_v55, %v7685_v46  ;;  %v7705_v11 = vadd.f32 %v3310_v62, %v7689_v3  ;;  %v3512_v47 = vmul.f32 %v3448_v58, %v7692_v13  ;;  %v7715_v30 = vmul.f32 0.5, %v3196_v42 }
 0xa47   : > { %v3641_v22 = vadd.f32 %v3577_v51, %v3305_v50  ;;  %v3515_v10 = vmul.f32 %v3451_v54, %v3196_v42  ;;  %v3517_v25 = vmul.f32 %v3453_v36, %v3309_v43  ;;  %v7713_v51 = vadd.f32 %v3314_v39, %v7680_v35 }
 0xa48   : > { %v3203_v56 = vpop.f32.mrf.mxu1  ;;  %v3316_v44 = vpop.f32.mrf.mxu0  ;;  %v3639_v36 = vadd.f32 %v3575_v5, %v3192_v18  ;;  %v7718_v62 = vmul.f32 0.5, %v7692_v13  ;;  %v7721_v8 = vmul.f32 0.5, %v7697_v49  ;;  %v3514_v50 = vmul.f32 %v3450_v34, %v7697_v49 }
 0xa49   : > { %v3705_v9 = vmul.f32 0.7978846, %v3641_v22  ;;  %v3579_v15 = vmul.f32 %v3515_v10, %v3196_v42  ;;  %v3581_v12 = vmul.f32 %v3517_v25, %v3309_v43  ;;  %8907 = vst [vmem:[#allocation44_spill] sm:$0xff] %v7713_v51  ;;  %v3452_v58 = vmul.f32 0.044715, %v7702_v0 }
 0xa4a   : > { %v3205_v54 = vpop.f32.mrf.mxu1  ;;  %v3318_v55 = vpop.f32.mrf.mxu0  ;;  %8908 = vst [vmem:[#allocation45_spill] sm:$0xff] %v7718_v62  ;;  %8909 = vst [vmem:[#allocation46_spill] sm:$0xff] %v7721_v8  ;;  %v3454_v10 = vmul.f32 0.044715, %v7705_v11  ;;  %v7727_v18 = vadd.f32 %v3201_v7, %v7676_v33  ;;  %v3457_v5 = vmul.f32 0.044715, %v7713_v51  ;;  %v7731_v26 = vmul.f32 %v3512_v47, %v7692_v13 }
 0xa4b   : > { %v3645_v22 = vadd.f32 %v3581_v12, %v3309_v43  ;;  %5893 = vtanh.f32 %v3705_v9  ;;  %v3643_v14 = vadd.f32 %v3579_v15, %v3196_v42  ;;  %v7733_v31 = vmul.f32 0.5, %v3309_v43 }
 0xa4c   : > { %v3207_v39 = vpop.f32.mrf.mxu1  ;;  %v3320_v25 = vpop.f32.mrf.mxu0  ;;  %v7736_v12 = vadd.f32 %v3203_v56, %v7685_v46  ;;  %v3703_v59 = vmul.f32 0.7978846, %v3639_v36  ;;  %v3521_v9 = vmul.f32 %v3457_v5, %v7713_v51  ;;  %v7740_v42 = vadd.f32 %v3316_v44, %v7689_v3 }
 0xa4d   : > { %v3709_v34 = vmul.f32 0.7978846, %v3645_v22  ;;  %v7743_v7 = vadd.f32 %v3205_v54, %v7676_v33  ;;  %v3516_v15 = vmul.f32 %v3452_v58, %v7702_v0  ;;  %v3518_v43 = vmul.f32 %v3454_v10, %v7705_v11 }
 0xa4e   : > { %v3211_v23 = vpop.f32.mrf.mxu1  ;;  %v3324_v53 = vpop.f32.mrf.mxu0  ;;  %v7748_v47 = vadd.f32 %v3318_v55, %v7680_v35  ;;  %v3707_v27 = vmul.f32 0.7978846, %v3643_v14  ;;  %v3455_v36 = vmul.f32 0.044715, %v7727_v18  ;;  %v3585_v5 = vmul.f32 %v3521_v9, %v7713_v51 }
 0xa4f   : > { %5895 = vtanh.f32 %v3709_v34  ;;  %v7753_v44 = vadd.f32 %v3207_v39, %v7685_v46  ;;  %v3456_v54 = vmul.f32 0.044715, %v7736_v12  ;;  %v7758_v58 = vadd.f32 %v3320_v25, %v7689_v3 }
 0xa50   : > { %v3213_v56 = vpop.f32.mrf.mxu1  ;;  %v3326_v22 = vpop.f32.mrf.mxu0  ;;  %v3461_v34 = vmul.f32 0.044715, %v7748_v47  ;;  %v7761_v55 = vadd.f32 %v3211_v23, %v7676_v33  ;;  %v3649_v14 = vadd.f32 %v3585_v5, %v7713_v51  ;;  %v3458_v20 = vmul.f32 0.044715, %v7740_v42 }
 0xa51   : > { %v3459_v9 = vmul.f32 0.044715, %v7743_v7  ;;  %v7767_v39 = vadd.f32 %v3324_v53, %v7680_v35  ;;  %5897 = vtanh.f32 %v3703_v59  ;;  %v7770_v19 = vmul.f32 %v3514_v50, %v7697_v49 }
 0xa52   : > { %v3215_v10 = vpop.f32.mrf.mxu1  ;;  %v3328_v40 = vpop.f32.mrf.mxu0  ;;  %v3525_v25 = vmul.f32 %v3461_v34, %v7748_v47  ;;  %v3460_v23 = vmul.f32 0.044715, %v7753_v44  ;;  %v7775_v41 = vmul.f32 %v3516_v15, %v7702_v0  ;;  %v3519_v5 = vmul.f32 %v3455_v36, %v7727_v18 }
 0xa53   : > { %8910 = vst [vmem:[#allocation47_spill] sm:$0xff] %v7767_v39  ;;  %v3462_v24 = vmul.f32 0.044715, %v7758_v58  ;;  %v3465_v60 = vmul.f32 0.044715, %v7767_v39  ;;  %5899 = vtanh.f32 %v3707_v27  ;;  %v7781_v59 = vmul.f32 %v3518_v43, %v7705_v11 }
 0xa54   : > { %v3217_v28 = vpop.f32.mrf.mxu1  ;;  %v3330_v53 = vpop.f32.mrf.mxu0  ;;  %v3520_v50 = vmul.f32 %v3456_v54, %v7736_v12  ;;  %v3463_v34 = vmul.f32 0.044715, %v7761_v55  ;;  %v3713_v37 = vmul.f32 0.7978846, %v3649_v14  ;;  %v3522_v61 = vmul.f32 %v3458_v20, %v7740_v42 }
 0xa55   : > { %v3523_v15 = vmul.f32 %v3459_v9, %v7743_v7  ;;  %v3529_v36 = vmul.f32 %v3465_v60, %v7767_v39  ;;  %v3589_v32 = vmul.f32 %v3525_v25, %v7748_v47  ;;  %v3524_v16 = vmul.f32 %v3460_v23, %v7753_v44 }
 0xa56   : > { %v7791_v27 = vadd.f32 %v3213_v56, %v7685_v46  ;;  %v7794_v43 = vadd.f32 %v3326_v22, %v7689_v3  ;;  %v3221_v54 = vpop.f32.mrf.mxu1  ;;  %v7797_v21 = vmul.f32 %v3519_v5, %v7727_v18  ;;  %v3526_v20 = vmul.f32 %v3462_v24, %v7758_v58  ;;  %v3334_v9 = vpop.f32.mrf.mxu0 }
 0xa57   : > { %v3593_v14 = vmul.f32 %v3529_v36, %v7767_v39  ;;  %v7802_v60 = vadd.f32 %v3328_v40, %v7680_v35  ;;  %v7805_v23 = vmul.f32 %v3520_v50, %v7736_v12  ;;  %v3527_v56 = vmul.f32 %v3463_v34, %v7761_v55 }
 0xa58   : > { %v5894_v25 = vpop.eup %5893  ;;  %v7809_v22 = vadd.f32 %v3215_v10, %v7676_v33  ;;  %v7812_v5 = vadd.f32 %v3217_v28, %v7685_v46  ;;  %5901 = vtanh.f32 %v3713_v37  ;;  %v7815_v24 = vmul.f32 %v3522_v61, %v7740_v42  ;;  %v3223_v28 = vpop.f32.mrf.mxu1 }
 0xa59   : > { %8911 = vst [vmem:[#allocation48_spill] sm:$0xff] %v7802_v60  ;;  %v7818_v40 = vmul.f32 %v3523_v15, %v7743_v7  ;;  %v3469_v36 = vmul.f32 0.044715, %v7802_v60  ;;  %v3653_v50 = vadd.f32 %v3589_v32, %v7748_v47  ;;  %v7823_v45 = vmul.f32 %v3524_v16, %v7753_v44  ;;  %v3336_v4 = vpop.f32.mrf.mxu0 }
 0xa5a   : > { %v3464_v10 = vmul.f32 0.044715, %v7791_v27  ;;  %v3466_v34 = vmul.f32 0.044715, %v7794_v43  ;;  %v3833_v37 = vadd.f32 1.0, %v5894_v25  ;;  %v7828_v61 = vmul.f32 %v3526_v20, %v7758_v58  ;;  %v3225_v6 = vpop.f32.mrf.mxu1 }
 0xa5b   : > { %v3657_v15 = vadd.f32 %v3593_v14, %v7767_v39  ;;  %v3533_v63 = vmul.f32 %v3469_v36, %v7802_v60  ;;  %v7833_v32 = vmul.f32 %v3527_v56, %v7761_v55  ;;  %v3467_v16 = vmul.f32 0.044715, %v7809_v22 }
 0xa5c   : > { %v5896_v1 = vpop.eup %5895  ;;  %v3468_v17 = vmul.f32 0.044715, %v7812_v5  ;;  %v7838_v29 = vadd.f32 %v3330_v53, %v7689_v3  ;;  %v7842_v20 = vadd.f32 %v3221_v54, %v7676_v33  ;;  %v7845_v14 = vadd.f32 %v3334_v9, %v7680_v35  ;;  %v3338_v9 = vpop.f32.mrf.mxu0 }
 0xa5d   : > { %v3837_v2 = vadd.f32 1.0, %v5896_v1  ;;  %v3597_v25 = vmul.f32 %v3533_v63, %v7802_v60  ;;  %v3717_v36 = vmul.f32 0.7978846, %v3653_v50  ;;  %v3528_v56 = vmul.f32 %v3464_v10, %v7791_v27 }
 0xa5e   : > { %v3530_v39 = vmul.f32 %v3466_v34, %v7794_v43  ;;  %v3470_v48 = vmul.f32 0.044715, %v7838_v29  ;;  %v7850_v52 = vpop.eup %5897  ;;  %v7853_v1 = vmul.f32 %v3833_v37, %v7709_v38  ;;  %v3721_v63 = vmul.f32 0.7978846, %v3657_v15 }
 0xa5f   : > { %v3661_v53 = vadd.f32 %v3597_v25, %v7802_v60  ;;  %v3473_v54 = vmul.f32 0.044715, %v7845_v14  ;;  %v3531_v50 = vmul.f32 %v3467_v16, %v7809_v22  ;;  %v3532_v10 = vmul.f32 %v3468_v17, %v7812_v5 }
 0xa60   : > { %8912 = vst [vmem:[#allocation49_spill] sm:$0xff] %v7853_v1  ;;  %v7860_v34 = vadd.f32 %v3223_v28, %v7685_v46  ;;  %v7863_v8 = vadd.f32 %v3336_v4, %v7689_v3  ;;  %v5900_v51 = vpop.eup %5899  ;;  %v7866_v38 = vmul.f32 %v3837_v2, %v7733_v31  ;;  %v3471_v37 = vmul.f32 0.044715, %v7842_v20 }
 0xa61   : > { %v3537_v15 = vmul.f32 %v3473_v54, %v7845_v14  ;;  %v7871_v25 = vadd.f32 %v3225_v6, %v7676_v33  ;;  %5903 = vtanh.f32 %v3717_v36  ;;  %v7874_v17 = vmul.f32 %v3528_v56, %v7791_v27  ;;  %v3227_v54 = vpop.f32.mrf.mxu1  ;;  %v3340_v33 = vpop.f32.mrf.mxu0 }
 0xa62   : > { %v3534_v28 = vmul.f32 %v3470_v48, %v7838_v29  ;;  %v7878_v4 = vadd.f32 %v3338_v9, %v7680_v35  ;;  %5905 = vtanh.f32 %v3721_v63  ;;  %v7881_v31 = vmul.f32 %v3530_v39, %v7794_v43 }
 0xa63   : > { %v3725_v2 = vmul.f32 0.7978846, %v3661_v53  ;;  %v3601_v16 = vmul.f32 %v3537_v15, %v7845_v14  ;;  %v7885_v6 = vmul.f32 %v3531_v50, %v7809_v22  ;;  %v3472_v36 = vmul.f32 0.044715, %v7860_v34 }
 0xa64   : > { %v3474_v56 = vmul.f32 0.044715, %v7863_v8  ;;  %v3477_v48 = vmul.f32 0.044715, %v7878_v4  ;;  %v7893_v39 = vmul.f32 %v3532_v10, %v7812_v5  ;;  %v3535_v53 = vmul.f32 %v3471_v37, %v7842_v20 }
 0xa65   : > { %v3475_v9 = vmul.f32 0.044715, %v7871_v25  ;;  %v7897_v15 = vpop.eup %5901  ;;  %v7900_v50 = vmul.f32 %v3534_v28, %v7838_v29  ;;  %v3665_v35 = vadd.f32 %v3601_v16, %v7845_v14  ;;  %v7905_v62 = vadd.f32 %v3227_v54, %v7685_v46 }
 0xa66   : > { %v3541_v60 = vmul.f32 %v3477_v48, %v7878_v4  ;;  %5907 = vtanh.f32 %v3725_v2  ;;  %v7908_v10 = vadd.f32 %v3340_v33, %v7689_v3  ;;  %v3640_v37 = vadd.f32 %v7731_v26, %v7692_v13 }
 0xa67   : > { %v3644_v63 = vadd.f32 %v7775_v41, %v7702_v0  ;;  %v3536_v28 = vmul.f32 %v3472_v36, %v7860_v34  ;;  %v3538_v1 = vmul.f32 %v3474_v56, %v7863_v8  ;;  %v3642_v54 = vadd.f32 %v7770_v19, %v7697_v49 }
 0xa68   : > { %v3605_v16 = vmul.f32 %v3541_v60, %v7878_v4  ;;  %v3539_v2 = vmul.f32 %v3475_v9, %v7871_v25  ;;  %v3704_v48 = vmul.f32 0.7978846, %v3640_v37  ;;  %v3646_v3 = vadd.f32 %v7781_v59, %v7705_v11 }
 0xa69   : > { %v3708_v33 = vmul.f32 0.7978846, %v3644_v63  ;;  %v3729_v26 = vmul.f32 0.7978846, %v3665_v35  ;;  %v3476_v41 = vmul.f32 0.044715, %v7905_v62  ;;  %v7925_v56 = vmul.f32 %v3535_v53, %v7842_v20 }
 0xa6a   : > { %v3669_v13 = vadd.f32 %v3605_v16, %v7878_v4  ;;  %v3706_v36 = vmul.f32 0.7978846, %v3642_v54  ;;  %v3478_v60 = vmul.f32 0.044715, %v7908_v10  ;;  %5909 = vtanh.f32 %v3704_v48 }
 0xa6b   : > { %v3710_v19 = vmul.f32 0.7978846, %v3646_v3  ;;  %v7929_v49 = vmul.f32 %v3536_v28, %v7860_v34  ;;  %v7932_v63 = vmul.f32 %v3538_v1, %v7863_v8  ;;  %5911 = vtanh.f32 %v3708_v33 }
 0xa6c   : > { %v3733_v59 = vmul.f32 0.7978846, %v3669_v13  ;;  %v7935_v35 = vmul.f32 %v3539_v2, %v7871_v25  ;;  %v7938_v9 = vmul.f32 0.5, %v7702_v0  ;;  %5913 = vtanh.f32 %v3706_v36 }
 0xa6d   : > { %v3648_v53 = vadd.f32 %v7805_v23, %v7736_v12  ;;  %5915 = vtanh.f32 %v3729_v26  ;;  %v3540_v3 = vmul.f32 %v3476_v41, %v7905_v62  ;;  %v3835_v37 = vadd.f32 1.0, %v5900_v51 }
 0xa6e   : > { %v3652_v1 = vadd.f32 %v7823_v45, %v7753_v44  ;;  %v5904_v28 = vpop.eup %5903  ;;  %v3542_v16 = vmul.f32 %v3478_v60, %v7908_v10  ;;  %5917 = vtanh.f32 %v3710_v19  ;;  %v3650_v0 = vadd.f32 %v7815_v24, %v7740_v42 }
 0xa6f   : > { %v3712_v54 = vmul.f32 0.7978846, %v3648_v53  ;;  %v7948_v2 = vpop.eup %5905  ;;  %5919 = vtanh.f32 %v3733_v59  ;;  %v3831_v23 = vadd.f32 1.0, %v7850_v52  ;;  %v3654_v51 = vadd.f32 %v7828_v61, %v7758_v58 }
 0xa70   : > { %v3716_v48 = vmul.f32 0.7978846, %v3652_v1  ;;  %v3714_v33 = vmul.f32 0.7978846, %v3650_v0  ;;  %v3647_v45 = vadd.f32 %v7797_v21, %v7727_v18  ;;  %v3651_v26 = vadd.f32 %v7818_v40, %v7743_v7 }
 0xa71   : > { %5921 = vtanh.f32 %v3712_v54  ;;  %v3390_v13 = vmul.f32 0.5, %v7705_v11  ;;  %v7959_v24 = vmul.f32 %v3835_v37, %v7715_v30  ;;  %v3718_v41 = vmul.f32 0.7978846, %v3654_v51 }
 0xa72   : > { %5923 = vtanh.f32 %v3716_v48  ;;  %v7962_v52 = vmul.f32 %v3540_v3, %v7905_v62  ;;  %v3711_v61 = vmul.f32 0.7978846, %v3647_v45  ;;  %v3715_v36 = vmul.f32 0.7978846, %v3651_v26  ;;  %v8913_v26 = vld [vmem:[#allocation45_spill] sm:$0xff] }
 0xa73   : > { %5925 = vtanh.f32 %v3714_v33  ;;  %v7964_v60 = vpop.eup %5907  ;;  %v7967_v21 = vmul.f32 %v3542_v16, %v7908_v10  ;;  %v7970_v40 = vmul.f32 %v3831_v23, %v7707_v57  ;;  %v7973_v11 = vmul.f32 0.5, %v7736_v12 }
 0xa74   : > { %5927 = vtanh.f32 %v3718_v41  ;;  %v7976_v30 = vmul.f32 0.5, %v7753_v44  ;;  %v3656_v19 = vadd.f32 %v7874_v17, %v7791_v27  ;;  %v3660_v59 = vadd.f32 %v7893_v39, %v7812_v5 }
 0xa75   : > { %5929 = vtanh.f32 %v3711_v61  ;;  %v3959_v53 = vpack.c.bf16 %v7959_v24, %v7970_v40  ;;  %v7985_v57 = vmul.f32 0.5, %v7740_v42  ;;  %v7988_v12 = vmul.f32 0.5, %v7758_v58 }
 0xa76   : > { %5931 = vtanh.f32 %v3715_v36  ;;  %v3720_v3 = vmul.f32 0.7978846, %v3656_v19  ;;  %v3724_v44 = vmul.f32 0.7978846, %v3660_v59  ;;  %v3658_v37 = vadd.f32 %v7881_v31, %v7794_v43 }
 0xa77   : > { %v3662_v17 = vadd.f32 %v7900_v50, %v7838_v29  ;;  %v5910_v1 = vpop.eup %5909  ;;  %v7995_v39 = vmul.f32 0.5, %v7727_v18  ;;  %v7998_v16 = vmul.f32 0.5, %v7743_v7  ;;  %v3845_v42 = vadd.f32 1.0, %v5904_v28 }
 0xa78   : > { %v3655_v58 = vadd.f32 %v7833_v32, %v7761_v55  ;;  %v5912_v54 = vpop.eup %5911  ;;  %v3832_v0 = vadd.f32 1.0, %v5910_v1  ;;  %5933 = vtanh.f32 %v3720_v3  ;;  %v3722_v23 = vmul.f32 0.7978846, %v3658_v37  ;;  %v8915_v37 = vld [vmem:[#allocation46_spill] sm:$0xff] }
 0xa79   : > { %v3726_v48 = vmul.f32 0.7978846, %v3662_v17  ;;  %v5914_v31 = vpop.eup %5913  ;;  %v3836_v51 = vadd.f32 1.0, %v5912_v54  ;;  %5935 = vtanh.f32 %v3724_v44  ;;  %v3659_v50 = vadd.f32 %v7885_v6, %v7809_v22  ;;  %v8914_v6 = vld [vmem:[#allocation44_spill] sm:$0xff] }
 0xa7a   : > { %v3719_v18 = vmul.f32 0.7978846, %v3655_v58  ;;  %v8004_v33 = vpop.eup %5915  ;;  %v3834_v7 = vadd.f32 1.0, %v5914_v31  ;;  %v3397_v28 = vmul.f32 0.5, %v7748_v47  ;;  %v3841_v45 = vadd.f32 1.0, %v7897_v15 }
 0xa7b   : > { %5937 = vtanh.f32 %v3722_v23  ;;  %v5918_v32 = vpop.eup %5917  ;;  %v3896_v24 = vmul.f32 %v3832_v0, %v8913_v26  ;;  %v3900_v41 = vmul.f32 %v3836_v51, %v7938_v9  ;;  %v3723_v61 = vmul.f32 0.7978846, %v3659_v50 }
 0xa7c   : > { %5939 = vtanh.f32 %v3726_v48  ;;  %v8010_v36 = vpop.eup %5919  ;;  %v3838_v40 = vadd.f32 1.0, %v5918_v32  ;;  %v3393_v19 = vmul.f32 0.5, %v8914_v6  ;;  %v8013_v59 = vmul.f32 %v3845_v42, %v3397_v28 }
 0xa7d   : > { %5941 = vtanh.f32 %v3719_v18  ;;  %v3960_v47 = vpack.c.bf16 %v3900_v41, %v3896_v24  ;;  %v8016_v15 = vmul.f32 0.5, %v7791_v27  ;;  %v8019_v44 = vmul.f32 0.5, %v7812_v5  ;;  %v8918_v41 = vld [vmem:[#allocation49_spill] sm:$0xff] }
 0xa7e   : > { %v5922_v3 = vpop.eup %5921  ;;  %5943 = vtanh.f32 %v3723_v61  ;;  %v3898_v17 = vmul.f32 %v3834_v7, %v8915_v37  ;;  %v3902_v1 = vmul.f32 %v3838_v40, %v3390_v13  ;;  %v8022_v54 = vmul.f32 %v3841_v45, %v3393_v19  ;;  %v8916_v45 = vld [vmem:[#allocation21_spill] sm:$0xff]  ;;  %v8920_v37 = vld [vmem:[#allocation48_spill] sm:$0xff] }
 0xa7f   : > { %v5924_v9 = vpop.eup %5923  ;;  %v3840_v58 = vadd.f32 1.0, %v5922_v3  ;;  %4286 = vmatprep.mubr.bf16.mxu1 %v3960_v47  ;;  %v8025_v23 = vmul.f32 0.5, %v7794_v43  ;;  %v3664_v27 = vadd.f32 %v7929_v49, %v7860_v34  ;;  %v3668_v5 = vadd.f32 %v7962_v52, %v7905_v62 }
 0xa80   : > { %v5926_v0 = vpop.eup %5925  ;;  %v3844_v42 = vadd.f32 1.0, %v5924_v9  ;;  %v3962_v31 = vpack.c.bf16 %v3902_v1, %v3898_v17  ;;  %4287 = vmatmul.mubr.bf16.vlgmr.msra.gmra.mxu1 %v3959_v53  ;;  %v3965_v13 = vpack.c.bf16 %v8013_v59, %v8022_v54  ;;  %v8034_v50 = vmul.f32 0.5, %v7838_v29  ;;  %v8917_v29 = vld [vmem:[#allocation23_spill] sm:$0xff]  ;;  %v8926_v59 = vld [vmem:[#allocation42_spill] sm:$0xff] }
 0xa81   : > { %v5928_v48 = vpop.eup %5927  ;;  %v3842_v51 = vadd.f32 1.0, %v5926_v0  ;;  %v3904_v43 = vmul.f32 %v3840_v58, %v7973_v11  ;;  %v3728_v49 = vmul.f32 0.7978846, %v3664_v27  ;;  %5473 = vmatpush3.bf16.msra.mxu1 %v8916_v45  ;;  %v8041_v26 = vmul.f32 0.5, %v7761_v55 }
 0xa82   : > { %v5930_v18 = vpop.eup %5929  ;;  %v3908_v7 = vmul.f32 %v3844_v42, %v7976_v30  ;;  %v3846_v28 = vadd.f32 1.0, %v5928_v48  ;;  %4383 = vmatprep.mubr.bf16.mxu0 %v3962_v31  ;;  %v3732_v24 = vmul.f32 0.7978846, %v3668_v5  ;;  %5466 = vmatprep.subr.bf16.mxu1 %v8917_v29  ;;  %v8919_v11 = vpack.c.bf16 %v7866_v38, %v8918_v41  ;;  %v8922_v5 = vld [vmem:[#allocation26_spill] sm:$0xff] }
 0xa83   : > { %v5932_v52 = vpop.eup %5931  ;;  %v3906_v53 = vmul.f32 %v3842_v51, %v7985_v57  ;;  %v3839_v32 = vadd.f32 1.0, %v5930_v18  ;;  %5945 = vtanh.f32 %v3728_v49  ;;  %v3403_v6 = vmul.f32 0.5, %v7809_v22  ;;  %v8921_v22 = vld [vmem:[#allocation24_spill] sm:$0xff] }
 0xa84   : > { %4384 = vmatmul.mubr.bf16.vlgmr.msra.gmra.mxu0 %v8919_v11  ;;  %v3964_v30 = vpack.c.bf16 %v3908_v7, %v3904_v43  ;;  %v3910_v61 = vmul.f32 %v3846_v28, %v7988_v12  ;;  %v3843_v40 = vadd.f32 1.0, %v5932_v52  ;;  %5947 = vtanh.f32 %v3732_v24  ;;  %v8923_v11 = vld [vmem:[#allocation27_spill] sm:$0xff] }
 0xa85   : > { %v3666_v57 = vadd.f32 %v7932_v63, %v7863_v8  ;;  %v3670_v55 = vadd.f32 %v7967_v21, %v7908_v10  ;;  %v5934_v47 = vpop.eup %5933  ;;  %v3903_v9 = vmul.f32 %v3839_v32, %v7995_v39  ;;  %v3405_v17 = vmul.f32 0.5, %v8920_v37  ;;  %5474 = vmatpush3.bf16.msra.mxu1 %v8921_v22  ;;  %v8927_v37 = vld [vmem:[#allocation30_spill] sm:$0xff] }
 0xa86   : > { %4294 = vmatprep.mubr.bf16.mxu1 %v3964_v30  ;;  %v3966_v38 = vpack.c.bf16 %v3910_v61, %v3906_v53  ;;  %v3907_v12 = vmul.f32 %v3843_v40, %v7998_v16  ;;  %v5936_v1 = vpop.eup %5935  ;;  %v3848_v58 = vadd.f32 1.0, %v5934_v47  ;;  %v3663_v21 = vadd.f32 %v7925_v56, %v7842_v20  ;;  %5467 = vmatprep.subr.bf16.mxu1 %v8922_v5  ;;  %v8925_v40 = vld [vmem:[#allocation47_spill] sm:$0xff] }
 0xa87   : > { %v8053_v19 = vpop.f32.mrf.mxu1  ;;  %v3344_v3 = vpop.f32.mrf.mxu0  ;;  %v3730_v63 = vmul.f32 0.7978846, %v3666_v57  ;;  %v3734_v0 = vmul.f32 0.7978846, %v3670_v55  ;;  %v3852_v48 = vadd.f32 1.0, %v5936_v1  ;;  %v3853_v31 = vadd.f32 1.0, %v7964_v60 }
 0xa88   : > { %v5938_v39 = vpop.eup %5937  ;;  %4391 = vmatprep.mubr.bf16.mxu0 %v3966_v38  ;;  %v3963_v16 = vpack.c.bf16 %v3907_v12, %v3903_v9  ;;  %v3667_v51 = vadd.f32 %v7935_v35, %v7871_v25  ;;  %v3912_v43 = vmul.f32 %v3848_v58, %v8016_v15  ;;  %v3727_v56 = vmul.f32 0.7978846, %v3663_v21  ;;  %v8928_v1 = vld [vmem:[#allocation33_spill] sm:$0xff] }
 0xa89   : > { %v8061_v42 = vpop.f32.mrf.mxu1  ;;  %v8063_v27 = vpop.f32.mrf.mxu0  ;;  %v3850_v7 = vadd.f32 1.0, %v5938_v39  ;;  %5949 = vtanh.f32 %v3730_v63  ;;  %v3916_v52 = vmul.f32 %v3852_v48, %v8019_v44  ;;  %v3849_v29 = vadd.f32 1.0, %v7948_v2  ;;  %5475 = vmatpush3.bf16.msra.mxu1 %v8923_v11 }
 0xa8a   : > { %v5940_v18 = vpop.eup %5939  ;;  %4295 = vmatmul.mubr.bf16.gmra.mxu1 %v3963_v16  ;;  %5951 = vtanh.f32 %v3734_v0  ;;  %v3731_v32 = vmul.f32 0.7978846, %v3667_v51  ;;  %v3401_v2 = vmul.f32 0.5, %v8925_v40  ;;  %v3917_v57 = vmul.f32 %v3853_v31, %v3405_v17 }
 0xa8b   : > { %v8070_v28 = vpop.f32.mrf.mxu1  ;;  %v3348_v49 = vpop.f32.mrf.mxu0  ;;  %v3854_v53 = vadd.f32 1.0, %v5940_v18  ;;  %v3914_v24 = vmul.f32 %v3850_v7, %v8025_v23  ;;  %5953 = vtanh.f32 %v3727_v56  ;;  %v3968_v44 = vpack.c.bf16 %v3916_v52, %v3912_v43  ;;  %v8924_v23 = vld [vmem:[#allocation29_spill] sm:$0xff]  ;;  %v8929_v43 = vld [vmem:[#allocation34_spill] sm:$0xff] }
 0xa8c   : > { %v5942_v45 = vpop.eup %5941  ;;  %4392 = vmatmul.mubr.bf16.gmra.mxu0 %v3965_v13  ;;  %5955 = vtanh.f32 %v3731_v32  ;;  %5468 = vmatprep.subr.bf16.mxu1 %v8924_v23  ;;  %v8090_v54 = vadd.f32 %v3344_v3, %v8926_v59  ;;  %v3913_v17 = vmul.f32 %v3849_v29, %v3401_v2  ;;  %v3408_v5 = vmul.f32 0.5, %v7860_v34  ;;  %v8930_v34 = vld [vmem:[#allocation41_spill] sm:$0xff] }
 0xa8d   : > { %v5944_v60 = vpop.eup %5943  ;;  %v3847_v35 = vadd.f32 1.0, %v5942_v45  ;;  %v8075_v15 = vpop.f32.mrf.mxu1  ;;  %v3918_v30 = vmul.f32 %v3854_v53, %v8034_v50  ;;  %4302 = vmatprep.mubr.bf16.mxu1 %v3968_v44  ;;  %5476 = vmatpush3.bf16.msra.mxu1 %v8927_v37  ;;  %v3412_v39 = vmul.f32 0.5, %v7905_v62  ;;  %v3410_v31 = vmul.f32 0.5, %v7863_v8  ;;  %v8935_v2 = vld [vmem:[#allocation37_spill] sm:$0xff] }
 0xa8e   : > { %v8077_v41 = vpop.f32.mrf.mxu0  ;;  %v3851_v61 = vadd.f32 1.0, %v5944_v60  ;;  %5469 = vmatprep.subr.bf16.mxu1 %v8928_v1  ;;  %v3481_v63 = vmul.f32 0.044715, %v8090_v54  ;;  %v3969_v21 = vpack.c.bf16 %v3917_v57, %v3913_v17  ;;  %v3414_v51 = vmul.f32 0.5, %v7908_v10 }
 0xa8f   : > { %v8086_v55 = vpop.f32.mrf.mxu1  ;;  %v3970_v38 = vpack.c.bf16 %v3918_v30, %v3914_v24  ;;  %v3911_v9 = vmul.f32 %v3847_v35, %v8041_v26  ;;  %v8100_v26 = vadd.f32 %v3348_v49, %v8926_v59  ;;  %v3407_v7 = vmul.f32 0.5, %v7842_v20  ;;  %v8931_v20 = vld [vmem:[#allocation35_spill] sm:$0xff] }
 0xa90   : > { %v3354_v47 = vpop.f32.mrf.mxu0  ;;  %v3915_v12 = vmul.f32 %v3851_v61, %v3403_v6  ;;  %v5946_v58 = vpop.eup %5945  ;;  %v3857_v56 = vadd.f32 1.0, %v8004_v33  ;;  %v3861_v49 = vadd.f32 1.0, %v8010_v36  ;;  %v8117_v62 = vadd.f32 %v8053_v19, %v8930_v34  ;;  %v8932_v24 = vld [vmem:[#allocation43_spill] sm:$0xff]  ;;  %v8933_v61 = vld [vmem:[#allocation36_spill] sm:$0xff] }
 0xa91   : > { %v8092_v13 = vpop.f32.mrf.mxu1  ;;  %4399 = vmatprep.mubr.bf16.mxu0 %v3970_v38  ;;  %v5948_v0 = vpop.eup %5947  ;;  %v3856_v16 = vadd.f32 1.0, %v5946_v58  ;;  %v3485_v18 = vmul.f32 0.044715, %v8100_v26  ;;  %5477 = vmatpush3.bf16.msra.mxu1 %v8929_v43  ;;  %v3545_v10 = vmul.f32 %v3481_v63, %v8090_v54  ;;  %v8124_v53 = vadd.f32 %v8061_v42, %v7685_v46 }
 0xa92   : > { %v8094_v50 = vpop.f32.mrf.mxu0  ;;  %v3967_v22 = vpack.c.bf16 %v3915_v12, %v3911_v9  ;;  %v3860_v48 = vadd.f32 1.0, %v5948_v0  ;;  %5470 = vmatprep.subr.bf16.mxu1 %v8931_v20  ;;  %v3411_v36 = vmul.f32 0.5, %v7871_v25  ;;  %v3409_v19 = vmul.f32 0.5, %v7845_v14 }
 0xa93   : > { %v8102_v6 = vpop.f32.mrf.mxu1  ;;  %v3920_v8 = vmul.f32 %v3856_v16, %v3408_v5  ;;  %v3413_v60 = vmul.f32 0.5, %v7878_v4  ;;  %v8134_v35 = vadd.f32 %v8063_v27, %v8932_v24  ;;  %v8138_v42 = vadd.f32 %v8070_v28, %v8930_v34  ;;  %v8936_v5 = vld [vmem:[#allocation38_spill] sm:$0xff] }
 0xa94   : > { %v8104_v3 = vpop.f32.mrf.mxu0  ;;  %4303 = vmatmul.mubr.bf16.gmra.mxu1 %v3967_v22  ;;  %4400 = vmatmul.mubr.bf16.gmra.mxu0 %v3969_v21  ;;  %v3924_v52 = vmul.f32 %v3860_v48, %v3412_v39  ;;  %v3549_v30 = vmul.f32 %v3485_v18, %v8100_v26  ;;  %v3921_v14 = vmul.f32 %v3857_v56, %v3409_v19  ;;  %v3479_v28 = vmul.f32 0.044715, %v8117_v62 }
 0xa95   : > { %v8119_v45 = vpop.f32.mrf.mxu1  ;;  %5478 = vmatpush3.bf16.msra.mxu1 %v8933_v61  ;;  %v3925_v40 = vmul.f32 %v3861_v49, %v3413_v60  ;;  %v8143_v4 = vadd.f32 %v3354_v47, %v8926_v59  ;;  %v3609_v9 = vmul.f32 %v3545_v10, %v8090_v54  ;;  %v3480_v12 = vmul.f32 0.044715, %v8124_v53 }
 0xa96   : > { %v8126_v32 = vpop.f32.mrf.mxu0  ;;  %v5950_v33 = vpop.eup %5949  ;;  %v3972_v11 = vpack.c.bf16 %v3924_v52, %v3920_v8  ;;  %5471 = vmatprep.subr.bf16.mxu1 %v8935_v2  ;;  %v8153_v47 = vadd.f32 %v8075_v15, %v7685_v46  ;;  %v3482_v58 = vmul.f32 0.044715, %v8134_v35  ;;  %v3483_v63 = vmul.f32 0.044715, %v8138_v42  ;;  %v8937_v15 = vld [vmem:[#allocation39_spill] sm:$0xff] }
 0xa97   : > { %v5952_v29 = vpop.eup %5951  ;;  %v3858_v44 = vadd.f32 1.0, %v5950_v33  ;;  %8934 = vst [vmem:[#allocation45_spill] sm:$0xff] %v8143_v4  ;;  %v8145_v27 = vpop.f32.mrf.mxu1  ;;  %v3613_v0 = vmul.f32 %v3549_v30, %v8100_v26  ;;  %v8160_v21 = vadd.f32 %v8077_v41, %v8932_v24  ;;  %v3973_v18 = vpack.c.bf16 %v3925_v40, %v3921_v14 }
 0xa98   : > { %v5954_v25 = vpop.eup %5953  ;;  %v3862_v23 = vadd.f32 1.0, %v5952_v29  ;;  %4310 = vmatprep.mubr.bf16.mxu1 %v3972_v11  ;;  %v3364_v37 = vpop.f32.mrf.mxu0  ;;  %v3543_v43 = vmul.f32 %v3479_v28, %v8117_v62  ;;  %v8168_v56 = vadd.f32 %v8086_v55, %v8930_v34  ;;  %v3673_v8 = vadd.f32 %v3609_v9, %v8090_v54  ;;  %v8939_v55 = vld [vmem:[#allocation40_spill] sm:$0xff] }
 0xa99   : > { %v5956_v57 = vpop.eup %5955  ;;  %v3855_v38 = vadd.f32 1.0, %v5954_v25  ;;  %v3922_v22 = vmul.f32 %v3858_v44, %v3410_v31  ;;  %5479 = vmatpush3.bf16.msra.mxu1 %v8936_v5  ;;  %v3489_v31 = vmul.f32 0.044715, %v8143_v4  ;;  %v8174_v52 = vadd.f32 %v8104_v3, %v8926_v59 }
 0xa9a   : > { %v3926_v17 = vmul.f32 %v3862_v23, %v3414_v51  ;;  %v3859_v1 = vadd.f32 1.0, %v5956_v57  ;;  %v3253_v51 = vpop.f32.mrf.mxu1  ;;  %5472 = vmatprep.subr.bf16.mxu1 %v8937_v15  ;;  %v3366_v49 = vpop.f32.mrf.mxu0  ;;  %v3544_v10 = vmul.f32 %v3480_v12, %v8124_v53  ;;  %v3677_v20 = vadd.f32 %v3613_v0, %v8100_v26 }
 0xa9b   : > { %v3919_v16 = vmul.f32 %v3855_v38, %v3407_v7  ;;  %v3484_v7 = vmul.f32 0.044715, %v8153_v47  ;;  %8938 = vst [vmem:[#allocation44_spill] sm:$0xff] %v8174_v52  ;;  %v3486_v33 = vmul.f32 0.044715, %v8160_v21  ;;  %v3547_v19 = vmul.f32 %v3483_v63, %v8138_v42 }
 0xa9c   : > { %v3974_v39 = vpack.c.bf16 %v3926_v17, %v3922_v22  ;;  %v3923_v48 = vmul.f32 %v3859_v1, %v3411_v36  ;;  %v3546_v36 = vmul.f32 %v3482_v58, %v8134_v35  ;;  %v3553_v60 = vmul.f32 %v3489_v31, %v8143_v4  ;;  %v3255_v3 = vpop.f32.mrf.mxu1  ;;  %v3368_v61 = vpop.f32.mrf.mxu0 }
 0xa9d   : > { %5480 = vmatpush3.bf16.msra.mxu1 %v8939_v55  ;;  %v3493_v29 = vmul.f32 0.044715, %v8174_v52  ;;  %v3487_v11 = vmul.f32 0.044715, %v8168_v56  ;;  %v8187_v44 = vadd.f32 %v8092_v13, %v7685_v46  ;;  %v8191_v30 = vadd.f32 %v8094_v50, %v8932_v24 }
 0xa9e   : > { %4407 = vmatprep.mubr.bf16.mxu0 %v3974_v39  ;;  %v3971_v41 = vpack.c.bf16 %v3923_v48, %v3919_v16  ;;  %v8194_v25 = vmul.f32 %v3543_v43, %v8117_v62  ;;  %v3737_v23 = vmul.f32 0.7978846, %v3673_v8  ;;  %v3548_v14 = vmul.f32 %v3484_v7, %v8153_v47  ;;  %v3257_v12 = vpop.f32.mrf.mxu1  ;;  %v3370_v58 = vpop.f32.mrf.mxu0 }
 0xa9f   : > { %4408 = vmatmul.mubr.bf16.gmra.mxu0 %v3973_v18  ;;  %v8199_v40 = vadd.f32 %v8102_v6, %v8930_v34  ;;  %v8202_v2 = vmul.f32 %v3544_v10, %v8124_v53  ;;  %v3741_v13 = vmul.f32 0.7978846, %v3677_v20  ;;  %v3550_v57 = vmul.f32 %v3486_v33, %v8160_v21 }
 0xaa0   : > { %4311 = vmatmul.mubr.bf16.gmra.mxu1 %v3971_v41  ;;  %v8207_v50 = vadd.f32 %v8119_v45, %v7685_v46  ;;  %v8210_v38 = vmul.f32 %v3546_v36, %v8134_v35  ;;  %v8213_v28 = vmul.f32 %v3547_v19, %v8138_v42  ;;  %v3617_v9 = vmul.f32 %v3553_v60, %v8143_v4  ;;  %v3374_v10 = vpop.f32.mrf.mxu0 }
 0xaa1   : > { %v3557_v6 = vmul.f32 %v3493_v29, %v8174_v52  ;;  %v3551_v22 = vmul.f32 %v3487_v11, %v8168_v56  ;;  %v3488_v17 = vmul.f32 0.044715, %v8187_v44  ;;  %v3490_v1 = vmul.f32 0.044715, %v8191_v30 }
 0xaa2   : > { %v8221_v45 = vadd.f32 %v3364_v37, %v8926_v59  ;;  %5957 = vtanh.f32 %v3737_v23  ;;  %v8224_v63 = vmul.f32 %v3548_v14, %v8153_v47  ;;  %v3491_v0 = vmul.f32 0.044715, %v8199_v40 }
 0xaa3   : > { %v8229_v5 = vadd.f32 %v8126_v32, %v8932_v24  ;;  %5959 = vtanh.f32 %v3741_v13  ;;  %v8232_v39 = vmul.f32 %v3550_v57, %v8160_v21  ;;  %v3492_v16 = vmul.f32 0.044715, %v8207_v50  ;;  %v3261_v32 = vpop.f32.mrf.mxu1 }
 0xaa4   : > { %8940 = vst [vmem:[#allocation46_spill] sm:$0xff] %v8221_v45  ;;  %v3497_v37 = vmul.f32 0.044715, %v8221_v45  ;;  %v3681_v48 = vadd.f32 %v3617_v9, %v8143_v4  ;;  %v3621_v31 = vmul.f32 %v3557_v6, %v8174_v52  ;;  %v8240_v15 = vadd.f32 %v8145_v27, %v8930_v34  ;;  %v3376_v9 = vpop.f32.mrf.mxu0 }
 0xaa5   : > { %v8243_v18 = vadd.f32 %v3368_v61, %v8926_v59  ;;  %v8246_v43 = vmul.f32 %v3551_v22, %v8168_v56  ;;  %v3552_v41 = vmul.f32 %v3488_v17, %v8187_v44  ;;  %v3554_v8 = vmul.f32 %v3490_v1, %v8191_v30  ;;  %v3263_v23 = vpop.f32.mrf.mxu1 }
 0xaa6   : > { %v8251_v7 = vadd.f32 %v3253_v51, %v7685_v46  ;;  %v3555_v20 = vmul.f32 %v3491_v0, %v8199_v40  ;;  %v3494_v27 = vmul.f32 0.044715, %v8229_v5  ;;  %v8256_v33 = vadd.f32 %v3366_v49, %v8932_v24 }
 0xaa7   : > { %8941 = vst [vmem:[#allocation21_spill] sm:$0xff] %v8243_v18  ;;  %v8259_v55 = vadd.f32 %v3255_v3, %v8930_v34  ;;  %v3556_v36 = vmul.f32 %v3492_v16, %v8207_v50  ;;  %v3561_v19 = vmul.f32 %v3497_v37, %v8221_v45  ;;  %v3501_v60 = vmul.f32 0.044715, %v8243_v18 }
 0xaa8   : > { %v8265_v51 = vadd.f32 %v3257_v12, %v7685_v46  ;;  %v3745_v29 = vmul.f32 0.7978846, %v3681_v48  ;;  %v3685_v11 = vadd.f32 %v3621_v31, %v8174_v52  ;;  %v3495_v61 = vmul.f32 0.044715, %v8240_v15 }
 0xaa9   : > { %v8270_v49 = vadd.f32 %v3370_v58, %v8932_v24  ;;  %v8273_v3 = vmul.f32 %v3552_v41, %v8187_v44  ;;  %v8276_v14 = vmul.f32 %v3554_v8, %v8191_v30  ;;  %v3496_v13 = vmul.f32 0.044715, %v8251_v7 }
 0xaaa   : > { %v8280_v57 = vadd.f32 %v3261_v32, %v8930_v34  ;;  %v8283_v6 = vmul.f32 %v3555_v20, %v8199_v40  ;;  %v3498_v12 = vmul.f32 0.044715, %v8256_v33  ;;  %v3499_v22 = vmul.f32 0.044715, %v8259_v55  ;;  %v3265_v32 = vpop.f32.mrf.mxu1 }
 0xaab   : > { %8942 = vst [vmem:[#allocation23_spill] sm:$0xff] %v8270_v49  ;;  %v3565_v17 = vmul.f32 %v3501_v60, %v8243_v18  ;;  %v8289_v1 = vmul.f32 %v3556_v36, %v8207_v50  ;;  %v3558_v58 = vmul.f32 %v3494_v27, %v8229_v5  ;;  %v3625_v0 = vmul.f32 %v3561_v19, %v8221_v45  ;;  %v3378_v36 = vpop.f32.mrf.mxu0 }
 0xaac   : > { %v3500_v16 = vmul.f32 0.044715, %v8265_v51  ;;  %5961 = vtanh.f32 %v3745_v29  ;;  %v3749_v37 = vmul.f32 0.7978846, %v3685_v11  ;;  %v3559_v48 = vmul.f32 %v3495_v61, %v8240_v15  ;;  %v3267_v52 = vpop.f32.mrf.mxu1 }
 0xaad   : > { %v3502_v31 = vmul.f32 0.044715, %v8270_v49  ;;  %v3560_v41 = vmul.f32 %v3496_v13, %v8251_v7  ;;  %v3503_v8 = vmul.f32 0.044715, %v8280_v57  ;;  %v8299_v20 = vadd.f32 %v3374_v10, %v8926_v59 }
 0xaae   : > { %v8302_v27 = vadd.f32 %v3263_v23, %v7685_v46  ;;  %v3562_v19 = vmul.f32 %v3498_v12, %v8256_v33  ;;  %v3563_v60 = vmul.f32 %v3499_v22, %v8259_v55  ;;  %v3629_v29 = vmul.f32 %v3565_v17, %v8243_v18 }
 0xaaf   : > { %v8308_v11 = vadd.f32 %v3376_v9, %v8932_v24  ;;  %v8310_v61 = vpop.eup %5957  ;;  %v8313_v13 = vmul.f32 %v3558_v58, %v8229_v5  ;;  %v3689_v10 = vadd.f32 %v3625_v0, %v8221_v45  ;;  %v3564_v23 = vmul.f32 %v3500_v16, %v8265_v51 }
 0xab0   : > { %v8318_v4 = vadd.f32 %v3265_v32, %v8930_v34  ;;  %v5960_v12 = vpop.eup %5959  ;;  %5963 = vtanh.f32 %v3749_v37  ;;  %v8321_v22 = vmul.f32 %v3559_v48, %v8240_v15  ;;  %v3566_v9 = vmul.f32 %v3502_v31, %v8270_v49  ;;  %v3380_v32 = vpop.f32.mrf.mxu0 }
 0xab1   : > { %v8325_v17 = vadd.f32 %v3378_v36, %v8926_v59  ;;  %v8328_v58 = vmul.f32 %v3560_v41, %v8251_v7  ;;  %v3567_v0 = vmul.f32 %v3503_v8, %v8280_v57  ;;  %v3505_v16 = vmul.f32 0.044715, %v8299_v20 }
 0xab2   : > { %v3504_v34 = vmul.f32 0.044715, %v8302_v27  ;;  %v8334_v37 = vmul.f32 %v3562_v19, %v8256_v33  ;;  %v8337_v48 = vmul.f32 %v3563_v60, %v8259_v55  ;;  %v3693_v31 = vadd.f32 %v3629_v29, %v8243_v18 }
 0xab3   : > { %v3506_v59 = vmul.f32 0.044715, %v8308_v11  ;;  %v8341_v36 = vmul.f32 0.7978846, %v3689_v10  ;;  %v8344_v41 = vmul.f32 %v3564_v23, %v8265_v51  ;;  %v3507_v8 = vmul.f32 0.044715, %v8318_v4 }
 0xab4   : > { %8943 = vst [vmem:[#allocation49_spill] sm:$0xff] %v8334_v37  ;;  %v8348_v45 = vadd.f32 %v3267_v52, %v7685_v46  ;;  %v8351_v19 = vmul.f32 %v3566_v9, %v8270_v49  ;;  %v3509_v60 = vmul.f32 0.044715, %v8325_v17  ;;  %v3672_v29 = vadd.f32 %v8202_v2, %v8124_v53 }
 0xab5   : > { %8944 = vst [vmem:[#allocation48_spill] sm:$0xff] %v8341_v36  ;;  %v3676_v10 = vadd.f32 %v8224_v63, %v8153_v47  ;;  %v8359_v18 = vmul.f32 %v3567_v0, %v8280_v57  ;;  %v3569_v23 = vmul.f32 %v3505_v16, %v8299_v20  ;;  %v3568_v36 = vmul.f32 %v3504_v34, %v8302_v27 }
 0xab6   : > { %8945 = vst [vmem:[#allocation24_spill] sm:$0xff] %v8351_v19  ;;  %v8364_v46 = vadd.f32 %v3380_v32, %v8932_v24  ;;  %v3757_v52 = vmul.f32 0.7978846, %v3693_v31  ;;  %v3570_v9 = vmul.f32 %v3506_v59, %v8308_v11  ;;  %v3736_v19 = vmul.f32 0.7978846, %v3672_v29 }
 0xab7   : > { %v3740_v49 = vmul.f32 0.7978846, %v3676_v10  ;;  %v3571_v2 = vmul.f32 %v3507_v8, %v8318_v4  ;;  %v3508_v37 = vmul.f32 0.044715, %v8348_v45  ;;  %v3674_v63 = vadd.f32 %v8210_v38, %v8134_v35 }
 0xab8   : > { %v3678_v0 = vadd.f32 %v8232_v39, %v8160_v21  ;;  %v3573_v16 = vmul.f32 %v3509_v60, %v8325_v17  ;;  %5965 = vtanh.f32 %v3736_v19  ;;  %v3671_v24 = vadd.f32 %v8194_v25, %v8117_v62 }
 0xab9   : > { %v3675_v34 = vadd.f32 %v8213_v28, %v8138_v42  ;;  %v8378_v31 = vpop.eup %5961  ;;  %v3510_v59 = vmul.f32 0.044715, %v8364_v46  ;;  %5967 = vtanh.f32 %v3740_v49  ;;  %v3738_v32 = vmul.f32 0.7978846, %v3674_v63 }
 0xaba   : > { %v3742_v8 = vmul.f32 0.7978846, %v3678_v0  ;;  %5969 = vtanh.f32 %v3757_v52  ;;  %v8382_v38 = vmul.f32 %v3569_v23, %v8299_v20  ;;  %v3735_v39 = vmul.f32 0.7978846, %v3671_v24 }
 0xabb   : > { %v3739_v60 = vmul.f32 0.7978846, %v3675_v34  ;;  %v8385_v19 = vmul.f32 %v3568_v36, %v8302_v27  ;;  %v8388_v25 = vmul.f32 %v3570_v9, %v8308_v11  ;;  %v3572_v28 = vmul.f32 %v3508_v37, %v8348_v45 }
 0xabc   : > { %5971 = vtanh.f32 %v3738_v32  ;;  %v8392_v29 = vmul.f32 %v3571_v2, %v8318_v4  ;;  %v3416_v49 = vmul.f32 0.5, %v8124_v53  ;;  %v3680_v10 = vadd.f32 %v8273_v3, %v8187_v44 }
 0xabd   : > { %5973 = vtanh.f32 %v3742_v8  ;;  %v5964_v23 = vpop.eup %5963  ;;  %v8398_v52 = vmul.f32 %v3573_v16, %v8325_v17  ;;  %v3574_v36 = vmul.f32 %v3510_v59, %v8364_v46  ;;  %v3420_v9 = vmul.f32 0.5, %v8153_v47 }
 0xabe   : > { %5975 = vtanh.f32 %v3735_v39  ;;  %v3869_v37 = vadd.f32 1.0, %v5960_v12  ;;  %v3684_v2 = vadd.f32 %v8289_v1, %v8207_v50  ;;  %v3744_v63 = vmul.f32 0.7978846, %v3680_v10 }
 0xabf   : > { %5977 = vtanh.f32 %v3739_v60  ;;  %v8405_v53 = vmul.f32 %v3572_v28, %v8348_v45  ;;  %v3418_v3 = vmul.f32 0.5, %v8134_v35  ;;  %v3421_v0 = vmul.f32 0.5, %v8100_v26 }
 0xac0   : > { %v3682_v16 = vadd.f32 %v8276_v14, %v8191_v30  ;;  %v3865_v24 = vadd.f32 1.0, %v8310_v61  ;;  %v3748_v47 = vmul.f32 0.7978846, %v3684_v2  ;;  %5979 = vtanh.f32 %v3744_v63 }
 0xac1   : > { %v3686_v12 = vadd.f32 %v8313_v13, %v8229_v5  ;;  %v3422_v1 = vmul.f32 0.5, %v8160_v21  ;;  %v3417_v34 = vmul.f32 0.5, %v8090_v54  ;;  %v3679_v35 = vadd.f32 %v8246_v43, %v8168_v56 }
 0xac2   : > { %v3746_v59 = vmul.f32 0.7978846, %v3682_v16  ;;  %v8418_v32 = vmul.f32 %v3869_v37, %v3421_v0  ;;  %5981 = vtanh.f32 %v3748_v47  ;;  %v3683_v14 = vadd.f32 %v8283_v6, %v8199_v40 }
 0xac3   : > { %v3750_v26 = vmul.f32 0.7978846, %v3686_v12  ;;  %v8423_v61 = vmul.f32 %v3574_v36, %v8364_v46  ;;  %v3415_v13 = vmul.f32 0.5, %v8117_v62  ;;  %v3743_v21 = vmul.f32 0.7978846, %v3679_v35 }
 0xac4   : > { %5983 = vtanh.f32 %v3746_v59  ;;  %v3419_v54 = vmul.f32 0.5, %v8138_v42  ;;  %v8427_v8 = vmul.f32 %v3865_v24, %v3417_v34  ;;  %v3747_v43 = vmul.f32 0.7978846, %v3683_v14 }
 0xac5   : > { %5985 = vtanh.f32 %v3750_v26  ;;  %v5966_v39 = vpop.eup %5965  ;;  %v3424_v60 = vmul.f32 0.5, %v8187_v44  ;;  %v8431_v28 = vmul.f32 0.5, %v8207_v50  ;;  %v3688_v6 = vadd.f32 %v8328_v58, %v8251_v7 }
 0xac6   : > { %5987 = vtanh.f32 %v3743_v21  ;;  %v5968_v10 = vpop.eup %5967  ;;  %v3864_v62 = vadd.f32 1.0, %v5966_v39  ;;  %v3977_v36 = vpack.c.bf16 %v8418_v32, %v8427_v8  ;;  %v8438_v42 = vmul.f32 0.5, %v8191_v30  ;;  %v8946_v39 = vld [vmem:[#allocation44_spill] sm:$0xff] }
 0xac7   : > { %5989 = vtanh.f32 %v3747_v43  ;;  %v8440_v37 = vpop.eup %5969  ;;  %v3868_v2 = vadd.f32 1.0, %v5968_v10  ;;  %v8443_v44 = vmul.f32 0.5, %v8229_v5  ;;  %v3692_v50 = vadd.f32 %v8344_v41, %v8265_v51 }
 0xac8   : > { %v3752_v63 = vmul.f32 0.7978846, %v3688_v6  ;;  %v3928_v0 = vmul.f32 %v3864_v62, %v3416_v49  ;;  %v8448_v16 = vmul.f32 0.5, %v8168_v56  ;;  %v8451_v24 = vmul.f32 0.5, %v8199_v40 }
 0xac9   : > { %v5972_v58 = vpop.eup %5971  ;;  %v3687_v30 = vadd.f32 %v8321_v22, %v8240_v15  ;;  %v3932_v12 = vmul.f32 %v3868_v2, %v3420_v9  ;;  %v3756_v5 = vmul.f32 0.7978846, %v3692_v50  ;;  %v3877_v41 = vadd.f32 1.0, %v5964_v23 }
 0xaca   : > { %v5974_v47 = vpop.eup %5973  ;;  %v3866_v34 = vadd.f32 1.0, %v5972_v58  ;;  %5991 = vtanh.f32 %v3752_v63  ;;  %v3691_v49 = vadd.f32 %v8337_v48, %v8259_v55  ;;  %v3429_v6 = vmul.f32 0.5, %v8946_v39 }
 0xacb   : > { %v5976_v59 = vpop.eup %5975  ;;  %v3870_v35 = vadd.f32 1.0, %v5974_v47  ;;  %v3751_v32 = vmul.f32 0.7978846, %v3687_v30  ;;  %v3976_v26 = vpack.c.bf16 %v3932_v12, %v3928_v0  ;;  %5993 = vtanh.f32 %v3756_v5 }
 0xacc   : > { %v5978_v56 = vpop.eup %5977  ;;  %v3930_v14 = vmul.f32 %v3866_v34, %v3418_v3  ;;  %v3863_v40 = vadd.f32 1.0, %v5976_v59  ;;  %v3755_v22 = vmul.f32 0.7978846, %v3691_v49  ;;  %v3696_v23 = vadd.f32 %v8385_v19, %v8302_v27 }
 0xacd   : > { %v3934_v21 = vmul.f32 %v3870_v35, %v3422_v1  ;;  %v3867_v8 = vadd.f32 1.0, %v5978_v56  ;;  %5995 = vtanh.f32 %v3751_v32  ;;  %v5980_v9 = vpop.eup %5979  ;;  %4318 = vmatprep.mubr.bf16.mxu1 %v3976_v26  ;;  %v3700_v48 = vadd.f32 %v8405_v53, %v8348_v45  ;;  %v8947_v1 = vld [vmem:[#allocation45_spill] sm:$0xff] }
 0xace   : > { %v3927_v43 = vmul.f32 %v3863_v40, %v3415_v13  ;;  %v3872_v3 = vadd.f32 1.0, %v5980_v9  ;;  %5997 = vtanh.f32 %v3755_v22  ;;  %v3425_v50 = vmul.f32 0.5, %v8947_v1 }
 0xacf   : > { %v3978_v10 = vpack.c.bf16 %v3934_v21, %v3930_v14  ;;  %v3931_v62 = vmul.f32 %v3867_v8, %v3419_v54  ;;  %v5982_v2 = vpop.eup %5981  ;;  %v3873_v63 = vadd.f32 1.0, %v8378_v31  ;;  %v3760_v58 = vmul.f32 0.7978846, %v3696_v23  ;;  %v8949_v21 = vld [vmem:[#allocation23_spill] sm:$0xff]  ;;  %v8950_v8 = vld [vmem:[#allocation24_spill] sm:$0xff] }
 0xad0   : > { %v3764_v0 = vmul.f32 0.7978846, %v3700_v48  ;;  %v3876_v47 = vadd.f32 1.0, %v5982_v2  ;;  %v3941_v12 = vmul.f32 %v3877_v41, %v3429_v6  ;;  %v3695_v19 = vadd.f32 %v8359_v18, %v8280_v57 }
 0xad1   : > { %v5984_v13 = vpop.eup %5983  ;;  %4415 = vmatprep.mubr.bf16.mxu0 %v3978_v10  ;;  %v3975_v30 = vpack.c.bf16 %v3931_v62, %v3927_v43  ;;  %v3936_v54 = vmul.f32 %v3872_v3, %v3424_v60  ;;  %5999 = vtanh.f32 %v3760_v58  ;;  %v3699_v5 = vadd.f32 %v8392_v29, %v8318_v4  ;;  %v8951_v62 = vld [vmem:[#allocation48_spill] sm:$0xff] }
 0xad2   : > { %v5986_v53 = vpop.eup %5985  ;;  %4416 = vmatmul.mubr.bf16.gmra.mxu0 %v3977_v36  ;;  %v3874_v34 = vadd.f32 1.0, %v5984_v13  ;;  %v3940_v31 = vmul.f32 %v3876_v47, %v8431_v28  ;;  %6001 = vtanh.f32 %v3764_v0  ;;  %v3759_v49 = vmul.f32 0.7978846, %v3695_v19  ;;  %v8948_v28 = vld [vmem:[#allocation49_spill] sm:$0xff] }
 0xad3   : > { %v5988_v59 = vpop.eup %5987  ;;  %4319 = vmatmul.mubr.bf16.gmra.mxu1 %v3975_v30  ;;  %v3878_v35 = vadd.f32 1.0, %v5986_v53  ;;  %v3937_v18 = vmul.f32 %v3873_v63, %v3425_v50  ;;  %v3763_v26 = vmul.f32 0.7978846, %v3699_v5  ;;  %v3701_v29 = vadd.f32 %v8398_v52, %v8325_v17 }
 0xad4   : > { %v5990_v32 = vpop.eup %5989  ;;  %v3938_v41 = vmul.f32 %v3874_v34, %v8438_v42  ;;  %v3871_v56 = vadd.f32 1.0, %v5988_v59  ;;  %v3980_v36 = vpack.c.bf16 %v3940_v31, %v3936_v54  ;;  %6003 = vtanh.f32 %v3759_v49 }
 0xad5   : > { %v3942_v60 = vmul.f32 %v3878_v35, %v8443_v44  ;;  %v3875_v14 = vadd.f32 1.0, %v5990_v32  ;;  %6005 = vtanh.f32 %v3763_v26  ;;  %v3690_v40 = vadd.f32 %v8948_v28, %v8256_v33 }
 0xad6   : > { %v3694_v22 = vadd.f32 %v8950_v8, %v8949_v21  ;;  %4326 = vmatprep.mubr.bf16.mxu1 %v3980_v36  ;;  %v3935_v43 = vmul.f32 %v3871_v56, %v8448_v16  ;;  %v3981_v44 = vpack.c.bf16 %v3941_v12, %v3937_v18  ;;  %v3698_v52 = vadd.f32 %v8388_v25, %v8308_v11 }
 0xad7   : > { %v5992_v9 = vpop.eup %5991  ;;  %v3982_v42 = vpack.c.bf16 %v3942_v60, %v3938_v41  ;;  %v3939_v39 = vmul.f32 %v3875_v14, %v8451_v24  ;;  %v3754_v23 = vmul.f32 0.7978846, %v3690_v40  ;;  %6007 = vtanh.f32 %v8951_v62 }
 0xad8   : > { %v3880_v6 = vadd.f32 1.0, %v5992_v9  ;;  %v3758_v48 = vmul.f32 0.7978846, %v3694_v22  ;;  %v5994_v10 = vpop.eup %5993  ;;  %v3432_v2 = vmul.f32 0.5, %v8251_v7  ;;  %v3702_v1 = vadd.f32 %v8423_v61, %v8364_v46 }
 0xad9   : > { %4423 = vmatprep.mubr.bf16.mxu0 %v3982_v42  ;;  %v3979_v3 = vpack.c.bf16 %v3939_v39, %v3935_v43  ;;  %v3436_v24 = vmul.f32 0.5, %v8265_v51  ;;  %v3884_v50 = vadd.f32 1.0, %v5994_v10  ;;  %6009 = vtanh.f32 %v3754_v23 }
 0xada   : > { %v5996_v16 = vpop.eup %5995  ;;  %4424 = vmatmul.mubr.bf16.gmra.mxu0 %v3981_v44  ;;  %v3762_v63 = vmul.f32 0.7978846, %v3698_v52  ;;  %v3697_v25 = vadd.f32 %v8382_v38, %v8299_v20  ;;  %6011 = vtanh.f32 %v3758_v48  ;;  %v3766_v0 = vmul.f32 0.7978846, %v3702_v1 }
 0xadb   : > { %4327 = vmatmul.mubr.bf16.gmra.mxu1 %v3979_v3  ;;  %v3879_v58 = vadd.f32 1.0, %v5996_v16  ;;  %v5998_v13 = vpop.eup %5997  ;;  %v3765_v30 = vmul.f32 0.7978846, %v3701_v29  ;;  %v3944_v7 = vmul.f32 %v3880_v6, %v3432_v2  ;;  %v3948_v47 = vmul.f32 %v3884_v50, %v3436_v24  ;;  %v8952_v6 = vld [vmem:[#allocation21_spill] sm:$0xff]  ;;  %v8953_v2 = vld [vmem:[#allocation46_spill] sm:$0xff] }
 0xadc   : > { %6013 = vtanh.f32 %v3762_v63  ;;  %v3431_v61 = vmul.f32 0.5, %v8240_v15  ;;  %v3435_v12 = vmul.f32 0.5, %v8259_v55  ;;  %v3883_v51 = vadd.f32 1.0, %v5998_v13 }
 0xadd   : > { %6015 = vtanh.f32 %v3766_v0  ;;  %v3984_v19 = vpack.c.bf16 %v3948_v47, %v3944_v7  ;;  %v3761_v54 = vmul.f32 0.7978846, %v3697_v25  ;;  %v3440_v35 = vmul.f32 0.5, %v8302_v27 }
 0xade   : > { %v6000_v53 = vpop.eup %5999  ;;  %v3943_v34 = vmul.f32 %v3879_v58, %v3431_v61  ;;  %v3947_v38 = vmul.f32 %v3883_v51, %v3435_v12  ;;  %6017 = vtanh.f32 %v3765_v30  ;;  %v3444_v49 = vmul.f32 0.5, %v8348_v45  ;;  %v8508_v51 = vld [vmem:[%s761_s29] ss:$0 sm:$0xff] }
 0xadf   : > { %v6002_v5 = vpop.eup %6001  ;;  %4334 = vmatprep.mubr.bf16.mxu1 %v3984_v19  ;;  %v3888_v59 = vadd.f32 1.0, %v6000_v53  ;;  %6019 = vtanh.f32 %v3761_v54  ;;  %v3443_v26 = vmul.f32 0.5, %v8318_v4  ;;  %v3439_v14 = vmul.f32 0.5, %v8280_v57 }
 0xae0   : > { %v3983_v31 = vpack.c.bf16 %v3947_v38, %v3943_v34  ;;  %v3892_v32 = vadd.f32 1.0, %v6002_v5  ;;  %v3885_v8 = vadd.f32 1.0, %v8440_v37  ;;  %v3434_v43 = vmul.f32 0.5, %v8256_v33 }
 0xae1   : > { %v6004_v15 = vpop.eup %6003  ;;  %v3952_v55 = vmul.f32 %v3888_v59, %v3440_v35  ;;  %v3438_v39 = vmul.f32 0.5, %v8949_v21  ;;  %v3437_v23 = vmul.f32 0.5, %v8952_v6  ;;  %v3446_v62 = vmul.f32 0.5, %v8364_v46  ;;  %v8956_v6 = vld [vmem:[#allocation13_spill] sm:$0xff] }
 0xae2   : > { %v6006_v41 = vpop.eup %6005  ;;  %v3956_v56 = vmul.f32 %v3892_v32, %v3444_v49  ;;  %v3887_v18 = vadd.f32 1.0, %v6004_v15  ;;  %v3433_v1 = vmul.f32 0.5, %v8953_v2  ;;  %v3442_v33 = vmul.f32 0.5, %v8308_v11 }
 0xae3   : > { %4335 = vmatmul.mubr.bf16.gmra.mxu1 %v3983_v31  ;;  %v3891_v36 = vadd.f32 1.0, %v6006_v41  ;;  %v3949_v16 = vmul.f32 %v3885_v8, %v3437_v23  ;;  %v3445_v46 = vmul.f32 0.5, %v8325_v17  ;;  %v3441_v7 = vmul.f32 0.5, %v8299_v20 }
 0xae4   : > { %v3988_v60 = vpack.c.bf16 %v3956_v56, %v3952_v55  ;;  %v6008_v29 = vpop.eup %6007  ;;  %v3951_v27 = vmul.f32 %v3887_v18, %v3439_v14  ;;  %v8954_v55 = vld [vmem:[#allocation10_spill] sm:$0xff] }
 0xae5   : > { %v3955_v28 = vmul.f32 %v3891_v36, %v3443_v26  ;;  %v3881_v57 = vadd.f32 1.0, %v6008_v29 }
 0xae6   : > { %v6010_v40 = vpop.eup %6009  ;;  %4342 = vmatprep.mubr.bf16.mxu1 %v3988_v60 }
 0xae7   : > { %v6012_v45 = vpop.eup %6011  ;;  %v3882_v22 = vadd.f32 1.0, %v6010_v40  ;;  %v3987_v42 = vpack.c.bf16 %v3955_v28, %v3951_v27  ;;  %v3945_v50 = vmul.f32 %v3881_v57, %v3433_v1  ;;  %v8955_v27 = vld [vmem:[#allocation11_spill] sm:$0xff]  ;;  %v8957_v1 = vld [vmem:[#allocation12_spill] sm:$0xff] }
 0xae8   : > { %v3886_v4 = vadd.f32 1.0, %v6012_v45 }
 0xae9   : > { %v6014_v9 = vpop.eup %6013  ;;  %v3946_v48 = vmul.f32 %v3882_v22, %v3434_v43  ;;  %v3985_v58 = vpack.c.bf16 %v3949_v16, %v3945_v50 }
 0xaea   : > { %v6016_v44 = vpop.eup %6015  ;;  %v3950_v52 = vmul.f32 %v3886_v4, %v3438_v39  ;;  %v3890_v3 = vadd.f32 1.0, %v6014_v9 }
 0xaeb   : > { %4343 = vmatmul.mubr.bf16.gmra.mxu1 %v3987_v42  ;;  %v3894_v10 = vadd.f32 1.0, %v6016_v44  ;;  %v6018_v37 = vpop.eup %6017 }
 0xaec   : > { %v3986_v24 = vpack.c.bf16 %v3950_v52, %v3946_v48  ;;  %v6020_v63 = vpop.eup %6019  ;;  %v3954_v25 = vmul.f32 %v3890_v3, %v3442_v33  ;;  %v3893_v0 = vadd.f32 1.0, %v6018_v37 }
 0xaed   : > { %v3958_v21 = vmul.f32 %v3894_v10, %v3446_v62  ;;  %v3889_v30 = vadd.f32 1.0, %v6020_v63 }
 0xaee   : > { %4431 = vmatprep.mubr.bf16.mxu1 %v3986_v24  ;;  %v3957_v47 = vmul.f32 %v3893_v0, %v3445_v46  ;;  %v8958_v0 = vld [vmem:[#allocation15_spill] sm:$0xff] }
 0xaef   : > { %v3990_v13 = vpack.c.bf16 %v3958_v21, %v3954_v25  ;;  %v3953_v61 = vmul.f32 %v3889_v30, %v3441_v7  ;;  %v8959_v7 = vld [vmem:[#allocation14_spill] sm:$0xff] }
 0xaf1   : > { %v3989_v12 = vpack.c.bf16 %v3957_v47, %v3953_v61 }
 0xaf3   : > { %4432 = vmatmul.mubr.bf16.vlgmr.msra.gmra.mxu1 %v3985_v58 }
 0xaf4   : > { %4439 = vmatprep.mubr.bf16.mxu1 %v3990_v13 }
 0xafb   : > { %4440 = vmatmul.mubr.bf16.gmra.mxu1 %v3989_v12 }
 0xb40   : > { %v5161_v11 = vpop.f32.mrf.mxu1 }
 0xb42   : > { %v5162_v19 = vpop.f32.mrf.mxu1 }
 0xb43   : > { %v5163_v54 = vadd.f32 %v5162_v19, %v5161_v11 }
 0xb44   : > { %v5225_v53 = vpop.f32.mrf.mxu0  ;;  %v5164_v34 = vpop.f32.mrf.mxu1 }
 0xb45   : > { %v4289_v17 = vadd.f32 %v5163_v54, %v8508_v51 }
 0xb46   : > { %v5226_v38 = vpop.f32.mrf.mxu0  ;;  %v5165_v20 = vpop.f32.mrf.mxu1 }
 0xb47   : > { %v5227_v5 = vadd.f32 %v5226_v38, %v5225_v53  ;;  %v5166_v31 = vadd.f32 %v5165_v20, %v5164_v34 }
 0xb48   : > { %v5228_v59 = vpop.f32.mrf.mxu0 }
 0xb49   : > { %v4386_v35 = vadd.f32 %v5227_v5, %v4289_v17  ;;  %v4292_v49 = vadd.f32 %v5166_v31, %v8508_v51 }
 0xb4a   : > { %v5229_v32 = vpop.f32.mrf.mxu0  ;;  %v5167_v15 = vpop.f32.mrf.mxu1 }
 0xb4b   : > { %v5230_v41 = vadd.f32 %v5229_v32, %v5228_v59  ;;  %v8513_v56 = vadd.f32 %v4386_v35, %v8954_v55 }
 0xb4c   : > { %v5231_v18 = vpop.f32.mrf.mxu0  ;;  %v5168_v26 = vpop.f32.mrf.mxu1 }
 0xb4d   : > { %v4389_v36 = vadd.f32 %v5230_v41, %v4292_v49  ;;  %v5169_v60 = vadd.f32 %v5168_v26, %v5167_v15  ;;  %4466 = vadd.xlane.f32.xlu0 %v8513_v56  ;;  %v8960_v49 = vld [vmem:[#allocation17_spill] sm:$0xff]  ;;  %v8961_v41 = vld [vmem:[#allocation16_spill] sm:$0xff] }
 0xb4e   : > { %v5232_v14 = vpop.f32.mrf.mxu0  ;;  %v5170_v29 = vpop.f32.mrf.mxu1 }
 0xb4f   : > { %v4297_v28 = vadd.f32 %v5169_v60, %v8508_v51  ;;  %v5233_v40 = vadd.f32 %v5232_v14, %v5231_v18  ;;  %v8518_v45 = vadd.f32 %v4389_v36, %v8955_v27 }
 0xb50   : > { %v5234_v8 = vpop.f32.mrf.mxu0  ;;  %v5171_v22 = vpop.f32.mrf.mxu1 }
 0xb51   : > { %v4394_v9 = vadd.f32 %v5233_v40, %v4297_v28  ;;  %v5172_v42 = vadd.f32 %v5171_v22, %v5170_v29  ;;  %4468 = vadd.xlane.f32.xlu1 %v8518_v45 }
 0xb52   : > { %v5235_v43 = vpop.f32.mrf.mxu0 }
 0xb53   : > { %v4300_v4 = vadd.f32 %v5172_v42, %v8508_v51  ;;  %v5236_v44 = vadd.f32 %v5235_v43, %v5234_v8  ;;  %v8523_v23 = vadd.f32 %v4394_v9, %v8956_v6 }
 0xb54   : > { %v5173_v39 = vpop.f32.mrf.mxu1  ;;  %v5237_v57 = vpop.f32.mrf.mxu0 }
 0xb55   : > { %v4397_v52 = vadd.f32 %v5236_v44, %v4300_v4  ;;  %4470 = vadd.xlane.f32.xlu0 %v8523_v23 }
 0xb56   : > { %v5174_v48 = vpop.f32.mrf.mxu1  ;;  %v5238_v62 = vpop.f32.mrf.mxu0 }
 0xb57   : > { %v5175_v10 = vadd.f32 %v5174_v48, %v5173_v39  ;;  %v5239_v2 = vadd.f32 %v5238_v62, %v5237_v57  ;;  %v8528_v16 = vadd.f32 %v4397_v52, %v8957_v1  ;;  %v8962_v57 = vld [vmem:[#allocation18_spill] sm:$0xff] }
 0xb58   : > { %v5176_v3 = vpop.f32.mrf.mxu1  ;;  %v5240_v24 = vpop.f32.mrf.mxu0 }
 0xb59   : > { %v4305_v37 = vadd.f32 %v5175_v10, %v8508_v51  ;;  %4472 = vadd.xlane.f32.xlu1 %v8528_v16 }
 0xb5a   : > { %v5177_v33 = vpop.f32.mrf.mxu1  ;;  %v5241_v63 = vpop.f32.mrf.mxu0 }
 0xb5b   : > { %v4402_v21 = vadd.f32 %v5239_v2, %v4305_v37  ;;  %v5178_v50 = vadd.f32 %v5177_v33, %v5176_v3  ;;  %v5242_v58 = vadd.f32 %v5241_v63, %v5240_v24  ;;  %v8963_v24 = vld [vmem:[#allocation19_spill] sm:$0xff] }
 0xb5d   : > { %v4308_v25 = vadd.f32 %v5178_v50, %v8508_v51  ;;  %v8533_v13 = vadd.f32 %v4402_v21, %v8958_v0 }
 0xb5f   : > { %v4405_v46 = vadd.f32 %v5242_v58, %v4308_v25  ;;  %4474 = vadd.xlane.f32.xlu0 %v8533_v13  ;;  %v5243_v30 = vpop.f32.mrf.mxu0 }
 0xb60   : > { %v5179_v61 = vpop.f32.mrf.mxu1 }
 0xb61   : > { %v8537_v47 = vadd.f32 %v4405_v46, %v8959_v7  ;;  %v5244_v12 = vpop.f32.mrf.mxu0 }
 0xb62   : > { %v5180_v11 = vpop.f32.mrf.mxu1  ;;  %v5245_v17 = vadd.f32 %v5244_v12, %v5243_v30  ;;  %v8964_v30 = vld [vmem:[#allocation22_spill] sm:$0xff] }
 0xb63   : > { %4476 = vadd.xlane.f32.xlu1 %v8537_v47  ;;  %v5181_v19 = vadd.f32 %v5180_v11, %v5179_v61  ;;  %v5246_v53 = vpop.f32.mrf.mxu0 }
 0xb64   : > { %v5182_v54 = vpop.f32.mrf.mxu1 }
 0xb65   : > { %v4313_v34 = vadd.f32 %v5181_v19, %v8508_v51  ;;  %v5247_v5 = vpop.f32.mrf.mxu0  ;;  %v8965_v19 = vld [vmem:[#allocation20_spill] sm:$0xff] }
 0xb66   : > { %v5183_v38 = vpop.f32.mrf.mxu1  ;;  %v5248_v35 = vadd.f32 %v5247_v5, %v5246_v53 }
 0xb67   : > { %v4410_v20 = vadd.f32 %v5245_v17, %v4313_v34  ;;  %v5184_v59 = vadd.f32 %v5183_v38, %v5182_v54 }
 0xb69   : > { %v4316_v31 = vadd.f32 %v5184_v59, %v8508_v51  ;;  %v8543_v32 = vadd.f32 %v4410_v20, %v8960_v49 }
 0xb6b   : > { %v4413_v15 = vadd.f32 %v5248_v35, %v4316_v31  ;;  %4478 = vadd.xlane.f32.xlu0 %v8543_v32 }
 0xb6d   : > { %v8547_v55 = vadd.f32 %v4413_v15, %v8961_v41 }
 0xb6f   : > { %4480 = vadd.xlane.f32.xlu1 %v8547_v55 }
 0xb92   : > { %v5249_v18 = vpop.f32.mrf.mxu0 }
 0xb93   : > { %v5185_v26 = vpop.f32.mrf.mxu1 }
 0xb94   : > { %v5250_v36 = vpop.f32.mrf.mxu0 }
 0xb95   : > { %v5186_v60 = vpop.f32.mrf.mxu1  ;;  %v5251_v27 = vadd.f32 %v5250_v36, %v5249_v18 }
 0xb96   : > { %v5187_v14 = vadd.f32 %v5186_v60, %v5185_v26  ;;  %v5252_v29 = vpop.f32.mrf.mxu0 }
 0xb97   : > { %v5188_v28 = vpop.f32.mrf.mxu1 }
 0xb98   : > { %v4321_v40 = vadd.f32 %v5187_v14, %v8508_v51  ;;  %v5253_v8 = vpop.f32.mrf.mxu0 }
 0xb99   : > { %v5189_v22 = vpop.f32.mrf.mxu1  ;;  %v5254_v44 = vadd.f32 %v5253_v8, %v5252_v29  ;;  %v8966_v29 = vld [vmem:[#allocation28_spill] sm:$0xff] }
 0xb9a   : > { %v4418_v9 = vadd.f32 %v5251_v27, %v4321_v40  ;;  %v5190_v42 = vadd.f32 %v5189_v22, %v5188_v28  ;;  %v5255_v43 = vpop.f32.mrf.mxu0 }
 0xb9b   : > { %v5191_v39 = vpop.f32.mrf.mxu1 }
 0xb9c   : > { %v4324_v4 = vadd.f32 %v5190_v42, %v8508_v51  ;;  %v5256_v6 = vpop.f32.mrf.mxu0  ;;  %v8553_v48 = vadd.f32 %v4418_v9, %v8962_v57 }
 0xb9d   : > { %v5192_v52 = vpop.f32.mrf.mxu1  ;;  %v5257_v1 = vadd.f32 %v5256_v6, %v5255_v43  ;;  %v8967_v43 = vld [vmem:[#allocation25_spill] sm:$0xff] }
 0xb9e   : > { %v4421_v10 = vadd.f32 %v5254_v44, %v4324_v4  ;;  %v5193_v62 = vadd.f32 %v5192_v52, %v5191_v39  ;;  %4482 = vadd.xlane.f32.xlu0 %v8553_v48  ;;  %v5258_v3 = vpop.f32.mrf.mxu0 }
 0xb9f   : > { %v5194_v37 = vpop.f32.mrf.mxu1 }
 0xba0   : > { %v4329_v2 = vadd.f32 %v5193_v62, %v8508_v51  ;;  %v8558_v33 = vadd.f32 %v4421_v10, %v8963_v24  ;;  %v5259_v50 = vpop.f32.mrf.mxu0  ;;  %v8968_v10 = vld [vmem:[#allocation32_spill] sm:$0xff] }
 0xba1   : > { %v5195_v21 = vpop.f32.mrf.mxu1  ;;  %v5260_v46 = vadd.f32 %v5259_v50, %v5258_v3 }
 0xba2   : > { %v4426_v63 = vadd.f32 %v5257_v1, %v4329_v2  ;;  %v5196_v25 = vadd.f32 %v5195_v21, %v5194_v37  ;;  %4484 = vadd.xlane.f32.xlu1 %v8558_v33  ;;  %v8969_v37 = vld [vmem:[#allocation31_spill] sm:$0xff] }
 0xba3   : > { %v5197_v58 = vpop.f32.mrf.mxu1 }
 0xba4   : > { %v4332_v0 = vadd.f32 %v5196_v25, %v8508_v51  ;;  %v8563_v7 = vadd.f32 %v4426_v63, %v8964_v30 }
 0xba5   : > { %v5198_v61 = vpop.f32.mrf.mxu1 }
 0xba6   : > { %v4429_v12 = vadd.f32 %v5260_v46, %v4332_v0  ;;  %4486 = vadd.xlane.f32.xlu0 %v8563_v7  ;;  %v5199_v20 = vadd.f32 %v5198_v61, %v5197_v58 }
 0xba7   : > { %v5200_v11 = vpop.f32.mrf.mxu1 }
 0xba8   : > { %v8567_v53 = vadd.f32 %v4429_v12, %v8965_v19  ;;  %v4337_v35 = vadd.f32 %v5199_v20, %v8508_v51 }
 0xba9   : > { %v5201_v54 = vpop.f32.mrf.mxu1 }
 0xbaa   : > { %4488 = vadd.xlane.f32.xlu1 %v8567_v53  ;;  %v5202_v49 = vadd.f32 %v5201_v54, %v5200_v11 }
 0xbab   : > { %v5203_v34 = vpop.f32.mrf.mxu1 }
 0xbac   : > { %v4340_v36 = vadd.f32 %v5202_v49, %v8508_v51 }
 0xbad   : > { %v5204_v17 = vpop.f32.mrf.mxu1 }
 0xbae   : > { %v5205_v60 = vadd.f32 %v5204_v17, %v5203_v34 }
 0xbaf   : > { %v5206_v38 = vpop.f32.mrf.mxu1 }
 0xbb0   : > { %v4345_v22 = vadd.f32 %v5205_v60, %v8508_v51 }
 0xbb1   : > { %v5207_v5 = vpop.f32.mrf.mxu1 }
 0xbb2   : > { %v5208_v9 = vadd.f32 %v5207_v5, %v5206_v38 }
 0xbb3   : > { %v5261_v59 = vpop.f32.mrf.mxu1 }
 0xbb4   : > { %v4348_v57 = vadd.f32 %v5208_v9, %v8508_v51 }
 0xbb5   : > { %v5262_v31 = vpop.f32.mrf.mxu1 }
 0xbb6   : > { %v5263_v15 = vadd.f32 %v5262_v31, %v5261_v59 }
 0xbb7   : > { %v5264_v41 = vpop.f32.mrf.mxu1 }
 0xbb8   : > { %v4434_v18 = vadd.f32 %v5263_v15, %v4337_v35 }
 0xbb9   : > { %v5265_v26 = vpop.f32.mrf.mxu1 }
 0xbba   : > { %v5266_v14 = vadd.f32 %v5265_v26, %v5264_v41  ;;  %v8573_v28 = vadd.f32 %v4434_v18, %v8966_v29 }
 0xbbb   : > { %v5267_v40 = vpop.f32.mrf.mxu1 }
 0xbbc   : > { %v4437_v27 = vadd.f32 %v5266_v14, %v4340_v36  ;;  %4490 = vadd.xlane.f32.xlu0 %v8573_v28 }
 0xbbd   : > { %v5268_v8 = vpop.f32.mrf.mxu1 }
 0xbbe   : > { %v5269_v42 = vadd.f32 %v5268_v8, %v5267_v40  ;;  %v8578_v39 = vadd.f32 %v4437_v27, %v8967_v43 }
 0xbbf   : > { %v5270_v4 = vpop.f32.mrf.mxu1 }
 0xbc0   : > { %v4442_v44 = vadd.f32 %v5269_v42, %v4345_v22  ;;  %4492 = vadd.xlane.f32.xlu1 %v8578_v39 }
 0xbc1   : > { %v5271_v6 = vpop.f32.mrf.mxu1 }
 0xbc2   : > { %v5272_v52 = vadd.f32 %v5271_v6, %v5270_v4  ;;  %v8583_v62 = vadd.f32 %v4442_v44, %v8968_v10 }
 0xbc4   : > { %v4445_v3 = vadd.f32 %v5272_v52, %v4348_v57  ;;  %4494 = vadd.xlane.f32.xlu0 %v8583_v62 }
 0xbc6   : > { %v8587_v2 = vadd.f32 %v4445_v3, %v8969_v37 }
 0xbc8   : > { %4496 = vadd.xlane.f32.xlu1 %v8587_v2 }
 0xbd6   : > { %v4467_v1 = vpop.xlane.xlu0 %4466 }
 0xbd7   : > { %v4498_v24 = vmul.f32 0.0078125, %v4467_v1 }
 0xbd9   : > { %v8591_v21 = vsub.f32 %v8513_v56, %v4498_v24 }
 0xbda   : > { %v4469_v50 = vpop.xlane.xlu1 %4468 }
 0xbdb   : > { %v4499_v63 = vmul.f32 0.0078125, %v4469_v50  ;;  %v4530_v51 = vmul.f32 %v8591_v21, %v8591_v21 }
 0xbdd   : > { %v8596_v25 = vsub.f32 %v8518_v45, %v4499_v63  ;;  %4546 = vadd.xlane.f32.xlu0 %v4530_v51 }
 0xbde   : > { %v4471_v58 = vpop.xlane.xlu0 %4470 }
 0xbdf   : > { %v4500_v0 = vmul.f32 0.0078125, %v4471_v58  ;;  %v4531_v46 = vmul.f32 %v8596_v25, %v8596_v25 }
 0xbe1   : > { %v8601_v30 = vsub.f32 %v8523_v23, %v4500_v0  ;;  %4548 = vadd.xlane.f32.xlu1 %v4531_v46 }
 0xbe2   : > { %v4473_v56 = vpop.xlane.xlu1 %4472 }
 0xbe3   : > { %v4501_v61 = vmul.f32 0.0078125, %v4473_v56  ;;  %v4532_v12 = vmul.f32 %v8601_v30, %v8601_v30 }
 0xbe5   : > { %v8606_v11 = vsub.f32 %v8528_v16, %v4501_v61  ;;  %4550 = vadd.xlane.f32.xlu0 %v4532_v12 }
 0xbe7   : > { %v4533_v54 = vmul.f32 %v8606_v11, %v8606_v11 }
 0xbe8   : > { %v4475_v45 = vpop.xlane.xlu0 %4474 }
 0xbe9   : > { %v4502_v19 = vmul.f32 0.0078125, %v4475_v45  ;;  %4552 = vadd.xlane.f32.xlu1 %v4533_v54 }
 0xbeb   : > { %v8611_v34 = vsub.f32 %v8533_v13, %v4502_v19 }
 0xbec   : > { %v4477_v23 = vpop.xlane.xlu1 %4476 }
 0xbed   : > { %v4503_v17 = vmul.f32 0.0078125, %v4477_v23  ;;  %v4534_v38 = vmul.f32 %v8611_v34, %v8611_v34 }
 0xbef   : > { %v8616_v5 = vsub.f32 %v8537_v47, %v4503_v17  ;;  %4554 = vadd.xlane.f32.xlu0 %v4534_v38  ;;  %v8675_v17 = vld [vmem:[%s764_s7] ss:$0 sm:$0xff] }
 0xbf1   : > { %v4535_v16 = vmul.f32 %v8616_v5, %v8616_v5 }
 0xbf3   : > { %4556 = vadd.xlane.f32.xlu1 %v4535_v16 }
 0xbf4   : > { %v4479_v20 = vpop.xlane.xlu0 %4478 }
 0xbf5   : > { %v4504_v59 = vmul.f32 0.0078125, %v4479_v20  ;;  %v8683_v20 = vld [vmem:[%s767_s11] ss:$0 sm:$0xff] }
 0xbf7   : > { %v8621_v31 = vsub.f32 %v8543_v32, %v4504_v59 }
 0xbf8   : > { %v4481_v13 = vpop.xlane.xlu1 %4480 }
 0xbf9   : > { %v4505_v35 = vmul.f32 0.0078125, %v4481_v13  ;;  %v4536_v49 = vmul.f32 %v8621_v31, %v8621_v31 }
 0xbfb   : > { %v8626_v15 = vsub.f32 %v8547_v55, %v4505_v35  ;;  %4558 = vadd.xlane.f32.xlu0 %v4536_v49 }
 0xbfd   : > { %v4537_v47 = vmul.f32 %v8626_v15, %v8626_v15 }
 0xbff   : > { %4560 = vadd.xlane.f32.xlu1 %v4537_v47 }
 0xc27   : > { %v4483_v41 = vpop.xlane.xlu0 %4482 }
 0xc28   : > { %v4506_v18 = vmul.f32 0.0078125, %v4483_v41 }
 0xc2a   : > { %v8631_v26 = vsub.f32 %v8553_v48, %v4506_v18 }
 0xc2b   : > { %v4485_v32 = vpop.xlane.xlu1 %4484 }
 0xc2c   : > { %v4507_v36 = vmul.f32 0.0078125, %v4485_v32  ;;  %v4538_v60 = vmul.f32 %v8631_v26, %v8631_v26 }
 0xc2e   : > { %v8636_v14 = vsub.f32 %v8558_v33, %v4507_v36  ;;  %4562 = vadd.xlane.f32.xlu0 %v4538_v60 }
 0xc2f   : > { %v4487_v55 = vpop.xlane.xlu0 %4486 }
 0xc30   : > { %v4508_v29 = vmul.f32 0.0078125, %v4487_v55  ;;  %v4539_v40 = vmul.f32 %v8636_v14, %v8636_v14 }
 0xc32   : > { %v8641_v27 = vsub.f32 %v8563_v7, %v4508_v29  ;;  %4564 = vadd.xlane.f32.xlu1 %v4539_v40 }
 0xc33   : > { %v4489_v48 = vpop.xlane.xlu1 %4488 }
 0xc34   : > { %v4509_v8 = vmul.f32 0.0078125, %v4489_v48  ;;  %v4540_v22 = vmul.f32 %v8641_v27, %v8641_v27 }
 0xc36   : > { %v8646_v9 = vsub.f32 %v8567_v53, %v4509_v8  ;;  %4566 = vadd.xlane.f32.xlu0 %v4540_v22 }
 0xc38   : > { %v4541_v33 = vmul.f32 %v8646_v9, %v8646_v9 }
 0xc3a   : > { %4568 = vadd.xlane.f32.xlu1 %v4541_v33 }
 0xc45   : > { %v4491_v42 = vpop.xlane.xlu0 %4490 }
 0xc46   : > { %v4510_v43 = vmul.f32 0.0078125, %v4491_v42 }
 0xc48   : > { %v8651_v4 = vsub.f32 %v8573_v28, %v4510_v43 }
 0xc49   : > { %v4493_v7 = vpop.xlane.xlu1 %4492 }
 0xc4a   : > { %v4511_v44 = vmul.f32 0.0078125, %v4493_v7  ;;  %v4542_v6 = vmul.f32 %v8651_v4, %v8651_v4 }
 0xc4c   : > { %v8656_v57 = vsub.f32 %v8578_v39, %v4511_v44  ;;  %4570 = vadd.xlane.f32.xlu0 %v4542_v6 }
 0xc4d   : > { %v4495_v53 = vpop.xlane.xlu0 %4494 }
 0xc4e   : > { %v4512_v52 = vmul.f32 0.0078125, %v4495_v53  ;;  %v4543_v10 = vmul.f32 %v8656_v57, %v8656_v57 }
 0xc50   : > { %v8661_v3 = vsub.f32 %v8583_v62, %v4512_v52  ;;  %4572 = vadd.xlane.f32.xlu1 %v4543_v10 }
 0xc51   : > { %v4497_v28 = vpop.xlane.xlu1 %4496 }
 0xc52   : > { %v4513_v37 = vmul.f32 0.0078125, %v4497_v28  ;;  %v4544_v1 = vmul.f32 %v8661_v3, %v8661_v3 }
 0xc54   : > { %v8666_v24 = vsub.f32 %v8587_v2, %v4513_v37  ;;  %4574 = vadd.xlane.f32.xlu0 %v4544_v1 }
 0xc56   : > { %v4545_v39 = vmul.f32 %v8666_v24, %v8666_v24 }
 0xc58   : > { %4576 = vadd.xlane.f32.xlu1 %v4545_v39 }
 0xc66   : > { %v4547_v50 = vpop.xlane.xlu0 %4546 }
 0xc67   : > { %v4578_v63 = vmul.f32 0.0078125, %v4547_v50 }
 0xc69   : > { %v4594_v51 = vadd.f32 1e-12, %v4578_v63 }
 0xc6a   : > { %v4549_v58 = vpop.xlane.xlu1 %4548 }
 0xc6b   : > { %6021 = vrsqrt.f32 %v4594_v51  ;;  %v4579_v62 = vmul.f32 0.0078125, %v4549_v58 }
 0xc6d   : > { %v4595_v0 = vadd.f32 1e-12, %v4579_v62 }
 0xc6e   : > { %v4551_v46 = vpop.xlane.xlu0 %4550 }
 0xc6f   : > { %6023 = vrsqrt.f32 %v4595_v0  ;;  %v4580_v56 = vmul.f32 0.0078125, %v4551_v46 }
 0xc71   : > { %v4596_v61 = vadd.f32 1e-12, %v4580_v56 }
 0xc72   : > { %v4553_v2 = vpop.xlane.xlu1 %4552 }
 0xc73   : > { %6025 = vrsqrt.f32 %v4596_v61  ;;  %v4581_v12 = vmul.f32 0.0078125, %v4553_v2 }
 0xc75   : > { %v4597_v45 = vadd.f32 1e-12, %v4581_v12 }
 0xc77   : > { %6027 = vrsqrt.f32 %v4597_v45 }
 0xc78   : > { %v4555_v19 = vpop.xlane.xlu0 %4554  ;;  %v6022_v23 = vpop.eup %6021 }
 0xc79   : > { %v4582_v54 = vmul.f32 0.0078125, %v4555_v19  ;;  %v4626_v38 = vmul.f32 %v6022_v23, %v8591_v21 }
 0xc7b   : > { %v4598_v16 = vadd.f32 1e-12, %v4582_v54  ;;  %v4648_v13 = vmul.f32 %v8675_v17, %v4626_v38 }
 0xc7c   : > { %v4557_v59 = vpop.xlane.xlu1 %4556  ;;  %v6024_v49 = vpop.eup %6023 }
 0xc7d   : > { %6029 = vrsqrt.f32 %v4598_v16  ;;  %v4583_v35 = vmul.f32 0.0078125, %v4557_v59  ;;  %v4670_v47 = vadd.f32 %v8683_v20, %v4648_v13  ;;  %v4627_v41 = vmul.f32 %v6024_v49, %v8596_v25 }
 0xc7f   : > { %v4599_v21 = vadd.f32 1e-12, %v4583_v35  ;;  %4686 = vst [vmem:[%s6311_s12] sm:$0xff] %v4670_v47  ;;  %v4649_v18 = vmul.f32 %v8675_v17, %v4627_v41 }
 0xc80   : > { %v6026_v32 = vpop.eup %6025 }
 0xc81   : > { %6031 = vrsqrt.f32 %v4599_v21  ;;  %v4671_v36 = vadd.f32 %v8683_v20, %v4649_v18  ;;  %v4628_v60 = vmul.f32 %v6026_v32, %v8601_v30 }
 0xc83   : > { %4687 = vst [vmem:[%s6311_s12 + $0x8] sm:$0xff] %v4671_v36  ;;  %v4650_v55 = vmul.f32 %v8675_v17, %v4628_v60 }
 0xc84   : > { %v6028_v29 = vpop.eup %6027  ;;  %v4559_v40 = vpop.xlane.xlu0 %4558 }
 0xc85   : > { %v4672_v48 = vadd.f32 %v8683_v20, %v4650_v55  ;;  %v4629_v25 = vmul.f32 %v6028_v29, %v8606_v11  ;;  %v4584_v8 = vmul.f32 0.0078125, %v4559_v40 }
 0xc87   : > { %4688 = vst [vmem:[%s6311_s12 + $0x10] sm:$0xff] %v4672_v48  ;;  %v4651_v22 = vmul.f32 %v8675_v17, %v4629_v25  ;;  %v4600_v33 = vadd.f32 1e-12, %v4584_v8 }
 0xc88   : > { %v4561_v43 = vpop.xlane.xlu1 %4560 }
 0xc89   : > { %v4673_v30 = vadd.f32 %v8683_v20, %v4651_v22  ;;  %6033 = vrsqrt.f32 %v4600_v33  ;;  %v4585_v44 = vmul.f32 0.0078125, %v4561_v43 }
 0xc8a   : > { %v6030_v42 = vpop.eup %6029 }
 0xc8b   : > { %v4630_v7 = vmul.f32 %v6030_v42, %v8611_v34  ;;  %4689 = vst [vmem:[%s6311_s12 + $0x18] sm:$0xff] %v4673_v30  ;;  %v4601_v11 = vadd.f32 1e-12, %v4585_v44 }
 0xc8d   : > { %v4652_v6 = vmul.f32 %v8675_v17, %v4630_v7  ;;  %6035 = vrsqrt.f32 %v4601_v11 }
 0xc8e   : > { %v6032_v53 = vpop.eup %6031 }
 0xc8f   : > { %v4674_v52 = vadd.f32 %v8683_v20, %v4652_v6  ;;  %v4631_v10 = vmul.f32 %v6032_v53, %v8616_v5 }
 0xc91   : > { %4690 = vst [vmem:[%s6311_s12 + $0x20] sm:$0xff] %v4674_v52  ;;  %v4653_v28 = vmul.f32 %v8675_v17, %v4631_v10 }
 0xc93   : > { %v4675_v37 = vadd.f32 %v8683_v20, %v4653_v28 }
 0xc95   : > { %4691 = vst [vmem:[%s6311_s12 + $0x28] sm:$0xff] %v4675_v37 }
 0xc96   : > { %v6034_v34 = vpop.eup %6033 }
 0xc97   : > { %v4632_v1 = vmul.f32 %v6034_v34, %v8621_v31 }
 0xc99   : > { %v4654_v39 = vmul.f32 %v8675_v17, %v4632_v1 }
 0xc9a   : > { %v6036_v50 = vpop.eup %6035 }
 0xc9b   : > { %v4676_v63 = vadd.f32 %v8683_v20, %v4654_v39  ;;  %v4633_v51 = vmul.f32 %v6036_v50, %v8626_v15 }
 0xc9d   : > { %4692 = vst [vmem:[%s6311_s12 + $0x30] sm:$0xff] %v4676_v63  ;;  %v4655_v5 = vmul.f32 %v8675_v17, %v4633_v51 }
 0xc9f   : > { %v4677_v58 = vadd.f32 %v8683_v20, %v4655_v5 }
 0xca1   : > { %4693 = vst [vmem:[%s6311_s12 + $0x38] sm:$0xff] %v4677_v58 }
 0xcb7   : > { %v4563_v62 = vpop.xlane.xlu0 %4562 }
 0xcb8   : > { %v4586_v0 = vmul.f32 0.0078125, %v4563_v62 }
 0xcba   : > { %v4602_v46 = vadd.f32 1e-12, %v4586_v0 }
 0xcbb   : > { %v4565_v56 = vpop.xlane.xlu1 %4564 }
 0xcbc   : > { %6037 = vrsqrt.f32 %v4602_v46  ;;  %v4587_v61 = vmul.f32 0.0078125, %v4565_v56 }
 0xcbe   : > { %v4603_v31 = vadd.f32 1e-12, %v4587_v61 }
 0xcbf   : > { %v4567_v2 = vpop.xlane.xlu0 %4566 }
 0xcc0   : > { %6039 = vrsqrt.f32 %v4603_v31  ;;  %v4588_v12 = vmul.f32 0.0078125, %v4567_v2 }
 0xcc2   : > { %v4604_v45 = vadd.f32 1e-12, %v4588_v12 }
 0xcc3   : > { %v4569_v19 = vpop.xlane.xlu1 %4568 }
 0xcc4   : > { %6041 = vrsqrt.f32 %v4604_v45  ;;  %v4589_v15 = vmul.f32 0.0078125, %v4569_v19 }
 0xcc6   : > { %v4605_v54 = vadd.f32 1e-12, %v4589_v15 }
 0xcc8   : > { %6043 = vrsqrt.f32 %v4605_v54 }
 0xcc9   : > { %v6038_v23 = vpop.eup %6037 }
 0xcca   : > { %v4634_v38 = vmul.f32 %v6038_v23, %v8631_v26 }
 0xccc   : > { %v4656_v16 = vmul.f32 %v8675_v17, %v4634_v38 }
 0xccd   : > { %v6040_v59 = vpop.eup %6039 }
 0xcce   : > { %v4678_v13 = vadd.f32 %v8683_v20, %v4656_v16  ;;  %v4635_v35 = vmul.f32 %v6040_v59, %v8636_v14 }
 0xcd0   : > { %4694 = vst [vmem:[%s6311_s12 + $0x40] sm:$0xff] %v4678_v13  ;;  %v4657_v49 = vmul.f32 %v8675_v17, %v4635_v35 }
 0xcd1   : > { %v6042_v47 = vpop.eup %6041 }
 0xcd2   : > { %v4679_v41 = vadd.f32 %v8683_v20, %v4657_v49  ;;  %v4636_v21 = vmul.f32 %v6042_v47, %v8641_v27 }
 0xcd4   : > { %4695 = vst [vmem:[%s6311_s12 + $0x48] sm:$0xff] %v4679_v41  ;;  %v4658_v26 = vmul.f32 %v8675_v17, %v4636_v21 }
 0xcd5   : > { %v6044_v18 = vpop.eup %6043  ;;  %v4571_v32 = vpop.xlane.xlu0 %4570 }
 0xcd6   : > { %v4680_v36 = vadd.f32 %v8683_v20, %v4658_v26  ;;  %v4637_v60 = vmul.f32 %v6044_v18, %v8646_v9  ;;  %v4590_v55 = vmul.f32 0.0078125, %v4571_v32 }
 0xcd8   : > { %4696 = vst [vmem:[%s6311_s12 + $0x50] sm:$0xff] %v4680_v36  ;;  %v4659_v14 = vmul.f32 %v8675_v17, %v4637_v60  ;;  %v4606_v29 = vadd.f32 1e-12, %v4590_v55 }
 0xcd9   : > { %v4573_v40 = vpop.xlane.xlu1 %4572 }
 0xcda   : > { %v4681_v48 = vadd.f32 %v8683_v20, %v4659_v14  ;;  %6045 = vrsqrt.f32 %v4606_v29  ;;  %v4591_v25 = vmul.f32 0.0078125, %v4573_v40 }
 0xcdc   : > { %4697 = vst [vmem:[%s6311_s12 + $0x58] sm:$0xff] %v4681_v48  ;;  %v4607_v27 = vadd.f32 1e-12, %v4591_v25 }
 0xcdd   : > { %v4575_v8 = vpop.xlane.xlu0 %4574 }
 0xcde   : > { %6047 = vrsqrt.f32 %v4607_v27  ;;  %v4592_v22 = vmul.f32 0.0078125, %v4575_v8 }
 0xce0   : > { %v4608_v33 = vadd.f32 1e-12, %v4592_v22 }
 0xce1   : > { %v4577_v42 = vpop.xlane.xlu1 %4576 }
 0xce2   : > { %6049 = vrsqrt.f32 %v4608_v33  ;;  %v4593_v9 = vmul.f32 0.0078125, %v4577_v42 }
 0xce4   : > { %v4609_v43 = vadd.f32 1e-12, %v4593_v9 }
 0xce6   : > { %6051 = vrsqrt.f32 %v4609_v43 }
 0xce7   : > { %v6046_v30 = vpop.eup %6045 }
 0xce8   : > { %v4638_v7 = vmul.f32 %v6046_v30, %v8651_v4 }
 0xcea   : > { %v4660_v44 = vmul.f32 %v8675_v17, %v4638_v7 }
 0xceb   : > { %v6048_v6 = vpop.eup %6047 }
 0xcec   : > { %v4682_v11 = vadd.f32 %v8683_v20, %v4660_v44  ;;  %v4639_v53 = vmul.f32 %v6048_v6, %v8656_v57 }
 0xcee   : > { %4698 = vst [vmem:[%s6311_s12 + $0x60] sm:$0xff] %v4682_v11  ;;  %v4661_v52 = vmul.f32 %v8675_v17, %v4639_v53 }
 0xcef   : > { %v6050_v10 = vpop.eup %6049 }
 0xcf0   : > { %v4683_v28 = vadd.f32 %v8683_v20, %v4661_v52  ;;  %v4640_v37 = vmul.f32 %v6050_v10, %v8661_v3 }
 0xcf2   : > { %4699 = vst [vmem:[%s6311_s12 + $0x68] sm:$0xff] %v4683_v28  ;;  %v4662_v34 = vmul.f32 %v8675_v17, %v4640_v37 }
 0xcf3   : > { %v6052_v4 = vpop.eup %6051 }
 0xcf4   : > { %v4684_v1 = vadd.f32 %v8683_v20, %v4662_v34  ;;  %v4641_v39 = vmul.f32 %v6052_v4, %v8666_v24 }
 0xcf6   : > { %4700 = vst [vmem:[%s6311_s12 + $0x70] sm:$0xff] %v4684_v1  ;;  %v4663_v50 = vmul.f32 %v8675_v17, %v4641_v39 }
 0xcf8   : > { %v4685_v57 = vadd.f32 %v8683_v20, %v4663_v50 }
 0xcfa   : > { %4701 = vst [vmem:[%s6311_s12 + $0x78] sm:$0xff] %v4685_v57 }
 0xcfb PF: > { %s8970_s11 = sld [smem:[#allocation5_spill]] }
 0xcfc   : > { %s8971_s24 = sld [smem:[#allocation3_spill]] }
 0xcfd   : > { %s8972_s25 = sld [smem:[#allocation4_spill]] }
 0xcfe   : > { %s8973_s26 = sld [smem:[#allocation6_spill]] }
 0xcff   : > { %s8974_s27 = sld [smem:[#allocation7_spill]] }
 0xd01   : > { %s27_s28 = sadd.s32 1, %s8970_s11  }
 0xd02   : > { %p24_p8 = scmp.ge.s32.totalorder %s27_s28, 6  }
 0xd04   :  { %26 = sbr.rel (!%p24_p8) target bundleno = 12 (0xc), region = 161 }

</bundles_post_ra>
